<compile_context>
chip_gen: v5e
topology: v5e:2x2
jax: 0.10.0
libtpu: 0.0.40
codegen_flags: <defaults>
</compile_context>

<pallas_src>
import functools

import numpy as np
import jax
import jax.numpy as jnp
from jax import lax
from jax.experimental import pallas as pl
from jax.experimental.pallas import tpu as pltpu


# ----------------------------------------------------------------------------
# Fully fused Pallas kernel (one grid step = TB samples)
# ----------------------------------------------------------------------------
def _regressor_kernel(x1_ref,
                      w1_ref, b1_ref, s1_ref, t1_ref,
                      w2t_ref, w2b_ref, b2_ref, s2_ref, t2_ref,
                      w3t_ref, w3b_ref, b3_ref, s3_ref, t3_ref,
                      w4t_ref, w4b_ref, b4_ref,
                      wf1a_ref, wf1b_ref, bf1_ref, s4_ref, t4_ref,
                      wf2_ref, bf2_ref, wf3_ref, bf3_ref,
                      whd_ref, bhd_ref,
                      o_ref, *, tb):
    f32 = jnp.float32

    # conv1 (+folded bn0, relu, bn1): ONE matmul over all 12*tb output rows.
    # LHS rows ordered (group g in j-order [0,2,1,3], m, sample); 48 cols =
    # (top 24 px | bottom 24 px).  Output lanes = (col, channel), padded->256.
    y1 = jnp.dot(x1_ref[...], w1_ref[...], preferred_element_type=f32)
    y1 = jnp.maximum(y1 + b1_ref[...], 0.0) * s1_ref[...] + t1_ref[...]

    # conv2 (+relu, bn2): one fused pair over M = 6*tb
    # top rows (h1 even) = groups {j=0, j=2}; bottom rows (h1 odd) = {j=1, j=3}.
    y2 = jnp.dot(y1[:6 * tb], w2t_ref[...], preferred_element_type=f32)
    y2 = y2 + jnp.dot(y1[6 * tb:], w2b_ref[...], preferred_element_type=f32)
    y2 = jnp.maximum(y2 + b2_ref[...], 0.0) * s2_ref[...] + t2_ref[...]

    # conv3 (+relu, bn3): M = 3*tb (top = even h2, bottom = odd h2).
    y3 = jnp.dot(y2[:3 * tb], w3t_ref[...], preferred_element_type=f32)
    y3 = y3 + jnp.dot(y2[3 * tb:], w3b_ref[...], preferred_element_type=f32)
    y3 = jnp.maximum(y3 + b3_ref[...], 0.0) * s3_ref[...] + t3_ref[...]

    # conv4 (2x2, stride 1) + relu: M = 2*tb; rows [0:tb] -> h4=0, [tb:2tb] -> h4=1.
    y4 = jnp.dot(y3[:2 * tb], w4t_ref[...], preferred_element_type=f32)
    y4 = y4 + jnp.dot(y3[tb:], w4b_ref[...], preferred_element_type=f32)
    y4 = jnp.maximum(y4 + b4_ref[...], 0.0)

    # flatten + fc1 (+relu, bn4): flatten folded into the split/permuted fc1 weight.
    h = jnp.dot(y4[:tb], wf1a_ref[...], preferred_element_type=f32)
    h = h + jnp.dot(y4[tb:], wf1b_ref[...], preferred_element_type=f32)
    h = jnp.maximum(h + bf1_ref[...], 0.0) * s4_ref[...] + t4_ref[...]

    # fc2 + leaky_relu(0.01)
    h = jnp.dot(h, wf2_ref[...], preferred_element_type=f32) + bf2_ref[...]
    h = jnp.where(h >= 0.0, h, 0.01 * h)

    # fc3 + tanh (output lane-padded to 128; padded lanes stay exactly 0).
    h = jnp.tanh(jnp.dot(h, wf3_ref[...], preferred_element_type=f32) + bf3_ref[...])

    # merged heads (fc4 | fc5 | zero pad) -> one unmasked lane-dense (tb, 128) store.
    o_ref[...] = (jnp.dot(h, whd_ref[...], preferred_element_type=f32)
                  + bhd_ref[...]).astype(o_ref.dtype)


# ----------------------------------------------------------------------------
# Host-side (one-time) parameter packing
# ----------------------------------------------------------------------------
def _bn_fold(gamma, beta, mean, var, eps=1e-5):
    scale = gamma / jnp.sqrt(var + eps)
    return scale, beta - mean * scale


def _expand_conv_w(w, w_in, w_out, stride):
    """Expand a 2x2 conv weight (Cout, Cin, 2, 2) into two block matrices.

    Returns (W_top, W_bot), each (w_in*Cin, w_out*Cout), so that for an
    activation row laid out as lanes (col, channel):
        out_row = top_image_row @ W_top + bot_image_row @ W_bot
    """
    cout, cin = int(w.shape[0]), int(w.shape[1])
    w = w.astype(jnp.float32)
    mats = []
    for kh in range(2):
        acc = jnp.zeros((w_in * cin, w_out * cout), jnp.float32)
        for kw in range(2):
            sel = np.zeros((w_in, w_out), np.float32)
            for wo in range(w_out):
                sel[stride * wo + kw, wo] = 1.0
            acc = acc + jnp.kron(jnp.asarray(sel), w[:, :, kh, kw].T)
        mats.append(acc)
    return mats[0], mats[1]


def pack_params(p):
    """Fold BN stats and repack weights into the fused kernel's lane-padded layout."""
    f32 = jnp.float32

    def row(v, width):
        v = jnp.asarray(v, f32).reshape(-1)
        return jnp.pad(v, (0, width - v.shape[0])).reshape(1, width)

    def tiled(v, reps, width):
        return row(jnp.tile(jnp.asarray(v, f32), reps), width)

    def padmat(m, rows, cols):
        m = jnp.asarray(m, f32)
        return jnp.pad(m, ((0, rows - m.shape[0]), (0, cols - m.shape[1])))

    # batchnorm0 folded exactly into conv1 (single input channel => scalar affine)
    a0, b0 = _bn_fold(**p["bn0"])
    w1_eff = p["conv1_w"].astype(f32) * a0[0]
    b1_eff = p["conv1_b"] + b0[0] * p["conv1_w"].sum(axis=(1, 2, 3))

    s1, t1 = _bn_fold(**p["bn1"])
    s2, t2 = _bn_fold(**p["bn2"])
    s3, t3 = _bn_fold(**p["bn3"])
    s4, t4 = _bn_fold(**p["bn4"])

    # conv1: merge W_top/W_bot into one (48, 256) weight (LHS cols = top|bottom).
    w1t, w1b = _expand_conv_w(w1_eff, 24, 12, 2)        # each (24, 192)
    w1 = padmat(jnp.concatenate([w1t, w1b], axis=0), 48, 256)

    w2t, w2b = _expand_conv_w(p["conv2_w"], 12, 6, 2)   # (192, 192) each
    w3t, w3b = _expand_conv_w(p["conv3_w"], 6, 3, 2)    # (192, 192) each
    w4t, w4b = _expand_conv_w(p["conv4_w"], 3, 2, 1)    # (192, 128) each

    # fc1: permute input rows from PyTorch flatten order (c, h, w) to the
    # kernel's (h, w, c) order, then split into the h4=0 / h4=1 halves.
    perm = np.array([c * 4 + h * 2 + w
                     for h in range(2) for w in range(2) for c in range(64)],
                    np.int32)
    wf1 = p["fc1_w"].T.astype(f32)[perm, :]             # (256, 256)

    # merged lane-padded heads: columns [0:5] = fc4, [5:6] = fc5, rest zero;
    # rows padded 64->128 (fc3 output is lane-padded to 128 with exact zeros).
    whd = jnp.concatenate(
        [p["fc4_w"].T.astype(f32), p["fc5_w"].T.astype(f32),
         jnp.zeros((64, 122), f32)], axis=1)            # (64, 128)
    bhd = jnp.concatenate(
        [p["fc4_b"].astype(f32), p["fc5_b"].astype(f32), jnp.zeros((122,), f32)])

    return dict(
        w1=w1,
        b1=tiled(b1_eff, 12, 256), s1=tiled(s1, 12, 256), t1=tiled(t1, 12, 256),
        w2t=padmat(w2t, 256, 256), w2b=padmat(w2b, 256, 256),
        b2=tiled(p["conv2_b"], 6, 256), s2=tiled(s2, 6, 256), t2=tiled(t2, 6, 256),
        w3t=padmat(w3t, 256, 256), w3b=padmat(w3b, 256, 256),
        b3=tiled(p["conv3_b"], 3, 256), s3=tiled(s3, 3, 256), t3=tiled(t3, 3, 256),
        w4t=padmat(w4t, 256, 128), w4b=padmat(w4b, 256, 128),
        b4=tiled(p["conv4_b"], 2, 128),
        wf1a=wf1[:128], wf1b=wf1[128:], bf1=row(p["fc1_b"], 256),
        s4=row(s4, 256), t4=row(t4, 256),
        wf2=p["fc2_w"].T.astype(f32), bf2=row(p["fc2_b"], 128),
        wf3=padmat(p["fc3_w"].T.astype(f32), 128, 128), bf3=row(p["fc3_b"], 128),
        whd=padmat(whd, 128, 128), bhd=row(bhd, 128),
    )


# ----------------------------------------------------------------------------
# Forward pass wrapper (single pallas_call, batch-tiled grid)
# ----------------------------------------------------------------------------
_ARG_ORDER = ("w1", "b1", "s1", "t1",
              "w2t", "w2b", "b2", "s2", "t2",
              "w3t", "w3b", "b3", "s3", "t3",
              "w4t", "w4b", "b4",
              "wf1a", "wf1b", "bf1", "s4", "t4",
              "wf2", "bf2", "wf3", "bf3", "whd", "bhd")


def _round_up(a, b):
    return (a + b - 1) // b * b


def _pack_input(x, tb):
    """(N,1,24,24) -> merged-conv1 LHS of shape (nb*12*tb, 48), plus nb, n_pad.

    Per batch block the rows are ordered (group g over j=[0,2,1,3], m, sample)
    where input row h = 8*m + 2*j + r; the 48 columns are (r, w) = top|bottom.
    """
    # NOTE: this regrouping is a host-side relayout of the input; for very
    # large N it should be fused into whatever produces x upstream.
    n = x.shape[0]
    n_pad = _round_up(n, tb)
    nb = n_pad // tb
    xs = x.reshape(n, 24, 24).astype(jnp.float32)
    if n_pad != n:
        xs = jnp.concatenate(
            [xs, jnp.zeros((n_pad - n, 24, 24), jnp.float32)], axis=0)
    x6 = xs.reshape(nb, tb, 3, 4, 2, 24)                 # (b, s, m, j, r, w)
    x6 = x6[:, :, :, jnp.array([0, 2, 1, 3]), :, :]      # j -> group order
    x6 = x6.transpose(0, 3, 2, 1, 4, 5)                  # (b, g, m, s, r, w)
    return x6.reshape(nb * 12 * tb, 48), nb, n_pad


def _wspec(shape):
    return pl.BlockSpec(tuple(int(d) for d in shape), lambda i: (0, 0))


def regressor_forward(x, pk, *, tb=None):
    """x: (N, 1, 24, 24) float32 NCHW -> (out4: (N, 5), out5: (N, 1))."""
    n = x.shape[0]
    if tb is None:
        tb = min(128, _round_up(n, 8))   # batch tile; multiple of 8 by construction
    x1, nb, n_pad = _pack_input(x, tb)

    args = [x1] + [pk[k] for k in _ARG_ORDER]

    # VMEM footprint @ tb=128: ~1.9 MiB weights + <6 MiB activations/buffers.
    out = pl.pallas_call(
        functools.partial(_regressor_kernel, tb=tb),
        out_shape=jax.ShapeDtypeStruct((n_pad, 128), jnp.float32),
        grid=(nb,),
        in_specs=[pl.BlockSpec((12 * tb, 48), lambda i: (i, 0))]
                 + [_wspec(pk[k].shape) for k in _ARG_ORDER],
        out_specs=pl.BlockSpec((tb, 128), lambda i: (i, 0)),
        compiler_params=pltpu.CompilerParams(
            dimension_semantics=("parallel",),
            vmem_limit_bytes=32 * 1024 * 1024),
        cost_estimate=pl.CostEstimate(
            flops=int(3.2e6) * n_pad,
            transcendentals=128 * n_pad,
            bytes_accessed=int(2.9e3 * n_pad + 1.9e6)),
    )(*args)
    return out[:n, :5], out[:n, 5:6]


# ----------------------------------------------------------------------------
# Plain-JAX reference (same eval semantics) for an in-script numerical check
# ----------------------------------------------------------------------------
def _conv_ref(x, w, b, stride):
    y = lax.conv_general_dilated(x, w, (stride, stride), "VALID",
                                 dimension_numbers=("NCHW", "OIHW", "NCHW"))
    return y + b[None, :, None, None]


def _bn_ref(x, bnp, eps=1e-5):
    s = bnp["gamma"] / jnp.sqrt(bnp["var"] + eps)
    t = bnp["beta"] - bnp["mean"] * s
    return x * s[None, :, None, None] + t[None, :, None, None]


def reference_forward(x, p):
    h = _bn_ref(x, p["bn0"])
    h = _bn_ref(jax.nn.relu(_conv_ref(h, p["conv1_w"], p["conv1_b"], 2)), p["bn1"])
    h = _bn_ref(jax.nn.relu(_conv_ref(h, p["conv2_w"], p["conv2_b"], 2)), p["bn2"])
    h = _bn_ref(jax.nn.relu(_conv_ref(h, p["conv3_w"], p["conv3_b"], 2)), p["bn3"])
    h = jax.nn.relu(_conv_ref(h, p["conv4_w"], p["conv4_b"], 1))
    h = h.reshape(h.shape[0], -1)
    s4, t4 = _bn_fold(**p["bn4"])
    h = jax.nn.relu(h @ p["fc1_w"].T + p["fc1_b"]) * s4 + t4
    z = h @ p["fc2_w"].T + p["fc2_b"]
    h = jnp.where(z >= 0.0, z, 0.01 * z)
    h = jnp.tanh(h @ p["fc3_w"].T + p["fc3_b"])
    return h @ p["fc4_w"].T + p["fc4_b"], h @ p["fc5_w"].T + p["fc5_b"]


# ----------------------------------------------------------------------------
# Deterministic synthetic parameters
# ----------------------------------------------------------------------------
def init_params(key):
    keys = iter(jax.random.split(key, 40))

    def nrm(shape, s=0.1):
        return s * jax.random.normal(next(keys), shape, jnp.float32)

    def bn(c):
        return dict(
            gamma=1.0 + 0.1 * jax.random.normal(next(keys), (c,), jnp.float32),
            beta=0.1 * jax.random.normal(next(keys), (c,), jnp.float32),
            mean=0.1 * jax.random.normal(next(keys), (c,), jnp.float32),
            var=jnp.abs(1.0 + 0.1 * jax.random.normal(next(keys), (c,), jnp.float32)),
        )

    p = {}
    p["bn0"] = bn(1)
    p["conv1_w"], p["conv1_b"] = nrm((16, 1, 2, 2)), nrm((16,))
    p["bn1"] = bn(16)
    p["conv2_w"], p["conv2_b"] = nrm((32, 16, 2, 2)), nrm((32,))
    p["bn2"] = bn(32)
    p["conv3_w"], p["conv3_b"] = nrm((64, 32, 2, 2)), nrm((64,))
    p["bn3"] = bn(64)
    p["conv4_w"], p["conv4_b"] = nrm((64, 64, 2, 2)), nrm((64,))
    p["fc1_w"], p["fc1_b"] = nrm((256, 256)), nrm((256,))
    p["bn4"] = bn(256)
    p["fc2_w"], p["fc2_b"] = nrm((128, 256)), nrm((128,))
    p["fc3_w"], p["fc3_b"] = nrm((64, 128)), nrm((64,))
    p["fc4_w"], p["fc4_b"] = nrm((5, 64)), nrm((5,))
    p["fc5_w"], p["fc5_b"] = nrm((1, 64)), nrm((1,))
    return p


if __name__ == "__main__":
    key = jax.random.PRNGKey(0)
    kx, kx2, kp = jax.random.split(key, 3)
    # Spatial must be 24x24 so conv4 output is 2x2 -> 64*2*2 = 256 = fc1 in.
    x = jax.random.normal(kx, (2, 1, 24, 24), jnp.float32)
    params = init_params(kp)

    packed = pack_params(params)          # one-time host-side repack (static weights)
    fwd = jax.jit(regressor_forward, static_argnames=("tb",))

    # Small-batch run (batch padded 2 -> 8 inside the wrapper, trimmed on return).
    out4, out5 = fwd(x, packed)
    jax.block_until_ready((out4, out5))
    assert out4.shape == (2, 5) and out5.shape == (2, 1)
    assert bool(jnp.all(jnp.isfinite(out4))) and bool(jnp.all(jnp.isfinite(out5)))

    ref4, ref5 = reference_forward(x, params)
    assert float(jnp.max(jnp.abs(out4 - ref4))) < 3e-2
    assert float(jnp.max(jnp.abs(out5 - ref5))) < 3e-2

    # Exercise the multi-block "parallel" grid path + batch padding/trim.
    x2 = jax.random.normal(kx2, (20, 1, 24, 24), jnp.float32)
    o4b, o5b = fwd(x2, packed, tb=8)      # 20 -> pad 24, grid=(3,)
    jax.block_until_ready((o4b, o5b))
    r4b, r5b = reference_forward(x2, params)
    assert o4b.shape == (20, 5) and o5b.shape == (20, 1)
    assert float(jnp.max(jnp.abs(o4b - r4b))) < 3e-2
    assert float(jnp.max(jnp.abs(o5b - r5b))) < 3e-2

    print("KERNEL_OK")
</pallas_src>

<mosaic_0001>
module attributes {stable_mosaic.version = 11 : i64} {
  func.func @_regressor_kernel(%arg0: i32, %arg1: memref<96x48xf32, #tpu.memory_space<vmem>>, %arg2: memref<48x256xf32, #tpu.memory_space<vmem>>, %arg3: memref<1x256xf32, #tpu.memory_space<vmem>>, %arg4: memref<1x256xf32, #tpu.memory_space<vmem>>, %arg5: memref<1x256xf32, #tpu.memory_space<vmem>>, %arg6: memref<256x256xf32, #tpu.memory_space<vmem>>, %arg7: memref<256x256xf32, #tpu.memory_space<vmem>>, %arg8: memref<1x256xf32, #tpu.memory_space<vmem>>, %arg9: memref<1x256xf32, #tpu.memory_space<vmem>>, %arg10: memref<1x256xf32, #tpu.memory_space<vmem>>, %arg11: memref<256x256xf32, #tpu.memory_space<vmem>>, %arg12: memref<256x256xf32, #tpu.memory_space<vmem>>, %arg13: memref<1x256xf32, #tpu.memory_space<vmem>>, %arg14: memref<1x256xf32, #tpu.memory_space<vmem>>, %arg15: memref<1x256xf32, #tpu.memory_space<vmem>>, %arg16: memref<256x128xf32, #tpu.memory_space<vmem>>, %arg17: memref<256x128xf32, #tpu.memory_space<vmem>>, %arg18: memref<1x128xf32, #tpu.memory_space<vmem>>, %arg19: memref<128x256xf32, #tpu.memory_space<vmem>>, %arg20: memref<128x256xf32, #tpu.memory_space<vmem>>, %arg21: memref<1x256xf32, #tpu.memory_space<vmem>>, %arg22: memref<1x256xf32, #tpu.memory_space<vmem>>, %arg23: memref<1x256xf32, #tpu.memory_space<vmem>>, %arg24: memref<256x128xf32, #tpu.memory_space<vmem>>, %arg25: memref<1x128xf32, #tpu.memory_space<vmem>>, %arg26: memref<128x128xf32, #tpu.memory_space<vmem>>, %arg27: memref<1x128xf32, #tpu.memory_space<vmem>>, %arg28: memref<128x128xf32, #tpu.memory_space<vmem>>, %arg29: memref<1x128xf32, #tpu.memory_space<vmem>>, %arg30: memref<8x128xf32, #tpu.memory_space<vmem>>) attributes {dimension_semantics = [#tpu.dimension_semantics<parallel>], iteration_bounds = array<i64: 1>, scalar_prefetch = 0 : i64, scratch_operands = 0 : i64, tpu.core_type = #tpu.core_type<tc>, window_params = [{transform_indices = @transform_0, window_bounds = array<i64: 96, 48>}, {pipeline_mode = #tpu.pipeline_mode<synchronous>, transform_indices = @transform_1, window_bounds = array<i64: 48, 256>}, {pipeline_mode = #tpu.pipeline_mode<synchronous>, transform_indices = @transform_2, window_bounds = array<i64: 1, 256>}, {pipeline_mode = #tpu.pipeline_mode<synchronous>, transform_indices = @transform_3, window_bounds = array<i64: 1, 256>}, {pipeline_mode = #tpu.pipeline_mode<synchronous>, transform_indices = @transform_4, window_bounds = array<i64: 1, 256>}, {pipeline_mode = #tpu.pipeline_mode<synchronous>, transform_indices = @transform_5, window_bounds = array<i64: 256, 256>}, {pipeline_mode = #tpu.pipeline_mode<synchronous>, transform_indices = @transform_6, window_bounds = array<i64: 256, 256>}, {pipeline_mode = #tpu.pipeline_mode<synchronous>, transform_indices = @transform_7, window_bounds = array<i64: 1, 256>}, {pipeline_mode = #tpu.pipeline_mode<synchronous>, transform_indices = @transform_8, window_bounds = array<i64: 1, 256>}, {pipeline_mode = #tpu.pipeline_mode<synchronous>, transform_indices = @transform_9, window_bounds = array<i64: 1, 256>}, {pipeline_mode = #tpu.pipeline_mode<synchronous>, transform_indices = @transform_10, window_bounds = array<i64: 256, 256>}, {pipeline_mode = #tpu.pipeline_mode<synchronous>, transform_indices = @transform_11, window_bounds = array<i64: 256, 256>}, {pipeline_mode = #tpu.pipeline_mode<synchronous>, transform_indices = @transform_12, window_bounds = array<i64: 1, 256>}, {pipeline_mode = #tpu.pipeline_mode<synchronous>, transform_indices = @transform_13, window_bounds = array<i64: 1, 256>}, {pipeline_mode = #tpu.pipeline_mode<synchronous>, transform_indices = @transform_14, window_bounds = array<i64: 1, 256>}, {pipeline_mode = #tpu.pipeline_mode<synchronous>, transform_indices = @transform_15, window_bounds = array<i64: 256, 128>}, {pipeline_mode = #tpu.pipeline_mode<synchronous>, transform_indices = @transform_16, window_bounds = array<i64: 256, 128>}, {pipeline_mode = #tpu.pipeline_mode<synchronous>, transform_indices = @transform_17, window_bounds = array<i64: 1, 128>}, {pipeline_mode = #tpu.pipeline_mode<synchronous>, transform_indices = @transform_18, window_bounds = array<i64: 128, 256>}, {pipeline_mode = #tpu.pipeline_mode<synchronous>, transform_indices = @transform_19, window_bounds = array<i64: 128, 256>}, {pipeline_mode = #tpu.pipeline_mode<synchronous>, transform_indices = @transform_20, window_bounds = array<i64: 1, 256>}, {pipeline_mode = #tpu.pipeline_mode<synchronous>, transform_indices = @transform_21, window_bounds = array<i64: 1, 256>}, {pipeline_mode = #tpu.pipeline_mode<synchronous>, transform_indices = @transform_22, window_bounds = array<i64: 1, 256>}, {pipeline_mode = #tpu.pipeline_mode<synchronous>, transform_indices = @transform_23, window_bounds = array<i64: 256, 128>}, {pipeline_mode = #tpu.pipeline_mode<synchronous>, transform_indices = @transform_24, window_bounds = array<i64: 1, 128>}, {pipeline_mode = #tpu.pipeline_mode<synchronous>, transform_indices = @transform_25, window_bounds = array<i64: 128, 128>}, {pipeline_mode = #tpu.pipeline_mode<synchronous>, transform_indices = @transform_26, window_bounds = array<i64: 1, 128>}, {pipeline_mode = #tpu.pipeline_mode<synchronous>, transform_indices = @transform_27, window_bounds = array<i64: 128, 128>}, {pipeline_mode = #tpu.pipeline_mode<synchronous>, transform_indices = @transform_28, window_bounds = array<i64: 1, 128>}, {transform_indices = @transform_29, window_bounds = array<i64: 8, 128>}]} {
    %c0 = arith.constant 0 : index
    %c0_0 = arith.constant 0 : index
    %0 = vector.load %arg1[%c0, %c0_0] : memref<96x48xf32, #tpu.memory_space<vmem>>, vector<96x48xf32>
    %c0_1 = arith.constant 0 : index
    %c0_2 = arith.constant 0 : index
    %1 = vector.load %arg2[%c0_1, %c0_2] : memref<48x256xf32, #tpu.memory_space<vmem>>, vector<48x256xf32>
    %cst = arith.constant dense<0.000000e+00> : vector<96x256xf32>
    %2 = tpu.matmul %0, %1, %cst {dimension_numbers = #tpu.dot_dimension_numbers<[1], [0], [0], [1], [0, 0, 1, 1], [], []>} : vector<96x48xf32>, vector<48x256xf32>, vector<96x256xf32> -> vector<96x256xf32>
    %c0_3 = arith.constant 0 : index
    %c0_4 = arith.constant 0 : index
    %3 = vector.load %arg3[%c0_3, %c0_4] : memref<1x256xf32, #tpu.memory_space<vmem>>, vector<1x256xf32>
    %4 = vector.broadcast %3 : vector<1x256xf32> to vector<96x256xf32>
    %5 = arith.addf %2, %4 : vector<96x256xf32>
    %cst_5 = arith.constant 0.000000e+00 : f32
    %6 = vector.broadcast %cst_5 : f32 to vector<96x256xf32>
    %7 = arith.maximumf %5, %6 : vector<96x256xf32>
    %c0_6 = arith.constant 0 : index
    %c0_7 = arith.constant 0 : index
    %8 = vector.load %arg4[%c0_6, %c0_7] : memref<1x256xf32, #tpu.memory_space<vmem>>, vector<1x256xf32>
    %9 = vector.broadcast %8 : vector<1x256xf32> to vector<96x256xf32>
    %10 = arith.mulf %7, %9 : vector<96x256xf32>
    %c0_8 = arith.constant 0 : index
    %c0_9 = arith.constant 0 : index
    %11 = vector.load %arg5[%c0_8, %c0_9] : memref<1x256xf32, #tpu.memory_space<vmem>>, vector<1x256xf32>
    %12 = vector.broadcast %11 : vector<1x256xf32> to vector<96x256xf32>
    %13 = arith.addf %10, %12 : vector<96x256xf32>
    %14 = vector.extract_strided_slice %13 {offsets = [0, 0], sizes = [48, 256], strides = [1, 1]} : vector<96x256xf32> to vector<48x256xf32>
    %c0_10 = arith.constant 0 : index
    %c0_11 = arith.constant 0 : index
    %15 = vector.load %arg6[%c0_10, %c0_11] : memref<256x256xf32, #tpu.memory_space<vmem>>, vector<256x256xf32>
    %cst_12 = arith.constant dense<0.000000e+00> : vector<48x256xf32>
    %16 = tpu.matmul %14, %15, %cst_12 {dimension_numbers = #tpu.dot_dimension_numbers<[1], [0], [0], [1], [0, 0, 1, 1], [], []>} : vector<48x256xf32>, vector<256x256xf32>, vector<48x256xf32> -> vector<48x256xf32>
    %17 = vector.extract_strided_slice %13 {offsets = [48, 0], sizes = [48, 256], strides = [1, 1]} : vector<96x256xf32> to vector<48x256xf32>
    %c0_13 = arith.constant 0 : index
    %c0_14 = arith.constant 0 : index
    %18 = vector.load %arg7[%c0_13, %c0_14] : memref<256x256xf32, #tpu.memory_space<vmem>>, vector<256x256xf32>
    %cst_15 = arith.constant dense<0.000000e+00> : vector<48x256xf32>
    %19 = tpu.matmul %17, %18, %cst_15 {dimension_numbers = #tpu.dot_dimension_numbers<[1], [0], [0], [1], [0, 0, 1, 1], [], []>} : vector<48x256xf32>, vector<256x256xf32>, vector<48x256xf32> -> vector<48x256xf32>
    %20 = arith.addf %16, %19 : vector<48x256xf32>
    %c0_16 = arith.constant 0 : index
    %c0_17 = arith.constant 0 : index
    %21 = vector.load %arg8[%c0_16, %c0_17] : memref<1x256xf32, #tpu.memory_space<vmem>>, vector<1x256xf32>
    %22 = vector.broadcast %21 : vector<1x256xf32> to vector<48x256xf32>
    %23 = arith.addf %20, %22 : vector<48x256xf32>
    %cst_18 = arith.constant 0.000000e+00 : f32
    %24 = vector.broadcast %cst_18 : f32 to vector<48x256xf32>
    %25 = arith.maximumf %23, %24 : vector<48x256xf32>
    %c0_19 = arith.constant 0 : index
    %c0_20 = arith.constant 0 : index
    %26 = vector.load %arg9[%c0_19, %c0_20] : memref<1x256xf32, #tpu.memory_space<vmem>>, vector<1x256xf32>
    %27 = vector.broadcast %26 : vector<1x256xf32> to vector<48x256xf32>
    %28 = arith.mulf %25, %27 : vector<48x256xf32>
    %c0_21 = arith.constant 0 : index
    %c0_22 = arith.constant 0 : index
    %29 = vector.load %arg10[%c0_21, %c0_22] : memref<1x256xf32, #tpu.memory_space<vmem>>, vector<1x256xf32>
    %30 = vector.broadcast %29 : vector<1x256xf32> to vector<48x256xf32>
    %31 = arith.addf %28, %30 : vector<48x256xf32>
    %32 = vector.extract_strided_slice %31 {offsets = [0, 0], sizes = [24, 256], strides = [1, 1]} : vector<48x256xf32> to vector<24x256xf32>
    %c0_23 = arith.constant 0 : index
    %c0_24 = arith.constant 0 : index
    %33 = vector.load %arg11[%c0_23, %c0_24] : memref<256x256xf32, #tpu.memory_space<vmem>>, vector<256x256xf32>
    %cst_25 = arith.constant dense<0.000000e+00> : vector<24x256xf32>
    %34 = tpu.matmul %32, %33, %cst_25 {dimension_numbers = #tpu.dot_dimension_numbers<[1], [0], [0], [1], [0, 0, 1, 1], [], []>} : vector<24x256xf32>, vector<256x256xf32>, vector<24x256xf32> -> vector<24x256xf32>
    %35 = vector.extract_strided_slice %31 {offsets = [24, 0], sizes = [24, 256], strides = [1, 1]} : vector<48x256xf32> to vector<24x256xf32>
    %c0_26 = arith.constant 0 : index
    %c0_27 = arith.constant 0 : index
    %36 = vector.load %arg12[%c0_26, %c0_27] : memref<256x256xf32, #tpu.memory_space<vmem>>, vector<256x256xf32>
    %cst_28 = arith.constant dense<0.000000e+00> : vector<24x256xf32>
    %37 = tpu.matmul %35, %36, %cst_28 {dimension_numbers = #tpu.dot_dimension_numbers<[1], [0], [0], [1], [0, 0, 1, 1], [], []>} : vector<24x256xf32>, vector<256x256xf32>, vector<24x256xf32> -> vector<24x256xf32>
    %38 = arith.addf %34, %37 : vector<24x256xf32>
    %c0_29 = arith.constant 0 : index
    %c0_30 = arith.constant 0 : index
    %39 = vector.load %arg13[%c0_29, %c0_30] : memref<1x256xf32, #tpu.memory_space<vmem>>, vector<1x256xf32>
    %40 = vector.broadcast %39 : vector<1x256xf32> to vector<24x256xf32>
    %41 = arith.addf %38, %40 : vector<24x256xf32>
    %cst_31 = arith.constant 0.000000e+00 : f32
    %42 = vector.broadcast %cst_31 : f32 to vector<24x256xf32>
    %43 = arith.maximumf %41, %42 : vector<24x256xf32>
    %c0_32 = arith.constant 0 : index
    %c0_33 = arith.constant 0 : index
    %44 = vector.load %arg14[%c0_32, %c0_33] : memref<1x256xf32, #tpu.memory_space<vmem>>, vector<1x256xf32>
    %45 = vector.broadcast %44 : vector<1x256xf32> to vector<24x256xf32>
    %46 = arith.mulf %43, %45 : vector<24x256xf32>
    %c0_34 = arith.constant 0 : index
    %c0_35 = arith.constant 0 : index
    %47 = vector.load %arg15[%c0_34, %c0_35] : memref<1x256xf32, #tpu.memory_space<vmem>>, vector<1x256xf32>
    %48 = vector.broadcast %47 : vector<1x256xf32> to vector<24x256xf32>
    %49 = arith.addf %46, %48 : vector<24x256xf32>
    %50 = vector.extract_strided_slice %49 {offsets = [0, 0], sizes = [16, 256], strides = [1, 1]} : vector<24x256xf32> to vector<16x256xf32>
    %c0_36 = arith.constant 0 : index
    %c0_37 = arith.constant 0 : index
    %51 = vector.load %arg16[%c0_36, %c0_37] : memref<256x128xf32, #tpu.memory_space<vmem>>, vector<256x128xf32>
    %cst_38 = arith.constant dense<0.000000e+00> : vector<16x128xf32>
    %52 = tpu.matmul %50, %51, %cst_38 {dimension_numbers = #tpu.dot_dimension_numbers<[1], [0], [0], [1], [0, 0, 1, 1], [], []>} : vector<16x256xf32>, vector<256x128xf32>, vector<16x128xf32> -> vector<16x128xf32>
    %53 = vector.extract_strided_slice %49 {offsets = [8, 0], sizes = [16, 256], strides = [1, 1]} : vector<24x256xf32> to vector<16x256xf32>
    %c0_39 = arith.constant 0 : index
    %c0_40 = arith.constant 0 : index
    %54 = vector.load %arg17[%c0_39, %c0_40] : memref<256x128xf32, #tpu.memory_space<vmem>>, vector<256x128xf32>
    %cst_41 = arith.constant dense<0.000000e+00> : vector<16x128xf32>
    %55 = tpu.matmul %53, %54, %cst_41 {dimension_numbers = #tpu.dot_dimension_numbers<[1], [0], [0], [1], [0, 0, 1, 1], [], []>} : vector<16x256xf32>, vector<256x128xf32>, vector<16x128xf32> -> vector<16x128xf32>
    %56 = arith.addf %52, %55 : vector<16x128xf32>
    %c0_42 = arith.constant 0 : index
    %c0_43 = arith.constant 0 : index
    %57 = vector.load %arg18[%c0_42, %c0_43] : memref<1x128xf32, #tpu.memory_space<vmem>>, vector<1x128xf32>
    %58 = vector.broadcast %57 : vector<1x128xf32> to vector<16x128xf32>
    %59 = arith.addf %56, %58 : vector<16x128xf32>
    %cst_44 = arith.constant 0.000000e+00 : f32
    %60 = vector.broadcast %cst_44 : f32 to vector<16x128xf32>
    %61 = arith.maximumf %59, %60 : vector<16x128xf32>
    %62 = vector.extract_strided_slice %61 {offsets = [0, 0], sizes = [8, 128], strides = [1, 1]} : vector<16x128xf32> to vector<8x128xf32>
    %c0_45 = arith.constant 0 : index
    %c0_46 = arith.constant 0 : index
    %63 = vector.load %arg19[%c0_45, %c0_46] : memref<128x256xf32, #tpu.memory_space<vmem>>, vector<128x256xf32>
    %cst_47 = arith.constant dense<0.000000e+00> : vector<8x256xf32>
    %64 = tpu.matmul %62, %63, %cst_47 {dimension_numbers = #tpu.dot_dimension_numbers<[1], [0], [0], [1], [0, 0, 1, 1], [], []>} : vector<8x128xf32>, vector<128x256xf32>, vector<8x256xf32> -> vector<8x256xf32>
    %65 = vector.extract_strided_slice %61 {offsets = [8, 0], sizes = [8, 128], strides = [1, 1]} : vector<16x128xf32> to vector<8x128xf32>
    %c0_48 = arith.constant 0 : index
    %c0_49 = arith.constant 0 : index
    %66 = vector.load %arg20[%c0_48, %c0_49] : memref<128x256xf32, #tpu.memory_space<vmem>>, vector<128x256xf32>
    %cst_50 = arith.constant dense<0.000000e+00> : vector<8x256xf32>
    %67 = tpu.matmul %65, %66, %cst_50 {dimension_numbers = #tpu.dot_dimension_numbers<[1], [0], [0], [1], [0, 0, 1, 1], [], []>} : vector<8x128xf32>, vector<128x256xf32>, vector<8x256xf32> -> vector<8x256xf32>
    %68 = arith.addf %64, %67 : vector<8x256xf32>
    %c0_51 = arith.constant 0 : index
    %c0_52 = arith.constant 0 : index
    %69 = vector.load %arg21[%c0_51, %c0_52] : memref<1x256xf32, #tpu.memory_space<vmem>>, vector<1x256xf32>
    %70 = vector.broadcast %69 : vector<1x256xf32> to vector<8x256xf32>
    %71 = arith.addf %68, %70 : vector<8x256xf32>
    %cst_53 = arith.constant 0.000000e+00 : f32
    %72 = vector.broadcast %cst_53 : f32 to vector<8x256xf32>
    %73 = arith.maximumf %71, %72 : vector<8x256xf32>
    %c0_54 = arith.constant 0 : index
    %c0_55 = arith.constant 0 : index
    %74 = vector.load %arg22[%c0_54, %c0_55] : memref<1x256xf32, #tpu.memory_space<vmem>>, vector<1x256xf32>
    %75 = vector.broadcast %74 : vector<1x256xf32> to vector<8x256xf32>
    %76 = arith.mulf %73, %75 : vector<8x256xf32>
    %c0_56 = arith.constant 0 : index
    %c0_57 = arith.constant 0 : index
    %77 = vector.load %arg23[%c0_56, %c0_57] : memref<1x256xf32, #tpu.memory_space<vmem>>, vector<1x256xf32>
    %78 = vector.broadcast %77 : vector<1x256xf32> to vector<8x256xf32>
    %79 = arith.addf %76, %78 : vector<8x256xf32>
    %c0_58 = arith.constant 0 : index
    %c0_59 = arith.constant 0 : index
    %80 = vector.load %arg24[%c0_58, %c0_59] : memref<256x128xf32, #tpu.memory_space<vmem>>, vector<256x128xf32>
    %cst_60 = arith.constant dense<0.000000e+00> : vector<8x128xf32>
    %81 = tpu.matmul %79, %80, %cst_60 {dimension_numbers = #tpu.dot_dimension_numbers<[1], [0], [0], [1], [0, 0, 1, 1], [], []>} : vector<8x256xf32>, vector<256x128xf32>, vector<8x128xf32> -> vector<8x128xf32>
    %c0_61 = arith.constant 0 : index
    %c0_62 = arith.constant 0 : index
    %82 = vector.load %arg25[%c0_61, %c0_62] : memref<1x128xf32, #tpu.memory_space<vmem>>, vector<1x128xf32>
    %83 = vector.broadcast %82 : vector<1x128xf32> to vector<8x128xf32>
    %84 = arith.addf %81, %83 : vector<8x128xf32>
    %cst_63 = arith.constant 0.000000e+00 : f32
    %85 = vector.broadcast %cst_63 : f32 to vector<8x128xf32>
    %86 = arith.cmpf oge, %84, %85 : vector<8x128xf32>
    %cst_64 = arith.constant 0.00999999977 : f32
    %87 = vector.broadcast %cst_64 : f32 to vector<8x128xf32>
    %88 = arith.mulf %87, %84 : vector<8x128xf32>
    %89 = arith.select %86, %84, %88 : vector<8x128xi1>, vector<8x128xf32>
    %c0_65 = arith.constant 0 : index
    %c0_66 = arith.constant 0 : index
    %90 = vector.load %arg26[%c0_65, %c0_66] : memref<128x128xf32, #tpu.memory_space<vmem>>, vector<128x128xf32>
    %cst_67 = arith.constant dense<0.000000e+00> : vector<8x128xf32>
    %91 = tpu.matmul %89, %90, %cst_67 {dimension_numbers = #tpu.dot_dimension_numbers<[1], [0], [0], [1], [0, 0, 1, 1], [], []>} : vector<8x128xf32>, vector<128x128xf32>, vector<8x128xf32> -> vector<8x128xf32>
    %c0_68 = arith.constant 0 : index
    %c0_69 = arith.constant 0 : index
    %92 = vector.load %arg27[%c0_68, %c0_69] : memref<1x128xf32, #tpu.memory_space<vmem>>, vector<1x128xf32>
    %93 = vector.broadcast %92 : vector<1x128xf32> to vector<8x128xf32>
    %94 = arith.addf %91, %93 : vector<8x128xf32>
    %95 = math.tanh %94 : vector<8x128xf32>
    %c0_70 = arith.constant 0 : index
    %c0_71 = arith.constant 0 : index
    %96 = vector.load %arg28[%c0_70, %c0_71] : memref<128x128xf32, #tpu.memory_space<vmem>>, vector<128x128xf32>
    %cst_72 = arith.constant dense<0.000000e+00> : vector<8x128xf32>
    %97 = tpu.matmul %95, %96, %cst_72 {dimension_numbers = #tpu.dot_dimension_numbers<[1], [0], [0], [1], [0, 0, 1, 1], [], []>} : vector<8x128xf32>, vector<128x128xf32>, vector<8x128xf32> -> vector<8x128xf32>
    %c0_73 = arith.constant 0 : index
    %c0_74 = arith.constant 0 : index
    %98 = vector.load %arg29[%c0_73, %c0_74] : memref<1x128xf32, #tpu.memory_space<vmem>>, vector<1x128xf32>
    %99 = vector.broadcast %98 : vector<1x128xf32> to vector<8x128xf32>
    %100 = arith.addf %97, %99 : vector<8x128xf32>
    %c0_75 = arith.constant 0 : index
    %c0_76 = arith.constant 0 : index
    %101 = vector.load %arg30[%c0_75, %c0_76] : memref<8x128xf32, #tpu.memory_space<vmem>>, vector<8x128xf32>
    tpu.vector_store %arg30[%c0_75, %c0_76], %100 {strides = array<i32>} : memref<8x128xf32, #tpu.memory_space<vmem>>, vector<8x128xf32>,
    return
  }
  func.func @transform_0(%arg0: i32) -> (i32, i32) {
    %c0_i32 = arith.constant 0 : i32
    %c0_i32_0 = arith.constant 0 : i32
    return %arg0, %c0_i32 : i32, i32
  }
  func.func @transform_1(%arg0: i32) -> (i32, i32) {
    %c0_i32 = arith.constant 0 : i32
    %c0_i32_0 = arith.constant 0 : i32
    %c0_i32_1 = arith.constant 0 : i32
    return %c0_i32, %c0_i32_0 : i32, i32
  }
  func.func @transform_2(%arg0: i32) -> (i32, i32) {
    %c0_i32 = arith.constant 0 : i32
    %c0_i32_0 = arith.constant 0 : i32
    %c0_i32_1 = arith.constant 0 : i32
    return %c0_i32, %c0_i32_0 : i32, i32
  }
  func.func @transform_3(%arg0: i32) -> (i32, i32) {
    %c0_i32 = arith.constant 0 : i32
    %c0_i32_0 = arith.constant 0 : i32
    %c0_i32_1 = arith.constant 0 : i32
    return %c0_i32, %c0_i32_0 : i32, i32
  }
  func.func @transform_4(%arg0: i32) -> (i32, i32) {
    %c0_i32 = arith.constant 0 : i32
    %c0_i32_0 = arith.constant 0 : i32
    %c0_i32_1 = arith.constant 0 : i32
    return %c0_i32, %c0_i32_0 : i32, i32
  }
  func.func @transform_5(%arg0: i32) -> (i32, i32) {
    %c0_i32 = arith.constant 0 : i32
    %c0_i32_0 = arith.constant 0 : i32
    %c0_i32_1 = arith.constant 0 : i32
    return %c0_i32, %c0_i32_0 : i32, i32
  }
  func.func @transform_6(%arg0: i32) -> (i32, i32) {
    %c0_i32 = arith.constant 0 : i32
    %c0_i32_0 = arith.constant 0 : i32
    %c0_i32_1 = arith.constant 0 : i32
    return %c0_i32, %c0_i32_0 : i32, i32
  }
  func.func @transform_7(%arg0: i32) -> (i32, i32) {
    %c0_i32 = arith.constant 0 : i32
    %c0_i32_0 = arith.constant 0 : i32
    %c0_i32_1 = arith.constant 0 : i32
    return %c0_i32, %c0_i32_0 : i32, i32
  }
  func.func @transform_8(%arg0: i32) -> (i32, i32) {
    %c0_i32 = arith.constant 0 : i32
    %c0_i32_0 = arith.constant 0 : i32
    %c0_i32_1 = arith.constant 0 : i32
    return %c0_i32, %c0_i32_0 : i32, i32
  }
  func.func @transform_9(%arg0: i32) -> (i32, i32) {
    %c0_i32 = arith.constant 0 : i32
    %c0_i32_0 = arith.constant 0 : i32
    %c0_i32_1 = arith.constant 0 : i32
    return %c0_i32, %c0_i32_0 : i32, i32
  }
  func.func @transform_10(%arg0: i32) -> (i32, i32) {
    %c0_i32 = arith.constant 0 : i32
    %c0_i32_0 = arith.constant 0 : i32
    %c0_i32_1 = arith.constant 0 : i32
    return %c0_i32, %c0_i32_0 : i32, i32
  }
  func.func @transform_11(%arg0: i32) -> (i32, i32) {
    %c0_i32 = arith.constant 0 : i32
    %c0_i32_0 = arith.constant 0 : i32
    %c0_i32_1 = arith.constant 0 : i32
    return %c0_i32, %c0_i32_0 : i32, i32
  }
  func.func @transform_12(%arg0: i32) -> (i32, i32) {
    %c0_i32 = arith.constant 0 : i32
    %c0_i32_0 = arith.constant 0 : i32
    %c0_i32_1 = arith.constant 0 : i32
    return %c0_i32, %c0_i32_0 : i32, i32
  }
  func.func @transform_13(%arg0: i32) -> (i32, i32) {
    %c0_i32 = arith.constant 0 : i32
    %c0_i32_0 = arith.constant 0 : i32
    %c0_i32_1 = arith.constant 0 : i32
    return %c0_i32, %c0_i32_0 : i32, i32
  }
  func.func @transform_14(%arg0: i32) -> (i32, i32) {
    %c0_i32 = arith.constant 0 : i32
    %c0_i32_0 = arith.constant 0 : i32
    %c0_i32_1 = arith.constant 0 : i32
    return %c0_i32, %c0_i32_0 : i32, i32
  }
  func.func @transform_15(%arg0: i32) -> (i32, i32) {
    %c0_i32 = arith.constant 0 : i32
    %c0_i32_0 = arith.constant 0 : i32
    %c0_i32_1 = arith.constant 0 : i32
    return %c0_i32, %c0_i32_0 : i32, i32
  }
  func.func @transform_16(%arg0: i32) -> (i32, i32) {
    %c0_i32 = arith.constant 0 : i32
    %c0_i32_0 = arith.constant 0 : i32
    %c0_i32_1 = arith.constant 0 : i32
    return %c0_i32, %c0_i32_0 : i32, i32
  }
  func.func @transform_17(%arg0: i32) -> (i32, i32) {
    %c0_i32 = arith.constant 0 : i32
    %c0_i32_0 = arith.constant 0 : i32
    %c0_i32_1 = arith.constant 0 : i32
    return %c0_i32, %c0_i32_0 : i32, i32
  }
  func.func @transform_18(%arg0: i32) -> (i32, i32) {
    %c0_i32 = arith.constant 0 : i32
    %c0_i32_0 = arith.constant 0 : i32
    %c0_i32_1 = arith.constant 0 : i32
    return %c0_i32, %c0_i32_0 : i32, i32
  }
  func.func @transform_19(%arg0: i32) -> (i32, i32) {
    %c0_i32 = arith.constant 0 : i32
    %c0_i32_0 = arith.constant 0 : i32
    %c0_i32_1 = arith.constant 0 : i32
    return %c0_i32, %c0_i32_0 : i32, i32
  }
  func.func @transform_20(%arg0: i32) -> (i32, i32) {
    %c0_i32 = arith.constant 0 : i32
    %c0_i32_0 = arith.constant 0 : i32
    %c0_i32_1 = arith.constant 0 : i32
    return %c0_i32, %c0_i32_0 : i32, i32
  }
  func.func @transform_21(%arg0: i32) -> (i32, i32) {
    %c0_i32 = arith.constant 0 : i32
    %c0_i32_0 = arith.constant 0 : i32
    %c0_i32_1 = arith.constant 0 : i32
    return %c0_i32, %c0_i32_0 : i32, i32
  }
  func.func @transform_22(%arg0: i32) -> (i32, i32) {
    %c0_i32 = arith.constant 0 : i32
    %c0_i32_0 = arith.constant 0 : i32
    %c0_i32_1 = arith.constant 0 : i32
    return %c0_i32, %c0_i32_0 : i32, i32
  }
  func.func @transform_23(%arg0: i32) -> (i32, i32) {
    %c0_i32 = arith.constant 0 : i32
    %c0_i32_0 = arith.constant 0 : i32
    %c0_i32_1 = arith.constant 0 : i32
    return %c0_i32, %c0_i32_0 : i32, i32
  }
  func.func @transform_24(%arg0: i32) -> (i32, i32) {
    %c0_i32 = arith.constant 0 : i32
    %c0_i32_0 = arith.constant 0 : i32
    %c0_i32_1 = arith.constant 0 : i32
    return %c0_i32, %c0_i32_0 : i32, i32
  }
  func.func @transform_25(%arg0: i32) -> (i32, i32) {
    %c0_i32 = arith.constant 0 : i32
    %c0_i32_0 = arith.constant 0 : i32
    %c0_i32_1 = arith.constant 0 : i32
    return %c0_i32, %c0_i32_0 : i32, i32
  }
  func.func @transform_26(%arg0: i32) -> (i32, i32) {
    %c0_i32 = arith.constant 0 : i32
    %c0_i32_0 = arith.constant 0 : i32
    %c0_i32_1 = arith.constant 0 : i32
    return %c0_i32, %c0_i32_0 : i32, i32
  }
  func.func @transform_27(%arg0: i32) -> (i32, i32) {
    %c0_i32 = arith.constant 0 : i32
    %c0_i32_0 = arith.constant 0 : i32
    %c0_i32_1 = arith.constant 0 : i32
    return %c0_i32, %c0_i32_0 : i32, i32
  }
  func.func @transform_28(%arg0: i32) -> (i32, i32) {
    %c0_i32 = arith.constant 0 : i32
    %c0_i32_0 = arith.constant 0 : i32
    %c0_i32_1 = arith.constant 0 : i32
    return %c0_i32, %c0_i32_0 : i32, i32
  }
  func.func @transform_29(%arg0: i32) -> (i32, i32) {
    %c0_i32 = arith.constant 0 : i32
    %c0_i32_0 = arith.constant 0 : i32
    return %arg0, %c0_i32 : i32, i32
  }
}

</mosaic_0001>

<bundles_post_ra>
// kernel: regressor_forward.1
= control target key start
LH: loop header
LB: loop body
LE: loop exit
PB: predicated region body
PF: predicated region fallthrough
CT: control target
= control target key end

     0   :  { %s2764_s6 = smov 1   ;;  %s2765_s10 = smov 2   ;;  %s3611_s0 = inlined_call_operand.smem [shape: u32[30], index: -1, kind: input, shape index: {}] }
   0x1   :  { %s2828_s5 = sld [smem:[%s3611_s0]]   ;;  %s2766_s14 = smov 3  }
   0x2   :  { %s2833_s9 = sld [smem:[%s3611_s0 + %s2764_s6]]   ;;  %s2767_s18 = smov 4  }
   0x3   :  { %s2838_s13 = sld [smem:[%s3611_s0 + %s2765_s10]]   ;;  %s2768_s22 = smov 5  }
   0x4   :  { %s2843_s17 = sld [smem:[%s3611_s0 + %s2766_s14]]   ;;  %s2769_s26 = smov 6  }
   0x5   :  { %s2848_s21 = sld [smem:[%s3611_s0 + %s2767_s18]]   ;;  %s2770_s30 = smov 7  }
   0x6   :  { %s2853_s25 = sld [smem:[%s3611_s0 + %s2768_s22]]   ;;  %s2771_s4 = smov 8  }
   0x7   :  { %3621 = sst [smem:[#allocation49_spill]] %s2828_s5  ;;  %s2772_s10 = smov 9  }
   0x8   :  { %s2858_s29 = sld [smem:[%s3611_s0 + %s2769_s26]]   ;;  %s2773_s15 = smov 10  }
   0x9   :  { %s2863_s3 = sld [smem:[%s3611_s0 + %s2770_s30]]   ;;  %s2774_s20 = smov 11  }
   0xa   :  { %s2868_s8 = sld [smem:[%s3611_s0 + %s2771_s4]]   ;;  %s2775_s26 = smov 12  }
   0xb   :  { %3622 = sst [smem:[#allocation50_spill]] %s2848_s21  ;;  %s2776_s1 = smov 13  }
   0xc   :  { %3623 = sst [smem:[#allocation51_spill]] %s2853_s25  ;;  %s2777_s7 = smov 14  }
   0xd   :  { %s2873_s14 = sld [smem:[%s3611_s0 + %s2772_s10]]   ;;  %s2779_s22 = smov 16  }
   0xe   :  { %3624 = sst [smem:[#allocation52_spill]] %s2858_s29  ;;  %s2780_s28 = smov 17  }
   0xf   :  { %s2878_s19 = sld [smem:[%s3611_s0 + %s2773_s15]]   ;;  %s2778_s15 = smov 15  }
  0x10   :  { %s2883_s24 = sld [smem:[%s3611_s0 + %s2774_s20]]  }
  0x11   :  { %s2888_s30 = sld [smem:[%s3611_s0 + %s2775_s26]]  }
  0x12   :  { %s2893_s6 = sld [smem:[%s3611_s0 + %s2776_s1]]  }
  0x13   :  { %3625 = sst [smem:[#allocation53_spill]] %s2873_s14 }
  0x14   :  { %s2898_s12 = sld [smem:[%s3611_s0 + %s2777_s7]]   ;;  %s2781_s7 = smov 18  }
  0x15   :  { %s2903_s20 = sld [smem:[%s3611_s0 + %s2778_s15]]   ;;  %s2782_s15 = smov 19  }
  0x16   :  { %s2908_s27 = sld [smem:[%s3611_s0 + %s2779_s22]]   ;;  %s2783_s22 = smov 20  }
  0x17   :  { %s2913_s4 = sld [smem:[%s3611_s0 + %s2780_s28]]   ;;  %s2784_s28 = smov 21  }
  0x18   :  { %3626 = sst [smem:[#allocation54_spill]] %s2893_s6 }
  0x19   :  { %s2923_s14 = sld [smem:[%s3611_s0 + %s2782_s15]]   ;;  %s2786_s15 = smov 23  }
  0x1a   :  { %3627 = sst [smem:[#allocation55_spill]] %s2898_s12 }
  0x1b   :  { %s2918_s12 = sld [smem:[%s3611_s0 + %s2781_s7]]   ;;  %s2785_s7 = smov 22  }
  0x1c   :  { %3628 = sst [smem:[#allocation56_spill]] %s2908_s27 }
  0x1d   :  { %s2928_s21 = sld [smem:[%s3611_s0 + %s2783_s22]]   ;;  %s2787_s22 = smov 24  }
  0x1e   :  { %s2933_s29 = sld [smem:[%s3611_s0 + %s2784_s28]]   ;;  %s2788_s28 = smov 25  }
  0x1f   :  { %s2938_s25 = sld [smem:[%s3611_s0 + %s2785_s7]]   ;;  %s2789_s7 = smov 26  }
  0x20   :  { %s2943_s5 = sld [smem:[%s3611_s0 + %s2786_s15]]   ;;  %s2790_s15 = smov 27  }
  0x21   :  { %3629 = sst [smem:[#allocation57_spill]] %s2918_s12 }
  0x22   :  { %s2953_s12 = sld [smem:[%s3611_s0 + %s2788_s28]]   ;;  %s2792_s28 = smov 29  }
  0x23   :  { %3630 = sst [smem:[#allocation58_spill]] %s2928_s21 }
  0x24   :  { %s2948_s21 = sld [smem:[%s3611_s0 + %s2787_s22]]   ;;  %s2791_s22 = smov 28  }
  0x25   :  { %3631 = sst [smem:[#allocation59_spill]] %s2938_s25 }
  0x26   :  { %s2958_s25 = sld [smem:[%s3611_s0 + %s2789_s7]]  }
  0x27   :  { %s2963_s27 = sld [smem:[%s3611_s0 + %s2790_s15]]  }
  0x28   :  { %s2973_s6 = sld [smem:[%s3611_s0 + %s2792_s28]]  }
  0x2a   :  { %3632 = sst [smem:[#allocation60_spill]] %s2948_s21 }
  0x2b   :  { %s2968_s21 = sld [smem:[%s3611_s0 + %s2791_s22]]  }
  0x2c   :  { %64 = vsyncpa [#allocation3], 0 }
  0x2d   :  { %65 = vsyncpa [#allocation5], 0 }
  0x2e   :  { %66 = vsyncpa [#allocation8], 0 }
  0x2f   :  { %67 = vsyncpa [#allocation11], 0 }
  0x30   :  { %68 = vsyncpa [#allocation14], 0 }
  0x31   :  { %69 = vsyncpa [#allocation17], 0 }
  0x32   :  { %70 = vsyncpa [#allocation20], 0 }
  0x33   :  { %71 = vsyncpa [#allocation23], 0 }
  0x34   :  { %72 = vsyncpa [#allocation26], 0 }
  0x35   :  { %73 = vsyncpa [#allocation29], 0 }
  0x36   :  { %74 = vsyncpa [#allocation32], 0  ;;  %s96_s7 = sshll.u32 %s2838_s13, 4  ;;  %s97_s7 = int_to_ptr.hbm [resolvable:$true] %s96_s7 }
  0x37   :  { %75 = vsyncpa [#allocation35], 0  ;;  %s2793_s0 = smov [#allocation4]   ;;  %s124_s11 = sshll.u32 %s2863_s3, 4  ;;  %s125_s11 = int_to_ptr.hbm [resolvable:$true] %s124_s11 }
  0x38   :  { %s98_s10 = sshll.u32 %s2793_s0, 4  ;;  %s2188_s15 = sshra.s32 %s97_s7, 4  ;;  %s99_s10 = int_to_ptr.vmem [resolvable:$true] %s98_s10  ;;  %s2189_s15 = int_to_ptr.hbm [resolvable:$true] %s2188_s15 }
  0x39   :  { %s2190_s16 = scalar_lea.hbm %s2189_s15, 2  ;;  %s2192_s18 = scalar_lea.hbm %s2838_s13, 2 }
  0x3a   :  { %p2191_p0 = scmp.ne.s32.totalorder %s2189_s15, %s2190_s16  ;;  %p2193_p1 = scmp.lt.s32.totalorder %s2189_s15, %s2838_s13 }
  0x3b   :  { %p2194_p2 = scmp.lt.s32.totalorder %s2192_s18, %s2190_s16 }
  0x3d   :  { %p2195_p3 = por %p2194_p2, %p2193_p1 }
  0x3f   :  { %p2196_p4 = pnand %p2195_p3, %p2191_p0 }
  0x41   :  { %2199 = shalt.err (!%p2196_p4)
}
  0x42   :  { %101 = dma.hbm_to_vmem [thread:$0]  %s97_s7, 32, %s99_s10, [#allocation5]  }
  0x43   :  { %s2794_s22 = smov [#allocation7]   ;;  %s2212_s26 = sshra.s32 %s125_s11, 4  ;;  %s2213_s26 = int_to_ptr.hbm [resolvable:$true] %s2212_s26 }
  0x44   :  { %s126_s23 = sshll.u32 %s2794_s22, 4  ;;  %s2214_s28 = scalar_lea.hbm %s2213_s26, 2  ;;  %s127_s23 = int_to_ptr.vmem [resolvable:$true] %s126_s23 }
  0x45   :  { %p2215_p5 = scmp.ne.s32.totalorder %s2213_s26, %s2214_s28  ;;  %s2216_s1 = scalar_lea.hbm %s2863_s3, 2 }
  0x46   :  { %p2217_p6 = scmp.lt.s32.totalorder %s2213_s26, %s2863_s3  ;;  %p2218_p7 = scmp.lt.s32.totalorder %s2216_s1, %s2214_s28 }
  0x48   :  { %p2219_p8 = por %p2218_p7, %p2217_p6 }
  0x4a   :  { %p2220_p9 = pnand %p2219_p8, %p2215_p5 }
  0x4c   :  { %2223 = shalt.err (!%p2220_p9)
}
  0x4d   :  { %129 = dma.hbm_to_vmem [thread:$0]  %s125_s11, 32, %s127_s23, [#allocation8]  }
  0x4e   :  { %s147_s13 = sshll.u32 %s2878_s19, 4  ;;  %s2795_s2 = smov [#allocation10]   ;;  %s148_s13 = int_to_ptr.hbm [resolvable:$true] %s147_s13 }
  0x4f   :  { %s149_s7 = sshll.u32 %s2795_s2, 4  ;;  %s174_s0 = sshll.u32 %s2888_s30, 4  ;;  %s150_s7 = int_to_ptr.vmem [resolvable:$true] %s149_s7  ;;  %s175_s0 = int_to_ptr.hbm [resolvable:$true] %s174_s0 }
  0x50   :  { %s2236_s10 = sshra.s32 %s148_s13, 4  ;;  %s2240_s3 = scalar_lea.hbm %s2878_s19, 512  ;;  %s2237_s10 = int_to_ptr.hbm [resolvable:$true] %s2236_s10 }
  0x51   :  { %s2238_s15 = scalar_lea.hbm %s2237_s10, 512  ;;  %p2241_p11 = scmp.lt.s32.totalorder %s2237_s10, %s2878_s19 }
  0x52   :  { %p2239_p10 = scmp.ne.s32.totalorder %s2237_s10, %s2238_s15  ;;  %p2242_p12 = scmp.lt.s32.totalorder %s2240_s3, %s2238_s15 }
  0x54   :  { %p2243_p13 = por %p2242_p12, %p2241_p11 }
  0x56   :  { %p2244_p0 = pnand %p2243_p13, %p2239_p10 }
  0x58   :  { %2247 = shalt.err (!%p2244_p0)
}
  0x59   :  { %s2796_s11 = smov 256   ;;  %s2797_s16 = smov 16  }
  0x5a   :  { %155 = dma.hbm_to_vmem [thread:$0]  %s148_s13, 8192, %s150_s7, [#allocation11], %s2796_s11, %s2796_s11, %s2797_s16  }
  0x5b   :  { %s2798_s18 = smov [#allocation13]   ;;  %s197_s23 = sshll.u32 %s2903_s20, 4  ;;  %s2989_s23 = int_to_ptr.hbm [resolvable:$true] %s197_s23 }
  0x5c   :  { %s176_s22 = sshll.u32 %s2798_s18, 4  ;;  %s2260_s19 = sshra.s32 %s175_s0, 4  ;;  %s177_s22 = int_to_ptr.vmem [resolvable:$true] %s176_s22  ;;  %s2261_s19 = int_to_ptr.hbm [resolvable:$true] %s2260_s19 }
  0x5d   :  { %s2262_s26 = scalar_lea.hbm %s2261_s19, 2  ;;  %s2264_s28 = scalar_lea.hbm %s2888_s30, 2 }
  0x5e   :  { %p2263_p1 = scmp.ne.s32.totalorder %s2261_s19, %s2262_s26  ;;  %p2265_p2 = scmp.lt.s32.totalorder %s2261_s19, %s2888_s30 }
  0x5f   :  { %p2266_p3 = scmp.lt.s32.totalorder %s2264_s28, %s2262_s26 }
  0x61   :  { %p2267_p4 = por %p2266_p3, %p2265_p2 }
  0x63   :  { %p2268_p5 = pnand %p2267_p4, %p2263_p1 }
  0x65   :  { %2271 = shalt.err (!%p2268_p5)
}
  0x66   :  { %179 = dma.hbm_to_vmem [thread:$0]  %s175_s0, 32, %s177_s22, [#allocation14]  }
  0x67   :  { %s2799_s1 = smov [#allocation16]   ;;  %s224_s2 = sshll.u32 %s2913_s4, 4  ;;  %s225_s2 = int_to_ptr.hbm [resolvable:$true] %s224_s2 }
  0x68   :  { %s199_s13 = sshll.u32 %s2799_s1, 4  ;;  %s2284_s7 = sshra.s32 %s2989_s23, 4  ;;  %s200_s13 = int_to_ptr.vmem [resolvable:$true] %s199_s13  ;;  %s2285_s7 = int_to_ptr.hbm [resolvable:$true] %s2284_s7 }
  0x69   :  { %s2286_s10 = scalar_lea.hbm %s2285_s7, 256  ;;  %s2288_s15 = scalar_lea.hbm %s2903_s20, 256 }
  0x6a   :  { %p2287_p6 = scmp.ne.s32.totalorder %s2285_s7, %s2286_s10  ;;  %p2289_p7 = scmp.lt.s32.totalorder %s2285_s7, %s2903_s20 }
  0x6b   :  { %p2290_p8 = scmp.lt.s32.totalorder %s2288_s15, %s2286_s10 }
  0x6d   :  { %p2291_p9 = por %p2290_p8, %p2289_p7 }
  0x6f   :  { %p2292_p10 = pnand %p2291_p9, %p2287_p6 }
  0x71   :  { %2295 = shalt.err (!%p2292_p10)
}
  0x72   :  { %s2800_s30 = smov 128   ;;  %s2801_s0 = smov 8  }
  0x73   :  { %205 = dma.hbm_to_vmem [thread:$0]  %s2989_s23, 4096, %s200_s13, [#allocation17], %s2800_s30, %s2800_s30, %s2801_s0  }
  0x74   :  { %s2802_s3 = smov [#allocation19]   ;;  %s247_s22 = sshll.u32 %s2923_s14, 4  ;;  %s3002_s22 = int_to_ptr.hbm [resolvable:$true] %s247_s22 }
  0x75   :  { %s226_s18 = sshll.u32 %s2802_s3, 4  ;;  %s2308_s20 = sshra.s32 %s225_s2, 4  ;;  %s227_s18 = int_to_ptr.vmem [resolvable:$true] %s226_s18  ;;  %s2309_s20 = int_to_ptr.hbm [resolvable:$true] %s2308_s20 }
  0x76   :  { %s2310_s19 = scalar_lea.hbm %s2309_s20, 1  ;;  %s2312_s26 = scalar_lea.hbm %s2913_s4, 1 }
  0x77   :  { %p2311_p11 = scmp.ne.s32.totalorder %s2309_s20, %s2310_s19  ;;  %p2313_p12 = scmp.lt.s32.totalorder %s2309_s20, %s2913_s4 }
  0x78   :  { %p2314_p13 = scmp.lt.s32.totalorder %s2312_s26, %s2310_s19 }
  0x7a   :  { %p2315_p0 = por %p2314_p13, %p2313_p12 }
  0x7c   :  { %p2316_p1 = pnand %p2315_p0, %p2311_p11 }
  0x7e   :  { %2319 = shalt.err (!%p2316_p1)
}
  0x7f   :  { %229 = dma.hbm_to_vmem [thread:$0]  %s225_s2, 16, %s227_s18, [#allocation20]  }
  0x80   :  { %s272_s23 = sshll.u32 %s2933_s29, 4  ;;  %s2803_s28 = smov [#allocation22]   ;;  %s273_s23 = int_to_ptr.hbm [resolvable:$true] %s272_s23 }
  0x81   :  { %s249_s1 = sshll.u32 %s2803_s28, 4  ;;  %s2332_s13 = sshra.s32 %s3002_s22, 4  ;;  %s250_s1 = int_to_ptr.vmem [resolvable:$true] %s249_s1  ;;  %s2333_s13 = int_to_ptr.hbm [resolvable:$true] %s2332_s13 }
  0x82   :  { %s2334_s7 = scalar_lea.hbm %s2333_s13, 256  ;;  %s2336_s10 = scalar_lea.hbm %s2923_s14, 256 }
  0x83   :  { %p2335_p2 = scmp.ne.s32.totalorder %s2333_s13, %s2334_s7  ;;  %p2337_p3 = scmp.lt.s32.totalorder %s2333_s13, %s2923_s14 }
  0x84   :  { %p2338_p4 = scmp.lt.s32.totalorder %s2336_s10, %s2334_s7 }
  0x86   :  { %p2339_p5 = por %p2338_p4, %p2337_p3 }
  0x88   :  { %p2340_p6 = pnand %p2339_p5, %p2335_p2 }
  0x8a   :  { %2343 = shalt.err (!%p2340_p6)
}
  0x8b   :  { %255 = dma.hbm_to_vmem [thread:$0]  %s3002_s22, 4096, %s250_s1, [#allocation23], %s2796_s11, %s2796_s11, %s2797_s16  }
  0x8c   :  { %s2804_s4 = smov [#allocation25]   ;;  %s293_s15 = sshll.u32 %s2943_s5, 4  ;;  %s3015_s15 = int_to_ptr.hbm [resolvable:$true] %s293_s15 }
  0x8d   :  { %s274_s2 = sshll.u32 %s2804_s4, 4  ;;  %s2356_s3 = sshra.s32 %s273_s23, 4  ;;  %s275_s2 = int_to_ptr.vmem [resolvable:$true] %s274_s2  ;;  %s2357_s3 = int_to_ptr.hbm [resolvable:$true] %s2356_s3 }
  0x8e   :  { %s2358_s14 = scalar_lea.hbm %s2357_s3, 2  ;;  %s2360_s18 = scalar_lea.hbm %s2933_s29, 2 }
  0x8f   :  { %p2359_p7 = scmp.ne.s32.totalorder %s2357_s3, %s2358_s14  ;;  %p2361_p8 = scmp.lt.s32.totalorder %s2357_s3, %s2933_s29 }
  0x90   :  { %p2362_p9 = scmp.lt.s32.totalorder %s2360_s18, %s2358_s14 }
  0x92   :  { %p2363_p10 = por %p2362_p9, %p2361_p8 }
  0x94   :  { %p2364_p11 = pnand %p2363_p10, %p2359_p7 }
  0x96   :  { %2367 = shalt.err (!%p2364_p11)
}
  0x97   :  { %277 = dma.hbm_to_vmem [thread:$0]  %s273_s23, 32, %s275_s2, [#allocation26]  }
  0x98   :  { %s317_s22 = sshll.u32 %s2953_s12, 4  ;;  %s2805_s20 = smov [#allocation28]   ;;  %s3020_s22 = int_to_ptr.hbm [resolvable:$true] %s317_s22 }
  0x99   :  { %s295_s19 = sshll.u32 %s2805_s20, 4  ;;  %s2380_s26 = sshra.s32 %s3015_s15, 4  ;;  %s296_s19 = int_to_ptr.vmem [resolvable:$true] %s295_s19  ;;  %s2381_s26 = int_to_ptr.hbm [resolvable:$true] %s2380_s26 }
  0x9a   :  { %s2382_s28 = scalar_lea.hbm %s2381_s26, 256  ;;  %s2384_s29 = scalar_lea.hbm %s2943_s5, 256 }
  0x9b   :  { %p2383_p12 = scmp.ne.s32.totalorder %s2381_s26, %s2382_s28  ;;  %p2385_p13 = scmp.lt.s32.totalorder %s2381_s26, %s2943_s5 }
  0x9c   :  { %p2386_p0 = scmp.lt.s32.totalorder %s2384_s29, %s2382_s28 }
  0x9e   :  { %p2387_p1 = por %p2386_p0, %p2385_p13 }
  0xa0   :  { %p2388_p2 = pnand %p2387_p1, %p2383_p12 }
  0xa2   :  { %2391 = shalt.err (!%p2388_p2)
}
  0xa3   :  { %301 = dma.hbm_to_vmem [thread:$0]  %s3015_s15, 4096, %s296_s19, [#allocation29], %s2800_s30, %s2800_s30, %s2801_s0  }
  0xa4   :  { %s2806_s23 = smov [#allocation31]   ;;  %s341_s13 = sshll.u32 %s2963_s27, 4  ;;  %s3030_s13 = int_to_ptr.hbm [resolvable:$true] %s341_s13 }
  0xa5   :  { %s319_s1 = sshll.u32 %s2806_s23, 4  ;;  %s2404_s5 = sshra.s32 %s3020_s22, 4  ;;  %s320_s1 = int_to_ptr.vmem [resolvable:$true] %s319_s1  ;;  %s2405_s5 = int_to_ptr.hbm [resolvable:$true] %s2404_s5 }
  0xa6   :  { %s2406_s7 = scalar_lea.hbm %s2405_s5, 128  ;;  %s2408_s10 = scalar_lea.hbm %s2953_s12, 128 }
  0xa7   :  { %p2407_p3 = scmp.ne.s32.totalorder %s2405_s5, %s2406_s7  ;;  %p2409_p4 = scmp.lt.s32.totalorder %s2405_s5, %s2953_s12 }
  0xa8   :  { %p2410_p5 = scmp.lt.s32.totalorder %s2408_s10, %s2406_s7 }
  0xaa   :  { %p2411_p6 = por %p2410_p5, %p2409_p4 }
  0xac   :  { %p2412_p7 = pnand %p2411_p6, %p2407_p3 }
  0xae   :  { %2415 = shalt.err (!%p2412_p7)
}
  0xaf   :  { %325 = dma.hbm_to_vmem [thread:$0]  %s3020_s22, 2048, %s320_s1, [#allocation32], %s2800_s30, %s2800_s30, %s2801_s0  }
  0xb0   :  { %s82_s4 = sshll.u32 %s2833_s9, 4  ;;  %s2807_s2 = smov [#allocation34]   ;;  %s3040_s4 = int_to_ptr.hbm [resolvable:$true] %s82_s4 }
  0xb1   :  { %s343_s15 = sshll.u32 %s2807_s2, 4  ;;  %s2428_s12 = sshra.s32 %s3030_s13, 4  ;;  %s344_s15 = int_to_ptr.vmem [resolvable:$true] %s343_s15  ;;  %s2429_s12 = int_to_ptr.hbm [resolvable:$true] %s2428_s12 }
  0xb2   :  { %s2430_s3 = scalar_lea.hbm %s2429_s12, 128  ;;  %s2432_s14 = scalar_lea.hbm %s2963_s27, 128 }
  0xb3   :  { %p2431_p8 = scmp.ne.s32.totalorder %s2429_s12, %s2430_s3  ;;  %p2433_p9 = scmp.lt.s32.totalorder %s2429_s12, %s2963_s27 }
  0xb4   :  { %p2434_p10 = scmp.lt.s32.totalorder %s2432_s14, %s2430_s3 }
  0xb6   :  { %p2435_p11 = por %p2434_p10, %p2433_p9 }
  0xb8   :  { %p2436_p12 = pnand %p2435_p11, %p2431_p8 }
  0xba   :  { %2439 = shalt.err (!%p2436_p12)
}
  0xbb   :  { %349 = dma.hbm_to_vmem [thread:$0]  %s3030_s13, 2048, %s344_s15, [#allocation35], %s2800_s30, %s2800_s30, %s2801_s0  }
  0xbc   :  { %s2808_s18 = smov [#allocation2]   ;;  %s107_s20 = sshll.u32 %s2843_s17, 4  ;;  %s108_s20 = int_to_ptr.hbm [resolvable:$true] %s107_s20 }
  0xbd   :  { %s84_s22 = sshll.u32 %s2808_s18, 4  ;;  %s2452_s19 = sshra.s32 %s3040_s4, 4  ;;  %s85_s22 = int_to_ptr.vmem [resolvable:$true] %s84_s22  ;;  %s2453_s19 = int_to_ptr.hbm [resolvable:$true] %s2452_s19 }
  0xbe   :  { %s2454_s27 = scalar_lea.hbm %s2453_s19, 96  ;;  %s2456_s26 = scalar_lea.hbm %s2833_s9, 96 }
  0xbf   :  { %p2455_p13 = scmp.ne.s32.totalorder %s2453_s19, %s2454_s27  ;;  %p2457_p0 = scmp.lt.s32.totalorder %s2453_s19, %s2833_s9 }
  0xc0   :  { %p2458_p1 = scmp.lt.s32.totalorder %s2456_s26, %s2454_s27 }
  0xc2   :  { %p2459_p2 = por %p2458_p1, %p2457_p0 }
  0xc4   :  { %p2460_p3 = pnand %p2459_p2, %p2455_p13 }
  0xc6   :  { %2463 = shalt.err (!%p2460_p3)
}
  0xc7   :  { %90 = dma.hbm_to_vmem [thread:$0]  %s3040_s4, 1536, %s85_s22, [#allocation3], %s2796_s11, %s2796_s11, %s2797_s16  }
  0xc8   :  { %s135_s28 = sshll.u32 %s2868_s8, 4  ;;  %s2809_s29 = smov [#allocation6]   ;;  %s136_s28 = int_to_ptr.hbm [resolvable:$true] %s135_s28 }
  0xc9   :  { %s109_s23 = sshll.u32 %s2809_s29, 4  ;;  %s2476_s1 = sshra.s32 %s108_s20, 4  ;;  %s110_s23 = int_to_ptr.vmem [resolvable:$true] %s109_s23  ;;  %s2477_s1 = int_to_ptr.hbm [resolvable:$true] %s2476_s1 }
  0xca   :  { %s2478_s9 = scalar_lea.hbm %s2477_s1, 2  ;;  %s2480_s13 = scalar_lea.hbm %s2843_s17, 2 }
  0xcb   :  { %p2479_p4 = scmp.ne.s32.totalorder %s2477_s1, %s2478_s9  ;;  %p2481_p5 = scmp.lt.s32.totalorder %s2477_s1, %s2843_s17 }
  0xcc   :  { %p2482_p6 = scmp.lt.s32.totalorder %s2480_s13, %s2478_s9 }
  0xce   :  { %p2483_p7 = por %p2482_p6, %p2481_p5 }
  0xd0   :  { %p2484_p8 = pnand %p2483_p7, %p2479_p4 }
  0xd2   :  { %2487 = shalt.err (!%p2484_p8)
}
  0xd3   :  { %112 = dma.hbm_to_vmem [thread:$0]  %s108_s20, 32, %s110_s23, [#allocation5]  }
  0xd4   :  { %s2810_s5 = smov [#allocation9]   ;;  %s160_s10 = sshll.u32 %s2883_s24, 4  ;;  %s3061_s10 = int_to_ptr.hbm [resolvable:$true] %s160_s10 }
  0xd5   :  { %s137_s7 = sshll.u32 %s2810_s5, 4  ;;  %s2500_s4 = sshra.s32 %s136_s28, 4  ;;  %s138_s7 = int_to_ptr.vmem [resolvable:$true] %s137_s7  ;;  %s2501_s4 = int_to_ptr.hbm [resolvable:$true] %s2500_s4 }
  0xd6   :  { %s2502_s2 = scalar_lea.hbm %s2501_s4, 2  ;;  %s2504_s15 = scalar_lea.hbm %s2868_s8, 2 }
  0xd7   :  { %p2503_p9 = scmp.ne.s32.totalorder %s2501_s4, %s2502_s2  ;;  %p2505_p10 = scmp.lt.s32.totalorder %s2501_s4, %s2868_s8 }
  0xd8   :  { %p2506_p11 = scmp.lt.s32.totalorder %s2504_s15, %s2502_s2 }
  0xda   :  { %p2507_p12 = por %p2506_p11, %p2505_p10 }
  0xdc   :  { %p2508_p13 = pnand %p2507_p12, %p2503_p9 }
  0xde   :  { %2511 = shalt.err (!%p2508_p13)
}
  0xdf   :  { %140 = dma.hbm_to_vmem [thread:$0]  %s136_s28, 32, %s138_s7, [#allocation8]  }
  0xe0   :  { %s3633_s17 = sld [smem:[#allocation54_spill]]  ;;  %s2811_s3 = smov [#allocation12]  }
  0xe1   :  { %s162_s14 = sshll.u32 %s2811_s3, 4  ;;  %s2524_s18 = sshra.s32 %s3061_s10, 4  ;;  %s163_s14 = int_to_ptr.vmem [resolvable:$true] %s162_s14  ;;  %s2525_s18 = int_to_ptr.hbm [resolvable:$true] %s2524_s18 }
  0xe2   :  { %s2526_s22 = scalar_lea.hbm %s2525_s18, 512  ;;  %s2528_s20 = scalar_lea.hbm %s2883_s24, 512 }
  0xe3   :  { %p2527_p0 = scmp.ne.s32.totalorder %s2525_s18, %s2526_s22  ;;  %p2529_p1 = scmp.lt.s32.totalorder %s2525_s18, %s2883_s24 }
  0xe4   :  { %p2530_p2 = scmp.lt.s32.totalorder %s2528_s20, %s2526_s22 }
  0xe6   :  { %s185_s12 = sshll.u32 %s3633_s17, 4  ;;  %p2531_p3 = por %p2530_p2, %p2529_p1  ;;  %s186_s12 = int_to_ptr.hbm [resolvable:$true] %s185_s12 }
  0xe8   :  { %p2532_p4 = pnand %p2531_p3, %p2527_p0 }
  0xea   :  { %2535 = shalt.err (!%p2532_p4)
}
  0xeb   :  { %s3634_s8 = sld [smem:[#allocation56_spill]]  ;;  %s2812_s19 = smov [#allocation15]  }
  0xec   :  { %168 = dma.hbm_to_vmem [thread:$0]  %s3061_s10, 8192, %s163_s14, [#allocation11], %s2796_s11, %s2796_s11, %s2797_s16  }
  0xed   :  { %s187_s27 = sshll.u32 %s2812_s19, 4  ;;  %s2548_s28 = sshra.s32 %s186_s12, 4  ;;  %s188_s27 = int_to_ptr.vmem [resolvable:$true] %s187_s27  ;;  %s2549_s28 = int_to_ptr.hbm [resolvable:$true] %s2548_s28 }
  0xee   :  { %s2550_s24 = scalar_lea.hbm %s2549_s28, 2  ;;  %s2552_s29 = scalar_lea.hbm %s3633_s17, 2 }
  0xef   :  { %p2551_p5 = scmp.ne.s32.totalorder %s2549_s28, %s2550_s24  ;;  %p2553_p6 = scmp.lt.s32.totalorder %s2549_s28, %s3633_s17 }
  0xf0   :  { %p2554_p7 = scmp.lt.s32.totalorder %s2552_s29, %s2550_s24 }
  0xf1   :  { %s210_s26 = sshll.u32 %s3634_s8, 4  ;;  %s3074_s26 = int_to_ptr.hbm [resolvable:$true] %s210_s26 }
  0xf2   :  { %p2555_p8 = por %p2554_p7, %p2553_p6 }
  0xf4   :  { %p2556_p9 = pnand %p2555_p8, %p2551_p5 }
  0xf6   :  { %2559 = shalt.err (!%p2556_p9)
}
  0xf7   :  { %190 = dma.hbm_to_vmem [thread:$0]  %s186_s12, 32, %s188_s27, [#allocation14]  }
  0xf8   :  { %s3635_s23 = sld [smem:[#allocation57_spill]]  ;;  %s2813_s9 = smov [#allocation18]  }
  0xf9   :  { %s212_s13 = sshll.u32 %s2813_s9, 4  ;;  %s2572_s5 = sshra.s32 %s3074_s26, 4  ;;  %s213_s13 = int_to_ptr.vmem [resolvable:$true] %s212_s13  ;;  %s2573_s5 = int_to_ptr.hbm [resolvable:$true] %s2572_s5 }
  0xfa   :  { %s2574_s7 = scalar_lea.hbm %s2573_s5, 256  ;;  %s2576_s10 = scalar_lea.hbm %s3634_s8, 256 }
  0xfb   :  { %p2575_p10 = scmp.ne.s32.totalorder %s2573_s5, %s2574_s7  ;;  %p2577_p11 = scmp.lt.s32.totalorder %s2573_s5, %s3634_s8 }
  0xfc   :  { %p2578_p12 = scmp.lt.s32.totalorder %s2576_s10, %s2574_s7 }
  0xfe   :  { %s234_s1 = sshll.u32 %s3635_s23, 4  ;;  %p2579_p13 = por %p2578_p12, %p2577_p11  ;;  %s3079_s1 = int_to_ptr.hbm [resolvable:$true] %s234_s1 }
 0x100   :  { %p2580_p0 = pnand %p2579_p13, %p2575_p10 }
 0x102   :  { %2583 = shalt.err (!%p2580_p0)
}
 0x103   :  { %s3636_s4 = sld [smem:[#allocation58_spill]]  ;;  %s2814_s2 = smov [#allocation21]  }
 0x104   :  { %218 = dma.hbm_to_vmem [thread:$0]  %s3074_s26, 4096, %s213_s13, [#allocation17], %s2800_s30, %s2800_s30, %s2801_s0  }
 0x105   :  { %s236_s15 = sshll.u32 %s2814_s2, 4  ;;  %s2596_s12 = sshra.s32 %s3079_s1, 4  ;;  %s237_s15 = int_to_ptr.vmem [resolvable:$true] %s236_s15  ;;  %s2597_s12 = int_to_ptr.hbm [resolvable:$true] %s2596_s12 }
 0x106   :  { %s2598_s3 = scalar_lea.hbm %s2597_s12, 256  ;;  %s2600_s14 = scalar_lea.hbm %s3635_s23, 256 }
 0x107   :  { %p2599_p1 = scmp.ne.s32.totalorder %s2597_s12, %s2598_s3  ;;  %p2601_p2 = scmp.lt.s32.totalorder %s2597_s12, %s3635_s23 }
 0x108   :  { %p2602_p3 = scmp.lt.s32.totalorder %s2600_s14, %s2598_s3 }
 0x109   :  { %s261_s17 = sshll.u32 %s3636_s4, 4  ;;  %s262_s17 = int_to_ptr.hbm [resolvable:$true] %s261_s17 }
 0x10a   :  { %p2603_p4 = por %p2602_p3, %p2601_p2 }
 0x10c   :  { %p2604_p5 = pnand %p2603_p4, %p2599_p1 }
 0x10e   :  { %2607 = shalt.err (!%p2604_p5)
}
 0x10f   :  { %s3637_s30 = sld [smem:[#allocation59_spill]]  ;;  %s2815_s18 = smov [#allocation24]  }
 0x110   :  { %242 = dma.hbm_to_vmem [thread:$0]  %s3079_s1, 4096, %s237_s15, [#allocation20], %s2796_s11, %s2796_s11, %s2797_s16  }
 0x111   :  { %s263_s22 = sshll.u32 %s2815_s18, 4  ;;  %s2620_s20 = sshra.s32 %s262_s17, 4  ;;  %s264_s22 = int_to_ptr.vmem [resolvable:$true] %s263_s22  ;;  %s2621_s20 = int_to_ptr.hbm [resolvable:$true] %s2620_s20 }
 0x112   :  { %s2622_s8 = scalar_lea.hbm %s2621_s20, 2  ;;  %s2624_s19 = scalar_lea.hbm %s3636_s4, 2 }
 0x113   :  { %p2623_p6 = scmp.ne.s32.totalorder %s2621_s20, %s2622_s8  ;;  %p2625_p7 = scmp.lt.s32.totalorder %s2621_s20, %s3636_s4 }
 0x114   :  { %p2626_p8 = scmp.lt.s32.totalorder %s2624_s19, %s2622_s8 }
 0x115   :  { %s283_s0 = sshll.u32 %s3637_s30, 4  ;;  %s284_s0 = int_to_ptr.hbm [resolvable:$true] %s283_s0 }
 0x116   :  { %p2627_p9 = por %p2626_p8, %p2625_p7 }
 0x118   :  { %p2628_p10 = pnand %p2627_p9, %p2623_p6 }
 0x11a   :  { %2631 = shalt.err (!%p2628_p10)
}
 0x11b   :  { %266 = dma.hbm_to_vmem [thread:$0]  %s262_s17, 32, %s264_s22, [#allocation23]  }
 0x11c   :  { %s3638_s27 = sld [smem:[#allocation60_spill]]  ;;  %s2816_s11 = smov [#allocation27]  }
 0x11d   :  { %s285_s16 = sshll.u32 %s2816_s11, 4  ;;  %s2644_s28 = sshra.s32 %s284_s0, 4  ;;  %s286_s16 = int_to_ptr.vmem [resolvable:$true] %s285_s16  ;;  %s2645_s28 = int_to_ptr.hbm [resolvable:$true] %s2644_s28 }
 0x11e   :  { %s2646_s24 = scalar_lea.hbm %s2645_s28, 2  ;;  %s2648_s29 = scalar_lea.hbm %s3637_s30, 2 }
 0x11f   :  { %p2647_p11 = scmp.ne.s32.totalorder %s2645_s28, %s2646_s24  ;;  %p2649_p12 = scmp.lt.s32.totalorder %s2645_s28, %s3637_s30 }
 0x120   :  { %p2650_p13 = scmp.lt.s32.totalorder %s2648_s29, %s2646_s24 }
 0x122   :  { %s307_s26 = sshll.u32 %s3638_s27, 4  ;;  %p2651_p0 = por %p2650_p13, %p2649_p12  ;;  %s308_s26 = int_to_ptr.hbm [resolvable:$true] %s307_s26 }
 0x124   :  { %p2652_p1 = pnand %p2651_p0, %p2647_p11 }
 0x126   :  { %2655 = shalt.err (!%p2652_p1)
}
 0x127   :  { %288 = dma.hbm_to_vmem [thread:$0]  %s284_s0, 32, %s286_s16, [#allocation26]  }
 0x128   :  { %s331_s23 = sshll.u32 %s2958_s25, 4  ;;  %s2817_s1 = smov [#allocation30]   ;;  %s332_s23 = int_to_ptr.hbm [resolvable:$true] %s331_s23 }
 0x129   :  { %s309_s9 = sshll.u32 %s2817_s1, 4  ;;  %s2668_s13 = sshra.s32 %s308_s26, 4  ;;  %s310_s9 = int_to_ptr.vmem [resolvable:$true] %s309_s9  ;;  %s2669_s13 = int_to_ptr.hbm [resolvable:$true] %s2668_s13 }
 0x12a   :  { %s2670_s5 = scalar_lea.hbm %s2669_s13, 1  ;;  %s2672_s7 = scalar_lea.hbm %s3638_s27, 1 }
 0x12b   :  { %p2671_p2 = scmp.ne.s32.totalorder %s2669_s13, %s2670_s5  ;;  %p2673_p3 = scmp.lt.s32.totalorder %s2669_s13, %s3638_s27 }
 0x12c   :  { %p2674_p4 = scmp.lt.s32.totalorder %s2672_s7, %s2670_s5 }
 0x12e   :  { %p2675_p5 = por %p2674_p4, %p2673_p3 }
 0x130   :  { %p2676_p6 = pnand %p2675_p5, %p2671_p2 }
 0x132   :  { %2679 = shalt.err (!%p2676_p6)
}
 0x133   :  { %312 = dma.hbm_to_vmem [thread:$0]  %s308_s26, 16, %s310_s9, [#allocation29]  }
 0x134   :  { %s2818_s10 = smov [#allocation33]   ;;  %s355_s2 = sshll.u32 %s2968_s21, 4  ;;  %s356_s2 = int_to_ptr.hbm [resolvable:$true] %s355_s2 }
 0x135   :  { %s333_s4 = sshll.u32 %s2818_s10, 4  ;;  %s2692_s15 = sshra.s32 %s332_s23, 4  ;;  %s334_s4 = int_to_ptr.vmem [resolvable:$true] %s333_s4  ;;  %s2693_s15 = int_to_ptr.hbm [resolvable:$true] %s2692_s15 }
 0x136   :  { %s2694_s17 = scalar_lea.hbm %s2693_s15, 1  ;;  %s2696_s12 = scalar_lea.hbm %s2958_s25, 1 }
 0x137   :  { %p2695_p7 = scmp.ne.s32.totalorder %s2693_s15, %s2694_s17  ;;  %p2697_p8 = scmp.lt.s32.totalorder %s2693_s15, %s2958_s25 }
 0x138   :  { %p2698_p9 = scmp.lt.s32.totalorder %s2696_s12, %s2694_s17 }
 0x13a   :  { %p2699_p10 = por %p2698_p9, %p2697_p8 }
 0x13c   :  { %p2700_p11 = pnand %p2699_p10, %p2695_p7 }
 0x13e   :  { %2703 = shalt.err (!%p2700_p11)
}
 0x13f   :  { %336 = dma.hbm_to_vmem [thread:$0]  %s332_s23, 16, %s334_s4, [#allocation32]  }
 0x140   :  { %s2819_s3 = smov [#allocation36]   ;;  %s2716_s30 = sshra.s32 %s356_s2, 4  ;;  %s2717_s30 = int_to_ptr.hbm [resolvable:$true] %s2716_s30 }
 0x141   :  { %s357_s14 = sshll.u32 %s2819_s3, 4  ;;  %s2718_s0 = scalar_lea.hbm %s2717_s30, 1  ;;  %s358_s14 = int_to_ptr.vmem [resolvable:$true] %s357_s14 }
 0x142   :  { %p2719_p12 = scmp.ne.s32.totalorder %s2717_s30, %s2718_s0  ;;  %s2720_s18 = scalar_lea.hbm %s2968_s21, 1 }
 0x143   :  { %p2721_p13 = scmp.lt.s32.totalorder %s2717_s30, %s2968_s21  ;;  %p2722_p0 = scmp.lt.s32.totalorder %s2720_s18, %s2718_s0 }
 0x145   :  { %p2723_p1 = por %p2722_p0, %p2721_p13 }
 0x147   :  { %p2724_p2 = pnand %p2723_p1, %p2719_p12 }
 0x149   :  { %2727 = shalt.err (!%p2724_p2)
}
 0x14a   :  { %360 = dma.hbm_to_vmem [thread:$0]  %s356_s2, 16, %s358_s14, [#allocation35]  }
 0x14b   :  { %2740 = dma.done.wait [#allocation3], 1536  }
 0x14c   :  { %2741 = vsyncadd [#allocation3], 4294965760 }
 0x14d   :  { %2742 = dma.done.wait [#allocation5], 64  }
 0x14e   :  { %2743 = vsyncadd [#allocation5], 4294967232 }
 0x14f   :  { %2744 = dma.done.wait [#allocation8], 64  }
 0x150   :  { %2745 = vsyncadd [#allocation8], 4294967232 }
 0x151   :  { %2746 = dma.done.wait [#allocation11], 16384  }
 0x152   :  { %2747 = vsyncadd [#allocation11], 4294950912 }
 0x153   :  { %2748 = dma.done.wait [#allocation14], 64  }
 0x154   :  { %2749 = vsyncadd [#allocation14], 4294967232 }
 0x155   :  { %2750 = dma.done.wait [#allocation17], 8192  }
 0x156   :  { %2751 = vsyncadd [#allocation17], 4294959104 }
 0x157   :  { %2752 = dma.done.wait [#allocation20], 4112  }
 0x158   :  { %2753 = vsyncadd [#allocation20], 4294963184 }
 0x159   :  { %2754 = dma.done.wait [#allocation23], 4128  }
 0x15a   :  { %2755 = vsyncadd [#allocation23], 4294963168 }
 0x15b   :  { %2756 = dma.done.wait [#allocation26], 64  }
 0x15c   :  { %2757 = vsyncadd [#allocation26], 4294967232 }
 0x15d   :  { %2758 = dma.done.wait [#allocation29], 4112  }
 0x15e   :  { %2759 = vsyncadd [#allocation29], 4294963184 }
 0x15f   :  { %2760 = dma.done.wait [#allocation32], 2064  }
 0x160   :  { %2761 = vsyncadd [#allocation32], 4294965232 }
 0x161   :  { %2762 = dma.done.wait [#allocation35], 2064  }
 0x162   :  { %2763 = vsyncadd [#allocation35], 4294965232  ;;  %v475_v0 = vld [vmem:[#allocation2 + $0x50] sm:$0xff]  ;;  %v476_v1 = vld [vmem:[#allocation2 + $0x58] sm:$0xff]  ;;  %s3639_s21 = sld [smem:[#allocation49_spill]]  ;;  %vm483_vm0 = vcmask 392192  }
 0x163   :  { %v473_v2 = vld [vmem:[#allocation2 + $0x40] sm:$0xff]  ;;  %530 = vmatpush.msra.mxu0 %v475_v0  ;;  %583 = vmatpush.msra.mxu1 %v476_v1  ;;  %v474_v3 = vld [vmem:[#allocation2 + $0x48] sm:$0xff]  ;;  %v471_v4 = vld [vmem:[#allocation2 + $0x30] sm:$0xff]  ;;  %s3640_s25 = sld [smem:[#allocation51_spill]] }
 0x164   :  { %v472_v5 = vld [vmem:[#allocation2 + $0x38] sm:$0xff]  ;;  %v469_v6 = vld [vmem:[#allocation2 + $0x20] sm:$0xff]  ;;  %v470_v7 = vld [vmem:[#allocation2 + $0x28] sm:$0xff]  ;;  %s3641_s22 = sld [smem:[#allocation52_spill]] }
 0x165   :  { %531 = vmatpush.msra.mxu0 %v473_v2  ;;  %584 = vmatpush.msra.mxu1 %v474_v3  ;;  %v467_v8 = vld [vmem:[#allocation2 + $0x10] sm:$0xff]  ;;  %v468_v9 = vld [vmem:[#allocation2 + $0x18] sm:$0xff]  ;;  %v465_v10 = vld [vmem:[#allocation2] sm:$0xff]  ;;  %s3642_s20 = sld [smem:[#allocation50_spill]] }
 0x166   :  { %v466_v11 = vld [vmem:[#allocation2 + $0x8] sm:$0xff]  ;;  %v477_v58 = vld [vmem:[#allocation4] sm:$0x3]  ;;  %v650_v1 = vld [vmem:[#allocation6] sm:$0x3]  ;;  %s3643_s8 = sld [smem:[#allocation53_spill]] }
 0x167   :  { %532 = vmatpush.msra.mxu0 %v471_v4  ;;  %585 = vmatpush.msra.mxu1 %v472_v5  ;;  %v3184_v63 = vperm.slane %v477_v58, 0  ;;  %v3186_v0 = vperm.slane %v477_v58, 1  ;;  %s3644_s19 = sld [smem:[#allocation55_spill]] }
 0x168   :  { %v453_v12 = vld [vmem:[%s3639_s21] sm:$0xff]  ;;  %v454_v13 = vld [vmem:[%s3639_s21 + $0x8] sm:$0xff]  ;;  %v455_v14 = vld [vmem:[%s3639_s21 + $0x10] sm:$0xff] }
 0x169   :  { %533 = vmatpush.msra.mxu0 %v469_v6  ;;  %586 = vmatpush.msra.mxu1 %v470_v7  ;;  %v456_v15 = vld [vmem:[%s3639_s21 + $0x18] sm:$0xff]  ;;  %v457_v16 = vld [vmem:[%s3639_s21 + $0x20] sm:$0xff]  ;;  %v458_v17 = vld [vmem:[%s3639_s21 + $0x28] sm:$0xff] }
 0x16a   :  { %v459_v18 = vld [vmem:[%s3639_s21 + $0x30] sm:$0xff]  ;;  %v460_v19 = vld [vmem:[%s3639_s21 + $0x38] sm:$0xff]  ;;  %v738_v21 = vld [vmem:[%s3640_s25 + $0xe0] sm:$0xff] }
 0x16b   :  { %534 = vmatpush.msra.mxu0 %v467_v8  ;;  %587 = vmatpush.msra.mxu1 %v468_v9  ;;  %v740_v20 = vld [vmem:[%s3640_s25 + $0xf0] sm:$0xff]  ;;  %v770_v23 = vld [vmem:[%s3640_s25 + $0x1e0] sm:$0xff]  ;;  %v462_v37 = vld [vmem:[%s3639_s21 + $0x48] sm:$0xff]  ;;  %v3192_v8 = vperm.slane %v650_v1, 0 }
 0x16c   :  { %v772_v22 = vld [vmem:[%s3640_s25 + $0x1f0] sm:$0xff]  ;;  %v734_v26 = vld [vmem:[%s3640_s25 + $0xc0] sm:$0xff]  ;;  %v464_v44 = vld [vmem:[%s3639_s21 + $0x58] sm:$0xff] }
 0x16d   :  { %535 = vmatpush.msra.mxu0 %v465_v10  ;;  %588 = vmatpush.msra.mxu1 %v466_v11  ;;  %v736_v24 = vld [vmem:[%s3640_s25 + $0xd0] sm:$0xff]  ;;  %v766_v27 = vld [vmem:[%s3640_s25 + $0x1c0] sm:$0xff]  ;;  %v3195_v10 = vperm.slane %v650_v1, 1 }
 0x16e   :  { %2102 = vmatmul.msk.f32.vlgmr.msra.gmra.mxu0 %vm483_vm0, %v453_v12  ;;  %2114 = vmatmul.msk.f32.vlgmr.msra.gmra.mxu1 %vm483_vm0, %v453_v12  ;;  %v768_v25 = vld [vmem:[%s3640_s25 + $0x1d0] sm:$0xff]  ;;  %v461_v28 = vld [vmem:[%s3639_s21 + $0x40] sm:$0xff] }
 0x16f   :  { %978 = vmatpush.msrb.mxu0 %v740_v20  ;;  %1013 = vmatpush.msrb.mxu1 %v772_v22  ;;  %v732_v29 = vld [vmem:[%s3640_s25 + $0xb0] sm:$0xff]  ;;  %v730_v31 = vld [vmem:[%s3640_s25 + $0xa0] sm:$0xff] }
 0x170   :  { %v764_v30 = vld [vmem:[%s3640_s25 + $0x1b0] sm:$0xff]  ;;  %v762_v32 = vld [vmem:[%s3640_s25 + $0x1a0] sm:$0xff] }
 0x171   :  { %979 = vmatpush.msrb.mxu0 %v738_v21  ;;  %1014 = vmatpush.msrb.mxu1 %v770_v23  ;;  %v728_v33 = vld [vmem:[%s3640_s25 + $0x90] sm:$0xff]  ;;  %v726_v35 = vld [vmem:[%s3640_s25 + $0x80] sm:$0xff] }
 0x172   :  { %v760_v34 = vld [vmem:[%s3640_s25 + $0x190] sm:$0xff]  ;;  %v758_v36 = vld [vmem:[%s3640_s25 + $0x180] sm:$0xff] }
 0x173   :  { %980 = vmatpush.msrb.mxu0 %v736_v24  ;;  %1015 = vmatpush.msrb.mxu1 %v768_v25  ;;  %v724_v38 = vld [vmem:[%s3640_s25 + $0x70] sm:$0xff]  ;;  %v722_v40 = vld [vmem:[%s3640_s25 + $0x60] sm:$0xff] }
 0x174   :  { %v756_v39 = vld [vmem:[%s3640_s25 + $0x170] sm:$0xff]  ;;  %v754_v41 = vld [vmem:[%s3640_s25 + $0x160] sm:$0xff] }
 0x175   :  { %981 = vmatpush.msrb.mxu0 %v734_v26  ;;  %1016 = vmatpush.msrb.mxu1 %v766_v27  ;;  %v720_v42 = vld [vmem:[%s3640_s25 + $0x50] sm:$0xff]  ;;  %v718_v45 = vld [vmem:[%s3640_s25 + $0x40] sm:$0xff] }
 0x176   :  { %2103 = vmatmul.msk.f32.gmra.mxu0 %vm483_vm0, %v454_v13  ;;  %2115 = vmatmul.msk.f32.gmra.mxu1 %vm483_vm0, %v454_v13  ;;  %v463_v43 = vld [vmem:[%s3639_s21 + $0x50] sm:$0xff]  ;;  %v750_v48 = vld [vmem:[%s3640_s25 + $0x140] sm:$0xff] }
 0x177   :  { %982 = vmatpush.msrb.mxu0 %v732_v29  ;;  %1017 = vmatpush.msrb.mxu1 %v764_v30  ;;  %v752_v46 = vld [vmem:[%s3640_s25 + $0x150] sm:$0xff]  ;;  %v714_v49 = vld [vmem:[%s3640_s25 + $0x20] sm:$0xff] }
 0x178   :  { %v716_v47 = vld [vmem:[%s3640_s25 + $0x30] sm:$0xff]  ;;  %v746_v52 = vld [vmem:[%s3640_s25 + $0x120] sm:$0xff] }
 0x179   :  { %983 = vmatpush.msrb.mxu0 %v730_v31  ;;  %1018 = vmatpush.msrb.mxu1 %v762_v32  ;;  %v748_v50 = vld [vmem:[%s3640_s25 + $0x130] sm:$0xff]  ;;  %v710_v53 = vld [vmem:[%s3640_s25] sm:$0xff] }
 0x17a   :  { %v712_v51 = vld [vmem:[%s3640_s25 + $0x10] sm:$0xff]  ;;  %v742_v55 = vld [vmem:[%s3640_s25 + $0x100] sm:$0xff] }
 0x17b   :  { %984 = vmatpush.msrb.mxu0 %v728_v33  ;;  %1019 = vmatpush.msrb.mxu1 %v760_v34  ;;  %v744_v54 = vld [vmem:[%s3640_s25 + $0x110] sm:$0xff]  ;;  %v802_v59 = vld [vmem:[%s3641_s22 + $0xe0] sm:$0xff] }
 0x17c   :  { %v804_v56 = vld [vmem:[%s3641_s22 + $0xf0] sm:$0xff]  ;;  %v834_v60 = vld [vmem:[%s3641_s22 + $0x1e0] sm:$0xff] }
 0x17d   :  { %985 = vmatpush.msrb.mxu0 %v726_v35  ;;  %1020 = vmatpush.msrb.mxu1 %v758_v36  ;;  %v836_v57 = vld [vmem:[%s3641_s22 + $0x1f0] sm:$0xff]  ;;  %v798_v2 = vld [vmem:[%s3641_s22 + $0xc0] sm:$0xff] }
 0x17e   :  { %2104 = vmatmul.msk.f32.gmra.mxu0 %vm483_vm0, %v455_v14  ;;  %2116 = vmatmul.msk.f32.gmra.mxu1 %vm483_vm0, %v455_v14  ;;  %v800_v61 = vld [vmem:[%s3641_s22 + $0xd0] sm:$0xff]  ;;  %v830_v3 = vld [vmem:[%s3641_s22 + $0x1c0] sm:$0xff] }
 0x17f   :  { %986 = vmatpush.msrb.mxu0 %v724_v38  ;;  %1021 = vmatpush.msrb.mxu1 %v756_v39  ;;  %v832_v62 = vld [vmem:[%s3641_s22 + $0x1d0] sm:$0xff]  ;;  %v680_v6 = vld [vmem:[%s3642_s20] sm:$0x3] }
 0x180   :  { %838 = vmatpush.msra.mxu2 %v804_v56  ;;  %873 = vmatpush.msra.mxu3 %v836_v57  ;;  %v796_v11 = vld [vmem:[%s3641_s22 + $0xb0] sm:$0xff]  ;;  %v790_v25 = vld [vmem:[%s3641_s22 + $0x80] sm:$0xff] }
 0x181   :  { %987 = vmatpush.msrb.mxu0 %v722_v40  ;;  %1022 = vmatpush.msrb.mxu1 %v754_v41  ;;  %v828_v12 = vld [vmem:[%s3641_s22 + $0x1b0] sm:$0xff]  ;;  %v822_v26 = vld [vmem:[%s3641_s22 + $0x180] sm:$0xff] }
 0x182   :  { %839 = vmatpush.msra.mxu2 %v802_v59  ;;  %874 = vmatpush.msra.mxu3 %v834_v60  ;;  %v792_v21 = vld [vmem:[%s3641_s22 + $0x90] sm:$0xff]  ;;  %v786_v35 = vld [vmem:[%s3641_s22 + $0x60] sm:$0xff] }
 0x183   :  { %988 = vmatpush.msrb.mxu0 %v720_v42  ;;  %1023 = vmatpush.msrb.mxu1 %v752_v46  ;;  %v824_v22 = vld [vmem:[%s3641_s22 + $0x190] sm:$0xff]  ;;  %v818_v36 = vld [vmem:[%s3641_s22 + $0x160] sm:$0xff] }
 0x184   :  { %840 = vmatpush.msra.mxu2 %v800_v61  ;;  %875 = vmatpush.msra.mxu3 %v832_v62  ;;  %v788_v31 = vld [vmem:[%s3641_s22 + $0x70] sm:$0xff]  ;;  %v774_v61 = vld [vmem:[%s3641_s22] sm:$0xff] }
 0x185   :  { %989 = vmatpush.msrb.mxu0 %v718_v45  ;;  %1024 = vmatpush.msrb.mxu1 %v750_v48  ;;  %v820_v32 = vld [vmem:[%s3641_s22 + $0x170] sm:$0xff]  ;;  %v806_v62 = vld [vmem:[%s3641_s22 + $0x100] sm:$0xff] }
 0x186   :  { %2105 = vmatmul.msk.f32.gmra.mxu0 %vm483_vm0, %v456_v15  ;;  %2117 = vmatmul.msk.f32.gmra.mxu1 %vm483_vm0, %v456_v15  ;;  %v3199_v15 = vperm.slane %v680_v6, 0  ;;  %v784_v39 = vld [vmem:[%s3641_s22 + $0x50] sm:$0xff] }
 0x187   :  { %990 = vmatpush.msrb.mxu0 %v716_v47  ;;  %1025 = vmatpush.msrb.mxu1 %v748_v50  ;;  %v816_v40 = vld [vmem:[%s3641_s22 + $0x150] sm:$0xff] }
 0x188   :  { %841 = vmatpush.msra.mxu2 %v798_v2  ;;  %876 = vmatpush.msra.mxu3 %v830_v3  ;;  %v812_v50 = vld [vmem:[%s3641_s22 + $0x130] sm:$0xff] }
 0x189   :  { %991 = vmatpush.msrb.mxu0 %v714_v49  ;;  %1026 = vmatpush.msrb.mxu1 %v746_v52  ;;  %v780_v49 = vld [vmem:[%s3641_s22 + $0x30] sm:$0xff] }
 0x18a   :  { %842 = vmatpush.msra.mxu2 %v796_v11  ;;  %877 = vmatpush.msra.mxu3 %v828_v12  ;;  %v776_v57 = vld [vmem:[%s3641_s22 + $0x10] sm:$0xff]  ;;  %v805_v11 = vld [vmem:[%s3641_s22 + $0xf8] sm:$0xff] }
 0x18b   :  { %992 = vmatpush.msrb.mxu0 %v712_v51  ;;  %1027 = vmatpush.msrb.mxu1 %v744_v54  ;;  %v810_v54 = vld [vmem:[%s3641_s22 + $0x120] sm:$0xff]  ;;  %v808_v58 = vld [vmem:[%s3641_s22 + $0x110] sm:$0xff]  ;;  %v837_v12 = vld [vmem:[%s3641_s22 + $0x1f8] sm:$0xff] }
 0x18d   :  { %993 = vmatpush.msrb.mxu0 %v710_v53  ;;  %1028 = vmatpush.msrb.mxu1 %v742_v55  ;;  %v778_v53 = vld [vmem:[%s3641_s22 + $0x20] sm:$0xff] }
 0x18e   :  { %2106 = vmatmul.msk.f32.gmra.mxu0 %vm483_vm0, %v457_v16  ;;  %2118 = vmatmul.msk.f32.gmra.mxu1 %vm483_vm0, %v457_v16  ;;  %v3201_v16 = vperm.slane %v680_v6, 1 }
 0x196   :  { %2107 = vmatmul.msk.f32.gmra.mxu0 %vm483_vm0, %v458_v17  ;;  %2119 = vmatmul.msk.f32.gmra.mxu1 %vm483_vm0, %v458_v17  ;;  %v794_v17 = vld [vmem:[%s3641_s22 + $0xa0] sm:$0xff] }
 0x197   :  { %843 = vmatpush.msra.mxu2 %v794_v17 }
 0x199   :  { %844 = vmatpush.msra.mxu2 %v792_v21 }
 0x19b   :  { %845 = vmatpush.msra.mxu2 %v790_v25 }
 0x19d   :  { %846 = vmatpush.msra.mxu2 %v788_v31  ;;  %v799_v31 = vld [vmem:[%s3641_s22 + $0xc8] sm:$0xff] }
 0x19e   :  { %2108 = vmatmul.msk.f32.gmra.mxu0 %vm483_vm0, %v459_v18  ;;  %2120 = vmatmul.msk.f32.gmra.mxu1 %vm483_vm0, %v459_v18  ;;  %v826_v18 = vld [vmem:[%s3641_s22 + $0x1a0] sm:$0xff] }
 0x19f   :  { %878 = vmatpush.msra.mxu3 %v826_v18  ;;  %847 = vmatpush.msra.mxu2 %v786_v35 }
 0x1a1   :  { %879 = vmatpush.msra.mxu3 %v824_v22  ;;  %848 = vmatpush.msra.mxu2 %v784_v39 }
 0x1a3   :  { %880 = vmatpush.msra.mxu3 %v822_v26 }
 0x1a5   :  { %881 = vmatpush.msra.mxu3 %v820_v32  ;;  %v831_v32 = vld [vmem:[%s3641_s22 + $0x1c8] sm:$0xff] }
 0x1a6   :  { %2109 = vmatmul.msk.f32.gmra.mxu0 %vm483_vm0, %v460_v19  ;;  %2121 = vmatmul.msk.f32.gmra.mxu1 %vm483_vm0, %v460_v19 }
 0x1a7   :  { %882 = vmatpush.msra.mxu3 %v818_v36  ;;  %v829_v36 = vld [vmem:[%s3641_s22 + $0x1b8] sm:$0xff] }
 0x1a9   :  { %883 = vmatpush.msra.mxu3 %v816_v40 }
 0x1ae   :  { %2110 = vmatmul.msk.f32.gmra.mxu0 %vm483_vm0, %v461_v28  ;;  %2122 = vmatmul.msk.f32.gmra.mxu1 %vm483_vm0, %v461_v28 }
 0x1b6   :  { %2111 = vmatmul.msk.f32.gmra.mxu0 %vm483_vm0, %v462_v37  ;;  %2123 = vmatmul.msk.f32.gmra.mxu1 %vm483_vm0, %v462_v37 }
 0x1be   :  { %2112 = vmatmul.msk.f32.gmra.mxu0 %vm483_vm0, %v463_v43  ;;  %2124 = vmatmul.msk.f32.gmra.mxu1 %vm483_vm0, %v463_v43  ;;  %v782_v43 = vld [vmem:[%s3641_s22 + $0x40] sm:$0xff] }
 0x1bf   :  { %849 = vmatpush.msra.mxu2 %v782_v43 }
 0x1c1   :  { %850 = vmatpush.msra.mxu2 %v780_v49  ;;  %v793_v49 = vld [vmem:[%s3641_s22 + $0x98] sm:$0xff] }
 0x1c3   :  { %851 = vmatpush.msra.mxu2 %v778_v53  ;;  %v791_v53 = vld [vmem:[%s3641_s22 + $0x88] sm:$0xff] }
 0x1c5   :  { %852 = vmatpush.msra.mxu2 %v776_v57 }
 0x1c6   :  { %2113 = vmatmul.msk.f32.gmra.mxu0 %vm483_vm0, %v464_v44  ;;  %2125 = vmatmul.msk.f32.gmra.mxu1 %vm483_vm0, %v464_v44  ;;  %v814_v44 = vld [vmem:[%s3641_s22 + $0x140] sm:$0xff] }
 0x1c7   :  { %884 = vmatpush.msra.mxu3 %v814_v44  ;;  %853 = vmatpush.msra.mxu2 %v774_v61 }
 0x1c9   :  { %885 = vmatpush.msra.mxu3 %v812_v50  ;;  %908 = vmatpush.msrb.mxu2 %v805_v11  ;;  %v825_v50 = vld [vmem:[%s3641_s22 + $0x198] sm:$0xff] }
 0x1ca   :  { %v785_v11 = vld [vmem:[%s3641_s22 + $0x58] sm:$0xff] }
 0x1cb   :  { %886 = vmatpush.msra.mxu3 %v810_v54 }
 0x1cd   :  { %887 = vmatpush.msra.mxu3 %v808_v58 }
 0x1cf   :  { %888 = vmatpush.msra.mxu3 %v806_v62 }
 0x1d1   :  { %943 = vmatpush.msrb.mxu3 %v837_v12 }
 0x1eb   :  { %v537_v4 = vpop.f32.mrf.mxu0  ;;  %v590_v5 = vpop.f32.mrf.mxu1 }
 0x1ec   :  { %v538_v7 = vadd.f32 %v537_v4, %v3184_v63  ;;  %v591_v9 = vadd.f32 %v590_v5, %v3186_v0 }
 0x1ee   :  { %v626_v13 = vmax.f32 %v538_v7, 0.0  ;;  %v627_v14 = vmax.f32 %v591_v9, 0.0 }
 0x1f0   :  { %v656_v19 = vmul.f32 %v3192_v8, %v626_v13  ;;  %v657_v20 = vmul.f32 %v3195_v10, %v627_v14  ;;  %v803_v13 = vld [vmem:[%s3641_s22 + $0xe8] sm:$0xff] }
 0x1f1   :  { %v835_v14 = vld [vmem:[%s3641_s22 + $0x1e8] sm:$0xff]  ;;  %909 = vmatpush.msrb.mxu2 %v803_v13 }
 0x1f2   :  { %v3210_v23 = vadd.f32 %v3199_v15, %v656_v19  ;;  %v3213_v24 = vadd.f32 %v3201_v16, %v657_v20  ;;  %v801_v19 = vld [vmem:[%s3641_s22 + $0xd8] sm:$0xff]  ;;  %944 = vmatpush.msrb.mxu3 %v835_v14 }
 0x1f3   :  { %v540_v27 = vpop.f32.mrf.mxu0  ;;  %v593_v28 = vpop.f32.mrf.mxu1  ;;  %910 = vmatpush.msrb.mxu2 %v801_v19 }
 0x1f4   :  { %v541_v29 = vadd.f32 %v540_v27, %v3184_v63  ;;  %v594_v30 = vadd.f32 %v593_v28, %v3186_v0  ;;  %994 = vmatmul.f32.vlgmr.msrb.gmra.mxu0 %v3210_v23  ;;  %1029 = vmatmul.f32.vlgmr.msrb.gmra.mxu1 %v3213_v24 }
 0x1f5   :  { %911 = vmatpush.msrb.mxu2 %v799_v31 }
 0x1f6   :  { %v628_v33 = vmax.f32 %v541_v29, 0.0  ;;  %v629_v34 = vmax.f32 %v594_v30, 0.0  ;;  %v833_v30 = vld [vmem:[%s3641_s22 + $0x1d8] sm:$0xff] }
 0x1f7   :  { %945 = vmatpush.msrb.mxu3 %v833_v30 }
 0x1f8   :  { %v658_v37 = vmul.f32 %v3192_v8, %v628_v33  ;;  %v659_v38 = vmul.f32 %v3195_v10, %v629_v34  ;;  %v797_v33 = vld [vmem:[%s3641_s22 + $0xb8] sm:$0xff] }
 0x1f9   :  { %946 = vmatpush.msrb.mxu3 %v831_v32  ;;  %912 = vmatpush.msrb.mxu2 %v797_v33  ;;  %v813_v32 = vld [vmem:[%s3641_s22 + $0x138] sm:$0xff]  ;;  %v779_v33 = vld [vmem:[%s3641_s22 + $0x28] sm:$0xff] }
 0x1fa   :  { %v3230_v41 = vadd.f32 %v3199_v15, %v658_v37  ;;  %v3233_v42 = vadd.f32 %v3201_v16, %v659_v38 }
 0x1fb   :  { %v543_v45 = vpop.f32.mrf.mxu0  ;;  %v596_v46 = vpop.f32.mrf.mxu1  ;;  %947 = vmatpush.msrb.mxu3 %v829_v36 }
 0x1fc   :  { %v544_v47 = vadd.f32 %v543_v45, %v3184_v63  ;;  %v597_v48 = vadd.f32 %v596_v46, %v3186_v0  ;;  %997 = vmatmul.f32.gmra.mxu0 %v3230_v41  ;;  %1032 = vmatmul.f32.gmra.mxu1 %v3233_v42 }
 0x1fe   :  { %v630_v51 = vmax.f32 %v544_v47, 0.0  ;;  %v631_v52 = vmax.f32 %v597_v48, 0.0  ;;  %v795_v47 = vld [vmem:[%s3641_s22 + $0xa8] sm:$0xff] }
 0x1ff   :  { %v827_v48 = vld [vmem:[%s3641_s22 + $0x1a8] sm:$0xff]  ;;  %913 = vmatpush.msrb.mxu2 %v795_v47 }
 0x200   :  { %v660_v55 = vmul.f32 %v3192_v8, %v630_v51  ;;  %v661_v56 = vmul.f32 %v3195_v10, %v631_v52  ;;  %948 = vmatpush.msrb.mxu3 %v827_v48  ;;  %v775_v47 = vld [vmem:[%s3641_s22 + $0x8] sm:$0xff] }
 0x201   :  { %914 = vmatpush.msrb.mxu2 %v793_v49 }
 0x202   :  { %v3250_v59 = vadd.f32 %v3199_v15, %v660_v55  ;;  %v3253_v60 = vadd.f32 %v3201_v16, %v661_v56  ;;  %949 = vmatpush.msrb.mxu3 %v825_v50  ;;  %v807_v50 = vld [vmem:[%s3641_s22 + $0x108] sm:$0xff] }
 0x203   :  { %v546_v1 = vpop.f32.mrf.mxu0  ;;  %v599_v2 = vpop.f32.mrf.mxu1  ;;  %915 = vmatpush.msrb.mxu2 %v791_v53 }
 0x204   :  { %v547_v3 = vadd.f32 %v546_v1, %v3184_v63  ;;  %v600_v4 = vadd.f32 %v599_v2, %v3186_v0  ;;  %1000 = vmatmul.f32.gmra.mxu0 %v3250_v59  ;;  %1035 = vmatmul.f32.gmra.mxu1 %v3253_v60  ;;  %v823_v2 = vld [vmem:[%s3641_s22 + $0x188] sm:$0xff] }
 0x205   :  { %950 = vmatpush.msrb.mxu3 %v823_v2  ;;  %v771_v2 = vld [vmem:[%s3640_s25 + $0x1e8] sm:$0xff] }
 0x206   :  { %v632_v5 = vmax.f32 %v547_v3, 0.0  ;;  %v633_v6 = vmax.f32 %v600_v4, 0.0  ;;  %v789_v3 = vld [vmem:[%s3641_s22 + $0x78] sm:$0xff] }
 0x207   :  { %v821_v4 = vld [vmem:[%s3641_s22 + $0x178] sm:$0xff]  ;;  %916 = vmatpush.msrb.mxu2 %v789_v3 }
 0x208   :  { %v662_v7 = vmul.f32 %v3192_v8, %v632_v5  ;;  %v663_v9 = vmul.f32 %v3195_v10, %v633_v6  ;;  %v787_v5 = vld [vmem:[%s3641_s22 + $0x68] sm:$0xff]  ;;  %951 = vmatpush.msrb.mxu3 %v821_v4 }
 0x209   :  { %917 = vmatpush.msrb.mxu2 %v787_v5  ;;  %v737_v5 = vld [vmem:[%s3640_s25 + $0xd8] sm:$0xff] }
 0x20a   :  { %v3268_v17 = vadd.f32 %v3199_v15, %v662_v7  ;;  %v3271_v18 = vadd.f32 %v3201_v16, %v663_v9  ;;  %v819_v9 = vld [vmem:[%s3641_s22 + $0x168] sm:$0xff] }
 0x20b   :  { %v549_v20 = vpop.f32.mrf.mxu0  ;;  %v602_v21 = vpop.f32.mrf.mxu1  ;;  %952 = vmatpush.msrb.mxu3 %v819_v9  ;;  %918 = vmatpush.msrb.mxu2 %v785_v11 }
 0x20c   :  { %v550_v22 = vadd.f32 %v549_v20, %v3184_v63  ;;  %v603_v25 = vadd.f32 %v602_v21, %v3186_v0  ;;  %1003 = vmatmul.f32.gmra.mxu0 %v3268_v17  ;;  %1038 = vmatmul.f32.gmra.mxu1 %v3271_v18 }
 0x20e   :  { %v634_v26 = vmax.f32 %v550_v22, 0.0  ;;  %v635_v27 = vmax.f32 %v603_v25, 0.0 }
 0x210   :  { %v664_v28 = vmul.f32 %v3192_v8, %v634_v26  ;;  %v665_v29 = vmul.f32 %v3195_v10, %v635_v27  ;;  %v817_v26 = vld [vmem:[%s3641_s22 + $0x158] sm:$0xff]  ;;  %v783_v27 = vld [vmem:[%s3641_s22 + $0x48] sm:$0xff] }
 0x211   :  { %953 = vmatpush.msrb.mxu3 %v817_v26  ;;  %919 = vmatpush.msrb.mxu2 %v783_v27  ;;  %v767_v26 = vld [vmem:[%s3640_s25 + $0x1c8] sm:$0xff]  ;;  %v733_v27 = vld [vmem:[%s3640_s25 + $0xb8] sm:$0xff] }
 0x212   :  { %v3285_v34 = vadd.f32 %v3199_v15, %v664_v28  ;;  %v3288_v35 = vadd.f32 %v3201_v16, %v665_v29  ;;  %v815_v28 = vld [vmem:[%s3641_s22 + $0x148] sm:$0xff]  ;;  %v781_v29 = vld [vmem:[%s3641_s22 + $0x38] sm:$0xff] }
 0x213   :  { %v552_v37 = vpop.f32.mrf.mxu0  ;;  %v605_v38 = vpop.f32.mrf.mxu1  ;;  %954 = vmatpush.msrb.mxu3 %v815_v28  ;;  %920 = vmatpush.msrb.mxu2 %v781_v29 }
 0x214   :  { %v553_v39 = vadd.f32 %v552_v37, %v3184_v63  ;;  %v606_v40 = vadd.f32 %v605_v38, %v3186_v0  ;;  %1006 = vmatmul.f32.gmra.mxu0 %v3285_v34  ;;  %1041 = vmatmul.f32.gmra.mxu1 %v3288_v35 }
 0x215   :  { %955 = vmatpush.msrb.mxu3 %v813_v32  ;;  %921 = vmatpush.msrb.mxu2 %v779_v33  ;;  %v765_v32 = vld [vmem:[%s3640_s25 + $0x1b8] sm:$0xff]  ;;  %v731_v33 = vld [vmem:[%s3640_s25 + $0xa8] sm:$0xff] }
 0x216   :  { %v636_v43 = vmax.f32 %v553_v39, 0.0  ;;  %v637_v44 = vmax.f32 %v606_v40, 0.0  ;;  %v811_v40 = vld [vmem:[%s3641_s22 + $0x128] sm:$0xff] }
 0x217   :  { %956 = vmatpush.msrb.mxu3 %v811_v40 }
 0x218   :  { %v666_v45 = vmul.f32 %v3192_v8, %v636_v43  ;;  %v667_v46 = vmul.f32 %v3195_v10, %v637_v44  ;;  %v777_v43 = vld [vmem:[%s3641_s22 + $0x18] sm:$0xff] }
 0x219   :  { %922 = vmatpush.msrb.mxu2 %v777_v43 }
 0x21a   :  { %v3302_v51 = vadd.f32 %v3199_v15, %v666_v45  ;;  %v3305_v52 = vadd.f32 %v3201_v16, %v667_v46  ;;  %v809_v46 = vld [vmem:[%s3641_s22 + $0x118] sm:$0xff] }
 0x21b   :  { %v555_v54 = vpop.f32.mrf.mxu0  ;;  %v608_v55 = vpop.f32.mrf.mxu1  ;;  %957 = vmatpush.msrb.mxu3 %v809_v46  ;;  %923 = vmatpush.msrb.mxu2 %v775_v47  ;;  %v763_v46 = vld [vmem:[%s3640_s25 + $0x1a8] sm:$0xff]  ;;  %v729_v47 = vld [vmem:[%s3640_s25 + $0x98] sm:$0xff] }
 0x21c   :  { %v556_v56 = vadd.f32 %v555_v54, %v3184_v63  ;;  %v609_v57 = vadd.f32 %v608_v55, %v3186_v0  ;;  %1009 = vmatmul.f32.gmra.mxu0 %v3302_v51  ;;  %1044 = vmatmul.f32.gmra.mxu1 %v3305_v52 }
 0x21d   :  { %958 = vmatpush.msrb.mxu3 %v807_v50 }
 0x21e   :  { %v638_v58 = vmax.f32 %v556_v56, 0.0  ;;  %v639_v61 = vmax.f32 %v609_v57, 0.0 }
 0x220   :  { %v668_v62 = vmul.f32 %v3192_v8, %v638_v58  ;;  %v669_v1 = vmul.f32 %v3195_v10, %v639_v61  ;;  %v741_v61 = vld [vmem:[%s3640_s25 + $0xf8] sm:$0xff] }
 0x222   :  { %v3319_v6 = vadd.f32 %v3199_v15, %v668_v62  ;;  %v3322_v7 = vadd.f32 %v3201_v16, %v669_v1  ;;  %v773_v62 = vld [vmem:[%s3640_s25 + $0x1f8] sm:$0xff]  ;;  %v739_v1 = vld [vmem:[%s3640_s25 + $0xe8] sm:$0xff] }
 0x223   :  { %v558_v12 = vpop.f32.mrf.mxu0  ;;  %v611_v13 = vpop.f32.mrf.mxu1 }
 0x224   :  { %v559_v14 = vadd.f32 %v558_v12, %v3184_v63  ;;  %v612_v19 = vadd.f32 %v611_v13, %v3186_v0  ;;  %854 = vmatmul.f32.vlgmr.msra.gmra.mxu2 %v3319_v6  ;;  %889 = vmatmul.f32.vlgmr.msra.gmra.mxu3 %v3322_v7 }
 0x225   :  { %1048 = vmatpush.msra.mxu2 %v741_v61  ;;  %1083 = vmatpush.msra.mxu3 %v773_v62  ;;  %v725_v61 = vld [vmem:[%s3640_s25 + $0x78] sm:$0xff] }
 0x226   :  { %v640_v20 = vmax.f32 %v559_v14, 0.0  ;;  %v641_v21 = vmax.f32 %v612_v19, 0.0  ;;  %v757_v62 = vld [vmem:[%s3640_s25 + $0x178] sm:$0xff] }
 0x227   :  { %1049 = vmatpush.msra.mxu2 %v739_v1  ;;  %1084 = vmatpush.msra.mxu3 %v771_v2  ;;  %v723_v1 = vld [vmem:[%s3640_s25 + $0x68] sm:$0xff] }
 0x228   :  { %v670_v22 = vmul.f32 %v3192_v8, %v640_v20  ;;  %v671_v25 = vmul.f32 %v3195_v10, %v641_v21  ;;  %v751_v2 = vld [vmem:[%s3640_s25 + $0x148] sm:$0xff] }
 0x229   :  { %1050 = vmatpush.msra.mxu2 %v737_v5  ;;  %v715_v5 = vld [vmem:[%s3640_s25 + $0x28] sm:$0xff] }
 0x22a   :  { %v3337_v30 = vadd.f32 %v3199_v15, %v670_v22  ;;  %v3340_v31 = vadd.f32 %v3201_v16, %v671_v25  ;;  %v769_v22 = vld [vmem:[%s3640_s25 + $0x1d8] sm:$0xff]  ;;  %v735_v25 = vld [vmem:[%s3640_s25 + $0xc8] sm:$0xff] }
 0x22b   :  { %v561_v36 = vpop.f32.mrf.mxu0  ;;  %v614_v37 = vpop.f32.mrf.mxu1  ;;  %1085 = vmatpush.msra.mxu3 %v769_v22  ;;  %1051 = vmatpush.msra.mxu2 %v735_v25  ;;  %v1269_v22 = vld [vmem:[#allocation12 + $0xa8] sm:$0xff]  ;;  %v1266_v25 = vld [vmem:[#allocation12 + $0x90] sm:$0xff] }
 0x22c   :  { %v562_v38 = vadd.f32 %v561_v36, %v3184_v63  ;;  %v615_v39 = vadd.f32 %v614_v37, %v3186_v0  ;;  %857 = vmatmul.f32.gmra.mxu2 %v3337_v30  ;;  %892 = vmatmul.f32.gmra.mxu3 %v3340_v31 }
 0x22d   :  { %1086 = vmatpush.msra.mxu3 %v767_v26  ;;  %1052 = vmatpush.msra.mxu2 %v733_v27  ;;  %v1267_v26 = vld [vmem:[#allocation12 + $0x98] sm:$0xff]  ;;  %v1262_v27 = vld [vmem:[#allocation12 + $0x70] sm:$0xff] }
 0x22e   :  { %v642_v44 = vmax.f32 %v562_v38, 0.0  ;;  %v643_v45 = vmax.f32 %v615_v39, 0.0 }
 0x22f   :  { %1087 = vmatpush.msra.mxu3 %v765_v32  ;;  %1053 = vmatpush.msra.mxu2 %v731_v33  ;;  %v1261_v32 = vld [vmem:[#allocation12 + $0x68] sm:$0xff]  ;;  %v1258_v33 = vld [vmem:[#allocation12 + $0x50] sm:$0xff] }
 0x230   :  { %v672_v48 = vmul.f32 %v3192_v8, %v642_v44  ;;  %v673_v49 = vmul.f32 %v3195_v10, %v643_v45 }
 0x231   :  { %1088 = vmatpush.msra.mxu3 %v763_v46  ;;  %1054 = vmatpush.msra.mxu2 %v729_v47  ;;  %v1249_v46 = vld [vmem:[#allocation12 + $0x8] sm:$0xff]  ;;  %v1214_v47 = vld [vmem:[#allocation10 + $0xf0] sm:$0xff] }
 0x232   :  { %v3356_v53 = vadd.f32 %v3199_v15, %v672_v48  ;;  %v3359_v54 = vadd.f32 %v3201_v16, %v673_v49  ;;  %v761_v48 = vld [vmem:[%s3640_s25 + $0x198] sm:$0xff]  ;;  %v727_v49 = vld [vmem:[%s3640_s25 + $0x88] sm:$0xff] }
 0x233   :  { %v564_v55 = vpop.f32.mrf.mxu0  ;;  %v617_v56 = vpop.f32.mrf.mxu1  ;;  %1089 = vmatpush.msra.mxu3 %v761_v48  ;;  %1055 = vmatpush.msra.mxu2 %v727_v49  ;;  %v1215_v48 = vld [vmem:[#allocation10 + $0xf8] sm:$0xff] }
 0x234   :  { %v565_v57 = vadd.f32 %v564_v55, %v3184_v63  ;;  %v618_v58 = vadd.f32 %v617_v56, %v3186_v0  ;;  %860 = vmatmul.f32.gmra.mxu2 %v3356_v53  ;;  %895 = vmatmul.f32.gmra.mxu3 %v3359_v54  ;;  %v759_v56 = vld [vmem:[%s3640_s25 + $0x188] sm:$0xff] }
 0x235   :  { %1090 = vmatpush.msra.mxu3 %v759_v56  ;;  %1056 = vmatpush.msra.mxu2 %v725_v61  ;;  %v1212_v56 = vld [vmem:[#allocation10 + $0xe0] sm:$0xff]  ;;  %v1206_v61 = vld [vmem:[#allocation10 + $0xb0] sm:$0xff] }
 0x236   :  { %v644_v3 = vmax.f32 %v565_v57, 0.0  ;;  %v645_v4 = vmax.f32 %v618_v58, 0.0 }
 0x237   :  { %1091 = vmatpush.msra.mxu3 %v757_v62  ;;  %1057 = vmatpush.msra.mxu2 %v723_v1  ;;  %v1207_v62 = vld [vmem:[#allocation10 + $0xb8] sm:$0xff] }
 0x238   :  { %v674_v9 = vmul.f32 %v3192_v8, %v644_v3  ;;  %v675_v11 = vmul.f32 %v3195_v10, %v645_v4  ;;  %v717_v3 = vld [vmem:[%s3640_s25 + $0x38] sm:$0xff] }
 0x239   :  { %v749_v4 = vld [vmem:[%s3640_s25 + $0x138] sm:$0xff] }
 0x23a   :  { %v3373_v12 = vadd.f32 %v3199_v15, %v674_v9  ;;  %v3376_v13 = vadd.f32 %v3201_v16, %v675_v11  ;;  %v745_v9 = vld [vmem:[%s3640_s25 + $0x118] sm:$0xff]  ;;  %v711_v11 = vld [vmem:[%s3640_s25 + $0x8] sm:$0xff] }
 0x23b   :  { %v567_v14 = vpop.f32.mrf.mxu0  ;;  %v620_v19 = vpop.f32.mrf.mxu1 }
 0x23c   :  { %v568_v20 = vadd.f32 %v567_v14, %v3184_v63  ;;  %v621_v21 = vadd.f32 %v620_v19, %v3186_v0  ;;  %863 = vmatmul.f32.gmra.mxu2 %v3373_v12  ;;  %898 = vmatmul.f32.gmra.mxu3 %v3376_v13  ;;  %v743_v14 = vld [vmem:[%s3640_s25 + $0x108] sm:$0xff] }
 0x23d   :  { %v1272_v19 = vld [vmem:[#allocation12 + $0xc0] sm:$0xff] }
 0x23e   :  { %v646_v28 = vmax.f32 %v568_v20, 0.0  ;;  %v647_v29 = vmax.f32 %v621_v21, 0.0  ;;  %v1271_v20 = vld [vmem:[#allocation12 + $0xb8] sm:$0xff]  ;;  %v1268_v21 = vld [vmem:[#allocation12 + $0xa0] sm:$0xff] }
 0x240   :  { %v676_v36 = vmul.f32 %v3192_v8, %v646_v28  ;;  %v677_v37 = vmul.f32 %v3195_v10, %v647_v29  ;;  %v1263_v28 = vld [vmem:[#allocation12 + $0x78] sm:$0xff]  ;;  %v1260_v29 = vld [vmem:[#allocation12 + $0x60] sm:$0xff] }
 0x242   :  { %v3391_v38 = vadd.f32 %v3199_v15, %v676_v36  ;;  %v3394_v39 = vadd.f32 %v3201_v16, %v677_v37  ;;  %v1259_v36 = vld [vmem:[#allocation12 + $0x58] sm:$0xff] }
 0x243   :  { %v570_v40 = vpop.f32.mrf.mxu0  ;;  %v623_v43 = vpop.f32.mrf.mxu1 }
 0x244   :  { %v571_v44 = vadd.f32 %v570_v40, %v3184_v63  ;;  %v624_v45 = vadd.f32 %v623_v43, %v3186_v0  ;;  %866 = vmatmul.f32.gmra.mxu2 %v3391_v38  ;;  %901 = vmatmul.f32.gmra.mxu3 %v3394_v39  ;;  %v1252_v43 = vld [vmem:[#allocation12 + $0x20] sm:$0xff] }
 0x246   :  { %v648_v50 = vmax.f32 %v571_v44, 0.0  ;;  %v649_v55 = vmax.f32 %v624_v45, 0.0  ;;  %v1253_v44 = vld [vmem:[#allocation12 + $0x28] sm:$0xff]  ;;  %v1248_v45 = vld [vmem:[#allocation12] sm:$0xff] }
 0x248   :  { %v678_v63 = vmul.f32 %v3192_v8, %v648_v50  ;;  %v679_v0 = vmul.f32 %v3195_v10, %v649_v55  ;;  %v755_v8 = vld [vmem:[%s3640_s25 + $0x168] sm:$0xff]  ;;  %v721_v10 = vld [vmem:[%s3640_s25 + $0x58] sm:$0xff] }
 0x249   :  { %1092 = vmatpush.msra.mxu3 %v755_v8  ;;  %1058 = vmatpush.msra.mxu2 %v721_v10  ;;  %v1204_v10 = vld [vmem:[#allocation10 + $0xa0] sm:$0xff] }
 0x24a   :  { %v708_v57 = vadd.f32 %v3199_v15, %v678_v63  ;;  %v709_v58 = vadd.f32 %v3201_v16, %v679_v0  ;;  %v753_v15 = vld [vmem:[%s3640_s25 + $0x158] sm:$0xff]  ;;  %v719_v16 = vld [vmem:[%s3640_s25 + $0x48] sm:$0xff]  ;;  %v1211_v0 = vld [vmem:[#allocation10 + $0xd8] sm:$0xff] }
 0x24b   :  { %1093 = vmatpush.msra.mxu3 %v753_v15  ;;  %1059 = vmatpush.msra.mxu2 %v719_v16  ;;  %v1205_v15 = vld [vmem:[#allocation10 + $0xa8] sm:$0xff] }
 0x24c   :  { %869 = vmatmul.f32.gmra.mxu2 %v708_v57  ;;  %904 = vmatmul.f32.gmra.mxu3 %v709_v58 }
 0x24d   :  { %1094 = vmatpush.msra.mxu3 %v751_v2  ;;  %1060 = vmatpush.msra.mxu2 %v717_v3  ;;  %v1200_v3 = vld [vmem:[#allocation10 + $0x80] sm:$0xff] }
 0x24f   :  { %1095 = vmatpush.msra.mxu3 %v749_v4  ;;  %1061 = vmatpush.msra.mxu2 %v715_v5  ;;  %v1201_v4 = vld [vmem:[#allocation10 + $0x88] sm:$0xff]  ;;  %v1198_v5 = vld [vmem:[#allocation10 + $0x70] sm:$0xff] }
 0x254   :  { %924 = vmatmul.f32.vlgmr.msrb.gmra.mxu2 %v3319_v6  ;;  %959 = vmatmul.f32.vlgmr.msrb.gmra.mxu3 %v3322_v7  ;;  %v747_v6 = vld [vmem:[%s3640_s25 + $0x128] sm:$0xff]  ;;  %v713_v7 = vld [vmem:[%s3640_s25 + $0x18] sm:$0xff] }
 0x255   :  { %1096 = vmatpush.msra.mxu3 %v747_v6  ;;  %1062 = vmatpush.msra.mxu2 %v713_v7  ;;  %v1199_v6 = vld [vmem:[#allocation10 + $0x78] sm:$0xff] }
 0x257   :  { %1097 = vmatpush.msra.mxu3 %v745_v9  ;;  %1063 = vmatpush.msra.mxu2 %v711_v11  ;;  %v1196_v11 = vld [vmem:[#allocation10 + $0x60] sm:$0xff] }
 0x259   :  { %1098 = vmatpush.msra.mxu3 %v743_v14  ;;  %v1197_v14 = vld [vmem:[#allocation10 + $0x68] sm:$0xff] }
 0x25c   :  { %927 = vmatmul.f32.gmra.mxu2 %v3337_v30  ;;  %962 = vmatmul.f32.gmra.mxu3 %v3340_v31  ;;  %v1278_v30 = vld [vmem:[#allocation12 + $0xf0] sm:$0xff]  ;;  %v1279_v31 = vld [vmem:[#allocation12 + $0xf8] sm:$0xff] }
 0x25d   :  { %1312 = vmatpush.msra.mxu0 %v1278_v30  ;;  %1364 = vmatpush.msrb.mxu2 %v1279_v31  ;;  %v1194_v30 = vld [vmem:[#allocation10 + $0x50] sm:$0xff]  ;;  %v1195_v31 = vld [vmem:[#allocation10 + $0x58] sm:$0xff] }
 0x264   :  { %930 = vmatmul.f32.gmra.mxu2 %v3356_v53  ;;  %965 = vmatmul.f32.gmra.mxu3 %v3359_v54  ;;  %v1276_v53 = vld [vmem:[#allocation12 + $0xe0] sm:$0xff]  ;;  %v1277_v54 = vld [vmem:[#allocation12 + $0xe8] sm:$0xff] }
 0x265   :  { %1313 = vmatpush.msra.mxu0 %v1276_v53  ;;  %1365 = vmatpush.msrb.mxu2 %v1277_v54  ;;  %v1192_v54 = vld [vmem:[#allocation10 + $0x40] sm:$0xff] }
 0x26c   :  { %933 = vmatmul.f32.gmra.mxu2 %v3373_v12  ;;  %968 = vmatmul.f32.gmra.mxu3 %v3376_v13  ;;  %v1274_v12 = vld [vmem:[#allocation12 + $0xd0] sm:$0xff]  ;;  %v1275_v13 = vld [vmem:[#allocation12 + $0xd8] sm:$0xff] }
 0x26d   :  { %1314 = vmatpush.msra.mxu0 %v1274_v12  ;;  %1366 = vmatpush.msrb.mxu2 %v1275_v13  ;;  %v1193_v12 = vld [vmem:[#allocation10 + $0x48] sm:$0xff] }
 0x26f   :  { %1315 = vmatpush.msra.mxu0 %v1272_v19  ;;  %v1190_v19 = vld [vmem:[#allocation10 + $0x30] sm:$0xff] }
 0x271   :  { %v3443_v37 = vpop.f32.mrf.mxu0  ;;  %v3445_v40 = vpop.f32.mrf.mxu1 }
 0x274   :  { %936 = vmatmul.f32.gmra.mxu2 %v3391_v38  ;;  %971 = vmatmul.f32.gmra.mxu3 %v3394_v39  ;;  %v1254_v38 = vld [vmem:[#allocation12 + $0x30] sm:$0xff]  ;;  %v1255_v39 = vld [vmem:[#allocation12 + $0x38] sm:$0xff] }
 0x279   :  { %v3453_v55 = vpop.f32.mrf.mxu0  ;;  %v3455_v63 = vpop.f32.mrf.mxu1 }
 0x27c   :  { %939 = vmatmul.f32.gmra.mxu2 %v708_v57  ;;  %974 = vmatmul.f32.gmra.mxu3 %v709_v58  ;;  %v1208_v57 = vld [vmem:[#allocation10 + $0xc0] sm:$0xff]  ;;  %v1209_v58 = vld [vmem:[#allocation10 + $0xc8] sm:$0xff] }
 0x281   :  { %v3463_v16 = vpop.f32.mrf.mxu0  ;;  %v3465_v2 = vpop.f32.mrf.mxu1 }
 0x284   :  { %1064 = vmatmul.f32.vlgmr.msra.gmra.mxu2 %v3210_v23  ;;  %1099 = vmatmul.f32.vlgmr.msra.gmra.mxu3 %v3213_v24  ;;  %v1273_v23 = vld [vmem:[#allocation12 + $0xc8] sm:$0xff]  ;;  %v1270_v24 = vld [vmem:[#allocation12 + $0xb0] sm:$0xff] }
 0x285   :  { %1367 = vmatpush.msrb.mxu2 %v1273_v23  ;;  %1316 = vmatpush.msra.mxu0 %v1270_v24  ;;  %v1191_v23 = vld [vmem:[#allocation10 + $0x38] sm:$0xff] }
 0x287   :  { %1368 = vmatpush.msrb.mxu2 %v1271_v20  ;;  %1317 = vmatpush.msra.mxu0 %v1268_v21 }
 0x289   :  { %1369 = vmatpush.msrb.mxu2 %v1269_v22  ;;  %1318 = vmatpush.msra.mxu0 %v1266_v25  ;;  %v1004_v53 = vpop.f32.mrf.mxu0  ;;  %v1039_v13 = vpop.f32.mrf.mxu1  ;;  %v1188_v22 = vld [vmem:[#allocation10 + $0x20] sm:$0xff]  ;;  %v1189_v25 = vld [vmem:[#allocation10 + $0x28] sm:$0xff] }
 0x28b   :  { %1370 = vmatpush.msrb.mxu2 %v1267_v26  ;;  %v3471_v26 = vld [vmem:[#allocation7] sm:$0x3] }
 0x28c   :  { %1067 = vmatmul.f32.gmra.mxu2 %v3230_v41  ;;  %1102 = vmatmul.f32.gmra.mxu3 %v3233_v42  ;;  %v1264_v41 = vld [vmem:[#allocation12 + $0x80] sm:$0xff]  ;;  %v1265_v42 = vld [vmem:[#allocation12 + $0x88] sm:$0xff] }
 0x28d   :  { %1319 = vmatpush.msra.mxu0 %v1264_v41  ;;  %1371 = vmatpush.msrb.mxu2 %v1265_v42  ;;  %v1186_v42 = vld [vmem:[#allocation10 + $0x10] sm:$0xff] }
 0x28f   :  { %1320 = vmatpush.msra.mxu0 %v1262_v27  ;;  %1372 = vmatpush.msrb.mxu2 %v1263_v28  ;;  %v1187_v27 = vld [vmem:[#allocation10 + $0x18] sm:$0xff]  ;;  %v3474_v28 = vperm.slane %v3471_v26, 0 }
 0x291   :  { %1321 = vmatpush.msra.mxu0 %v1260_v29  ;;  %1373 = vmatpush.msrb.mxu2 %v1261_v32  ;;  %v1184_v32 = vld [vmem:[#allocation10] sm:$0xff] }
 0x293   :  { %1322 = vmatpush.msra.mxu0 %v1258_v33  ;;  %1374 = vmatpush.msrb.mxu2 %v1259_v36  ;;  %v1185_v33 = vld [vmem:[#allocation10 + $0x8] sm:$0xff]  ;;  %v3476_v36 = vld [vmem:[#allocation9] sm:$0x3] }
 0x294   :  { %1070 = vmatmul.f32.gmra.mxu2 %v3250_v59  ;;  %1105 = vmatmul.f32.gmra.mxu3 %v3253_v60  ;;  %v1256_v59 = vld [vmem:[#allocation12 + $0x40] sm:$0xff]  ;;  %v1257_v60 = vld [vmem:[#allocation12 + $0x48] sm:$0xff] }
 0x295   :  { %1323 = vmatpush.msra.mxu0 %v1256_v59  ;;  %1375 = vmatpush.msrb.mxu2 %v1257_v60  ;;  %v1007_v59 = vpop.f32.mrf.mxu0 }
 0x297   :  { %1324 = vmatpush.msra.mxu0 %v1254_v38  ;;  %1376 = vmatpush.msrb.mxu2 %v1255_v39 }
 0x299   :  { %1325 = vmatpush.msra.mxu0 %v1252_v43  ;;  %1377 = vmatpush.msrb.mxu2 %v1253_v44  ;;  %v3480_v43 = vld [vmem:[%s3643_s8] sm:$0x3] }
 0x29c   :  { %1073 = vmatmul.f32.gmra.mxu2 %v3268_v17  ;;  %1108 = vmatmul.f32.gmra.mxu3 %v3271_v18  ;;  %v1250_v17 = vld [vmem:[#allocation12 + $0x10] sm:$0xff]  ;;  %v1251_v18 = vld [vmem:[#allocation12 + $0x18] sm:$0xff] }
 0x29d   :  { %1326 = vmatpush.msra.mxu0 %v1250_v17  ;;  %1378 = vmatpush.msrb.mxu2 %v1251_v18  ;;  %v3483_v18 = vperm.slane %v3476_v36, 0 }
 0x29f   :  { %1327 = vmatpush.msra.mxu0 %v1248_v45  ;;  %1379 = vmatpush.msrb.mxu2 %v1249_v46  ;;  %v1042_v45 = vpop.f32.mrf.mxu1 }
 0x2a1   :  { %1416 = vmatpush.msrb.mxu0 %v1214_v47  ;;  %1468 = vmatpush.msra.mxu2 %v1215_v48  ;;  %v3487_v48 = vperm.slane %v3480_v43, 0 }
 0x2a3   :  { %1417 = vmatpush.msrb.mxu0 %v1212_v56 }
 0x2a4   :  { %1076 = vmatmul.f32.gmra.mxu2 %v3285_v34  ;;  %1111 = vmatmul.f32.gmra.mxu3 %v3288_v35  ;;  %v1213_v34 = vld [vmem:[#allocation10 + $0xe8] sm:$0xff]  ;;  %v1210_v35 = vld [vmem:[#allocation10 + $0xd0] sm:$0xff] }
 0x2a5   :  { %1469 = vmatpush.msra.mxu2 %v1213_v34  ;;  %1418 = vmatpush.msrb.mxu0 %v1210_v35 }
 0x2a7   :  { %v3449_v49 = vpop.f32.mrf.mxu2  ;;  %v3451_v50 = vpop.f32.mrf.mxu3  ;;  %1470 = vmatpush.msra.mxu2 %v1211_v0  ;;  %1419 = vmatpush.msrb.mxu0 %v1208_v57 }
 0x2a8   :  { %v891_v56 = vadd.f32 %v3451_v50, %v3449_v49 }
 0x2a9   :  { %1471 = vmatpush.msra.mxu2 %v1209_v58  ;;  %1420 = vmatpush.msrb.mxu0 %v1206_v61 }
 0x2aa   :  { %v996_v61 = vadd.f32 %v3443_v37, %v891_v56  ;;  %v1300_v56 = vld [vmem:[#allocation12 + $0x1a0] sm:$0xff] }
 0x2ab   :  { %1472 = vmatpush.msra.mxu2 %v1207_v62  ;;  %1421 = vmatpush.msrb.mxu0 %v1204_v10 }
 0x2ac   :  { %1079 = vmatmul.f32.gmra.mxu2 %v3302_v51  ;;  %1114 = vmatmul.f32.gmra.mxu3 %v3305_v52  ;;  %v1202_v51 = vld [vmem:[#allocation10 + $0x90] sm:$0xff]  ;;  %v1203_v52 = vld [vmem:[#allocation10 + $0x98] sm:$0xff]  ;;  %v1031_v49 = vadd.f32 %v3445_v40, %v996_v61 }
 0x2ad   :  { %1473 = vmatpush.msra.mxu2 %v1205_v15  ;;  %1422 = vmatpush.msrb.mxu0 %v1202_v51  ;;  %v1010_v15 = vpop.f32.mrf.mxu0  ;;  %v1311_v40 = vld [vmem:[#allocation12 + $0x1f8] sm:$0xff] }
 0x2ae   :  { %1390 = vmatpush.msrb.mxu3 %v1311_v40  ;;  %v1295_v61 = vld [vmem:[#allocation12 + $0x178] sm:$0xff]  ;;  %v1281_v40 = vld [vmem:[#allocation12 + $0x108] sm:$0xff] }
 0x2af   :  { %v3459_v1 = vpop.f32.mrf.mxu2  ;;  %v3461_v8 = vpop.f32.mrf.mxu3  ;;  %1474 = vmatpush.msra.mxu2 %v1203_v52  ;;  %1423 = vmatpush.msrb.mxu0 %v1200_v3 }
 0x2b0   :  { %v1045_v3 = vpop.f32.mrf.mxu1  ;;  %v894_v50 = vadd.f32 %v3461_v8, %v3459_v1 }
 0x2b1   :  { %1475 = vmatpush.msra.mxu2 %v1201_v4  ;;  %1424 = vmatpush.msrb.mxu0 %v1198_v5 }
 0x2b3   :  { %1476 = vmatpush.msra.mxu2 %v1199_v6  ;;  %1425 = vmatpush.msrb.mxu0 %v1196_v11 }
 0x2b5   :  { %1477 = vmatpush.msra.mxu2 %v1197_v14  ;;  %1426 = vmatpush.msrb.mxu0 %v1194_v30  ;;  %v1124_v14 = vadd.f32 %v3474_v28, %v1031_v49  ;;  %v999_v30 = vadd.f32 %v3453_v55, %v894_v50  ;;  %v1289_v49 = vld [vmem:[#allocation12 + $0x148] sm:$0xff]  ;;  %v1286_v50 = vld [vmem:[#allocation12 + $0x130] sm:$0xff] }
 0x2b7   :  { %v3467_v7 = vpop.f32.mrf.mxu2  ;;  %v3469_v9 = vpop.f32.mrf.mxu3  ;;  %1478 = vmatpush.msra.mxu2 %v1195_v31  ;;  %1427 = vmatpush.msrb.mxu0 %v1192_v54  ;;  %v1136_v8 = vmax.f32 %v1124_v14, 0.0  ;;  %v1034_v54 = vadd.f32 %v3455_v63, %v999_v30  ;;  %v1307_v63 = vld [vmem:[#allocation12 + $0x1d8] sm:$0xff]  ;;  %v1282_v14 = vld [vmem:[#allocation12 + $0x110] sm:$0xff] }
 0x2b8   :  { %v1283_v30 = vld [vmem:[#allocation12 + $0x118] sm:$0xff] }
 0x2b9   :  { %1479 = vmatpush.msra.mxu2 %v1193_v12  ;;  %1428 = vmatpush.msrb.mxu0 %v1190_v19  ;;  %v897_v12 = vadd.f32 %v3469_v9, %v3467_v7  ;;  %v1308_v7 = vld [vmem:[#allocation12 + $0x1e0] sm:$0xff]  ;;  %v1305_v9 = vld [vmem:[#allocation12 + $0x1c8] sm:$0xff] }
 0x2bb   :  { %1480 = vmatpush.msra.mxu2 %v1191_v23  ;;  %1429 = vmatpush.msrb.mxu0 %v1188_v22  ;;  %v1002_v55 = vadd.f32 %v3463_v16, %v897_v12  ;;  %v1309_v22 = vld [vmem:[#allocation12 + $0x1e8] sm:$0xff] }
 0x2bc   :  { %1391 = vmatpush.msrb.mxu3 %v1309_v22  ;;  %v1245_v12 = vld [vmem:[#allocation10 + $0x1e8] sm:$0xff]  ;;  %v1238_v22 = vld [vmem:[#allocation10 + $0x1b0] sm:$0xff] }
 0x2bd   :  { %1481 = vmatpush.msra.mxu2 %v1189_v25  ;;  %1430 = vmatpush.msrb.mxu0 %v1186_v42  ;;  %v1310_v25 = vld [vmem:[#allocation12 + $0x1f0] sm:$0xff] }
 0x2be   :  { %1338 = vmatpush.msra.mxu1 %v1310_v25  ;;  %1392 = vmatpush.msrb.mxu3 %v1307_v63  ;;  %v1239_v25 = vld [vmem:[#allocation10 + $0x1b8] sm:$0xff]  ;;  %v1236_v63 = vld [vmem:[#allocation10 + $0x1a0] sm:$0xff] }
 0x2bf   :  { %v864_v24 = vpop.f32.mrf.mxu2  ;;  %v899_v20 = vpop.f32.mrf.mxu3  ;;  %1482 = vmatpush.msra.mxu2 %v1187_v27  ;;  %1431 = vmatpush.msrb.mxu0 %v1184_v32 }
 0x2c0   :  { %v900_v21 = vadd.f32 %v899_v20, %v864_v24  ;;  %v1154_v20 = vmul.f32 %v3483_v18, %v1136_v8  ;;  %1339 = vmatpush.msra.mxu1 %v1308_v7  ;;  %1393 = vmatpush.msrb.mxu3 %v1305_v9  ;;  %v1247_v8 = vld [vmem:[#allocation10 + $0x1f8] sm:$0xff]  ;;  %v1237_v7 = vld [vmem:[#allocation10 + $0x1a8] sm:$0xff] }
 0x2c1   :  { %1483 = vmatpush.msra.mxu2 %v1185_v33 }
 0x2c2   :  { %v1005_v41 = vadd.f32 %v1004_v53, %v900_v21  ;;  %v1126_v21 = vadd.f32 %v3474_v28, %v1034_v54  ;;  %v1172_v42 = vadd.f32 %v3487_v48, %v1154_v20  ;;  %v1244_v54 = vld [vmem:[#allocation10 + $0x1e0] sm:$0xff] }
 0x2c3   :  { %v1240_v20 = vld [vmem:[#allocation10 + $0x1c0] sm:$0xff] }
 0x2c4   :  { %v1040_v29 = vadd.f32 %v1039_v13, %v1005_v41  ;;  %v1037_v41 = vadd.f32 %v3465_v2, %v1002_v55  ;;  %v1138_v16 = vmax.f32 %v1126_v21, 0.0  ;;  %v1243_v55 = vld [vmem:[#allocation10 + $0x1d8] sm:$0xff]  ;;  %v1241_v21 = vld [vmem:[#allocation10 + $0x1c8] sm:$0xff] }
 0x2c6   :  { %v1130_v60 = vadd.f32 %v3474_v28, %v1040_v29  ;;  %v1156_v33 = vmul.f32 %v3483_v18, %v1138_v16  ;;  %v1235_v16 = vld [vmem:[#allocation10 + $0x198] sm:$0xff] }
 0x2c7   :  { %v867_v38 = vpop.f32.mrf.mxu2  ;;  %v902_v39 = vpop.f32.mrf.mxu3 }
 0x2c8   :  { %v1142_v44 = vmax.f32 %v1130_v60, 0.0  ;;  %v903_v17 = vadd.f32 %v902_v39, %v867_v38  ;;  %v1306_v60 = vld [vmem:[#allocation12 + $0x1d0] sm:$0xff]  ;;  %v1304_v38 = vld [vmem:[#allocation12 + $0x1c0] sm:$0xff]  ;;  %v1174_v39 = vadd.f32 %v3487_v48, %v1156_v33 }
 0x2c9   :  { %1340 = vmatpush.msra.mxu1 %v1306_v60  ;;  %v1230_v33 = vld [vmem:[#allocation10 + $0x170] sm:$0xff]  ;;  %v1228_v60 = vld [vmem:[#allocation10 + $0x160] sm:$0xff] }
 0x2ca   :  { %v1008_v46 = vadd.f32 %v1007_v59, %v903_v17  ;;  %v1160_v47 = vmul.f32 %v3483_v18, %v1142_v44  ;;  %v1128_v59 = vadd.f32 %v3474_v28, %v1037_v41  ;;  %v1303_v44 = vld [vmem:[#allocation12 + $0x1b8] sm:$0xff]  ;;  %v1302_v17 = vld [vmem:[#allocation12 + $0x1b0] sm:$0xff] }
 0x2cb   :  { %1341 = vmatpush.msra.mxu1 %v1304_v38  ;;  %1394 = vmatpush.msrb.mxu3 %v1303_v44  ;;  %v1229_v38 = vld [vmem:[#allocation10 + $0x168] sm:$0xff]  ;;  %v1226_v44 = vld [vmem:[#allocation10 + $0x150] sm:$0xff] }
 0x2cc   :  { %v1043_v34 = vadd.f32 %v1042_v45, %v1008_v46  ;;  %v1178_v35 = vadd.f32 %v3487_v48, %v1160_v47  ;;  %v1140_v2 = vmax.f32 %v1128_v59, 0.0  ;;  %v1301_v47 = vld [vmem:[#allocation12 + $0x1a8] sm:$0xff]  ;;  %v1231_v59 = vld [vmem:[#allocation10 + $0x178] sm:$0xff] }
 0x2cd   :  { %1342 = vmatpush.msra.mxu1 %v1302_v17  ;;  %1395 = vmatpush.msrb.mxu3 %v1301_v47  ;;  %v1227_v17 = vld [vmem:[#allocation10 + $0x158] sm:$0xff]  ;;  %v1224_v47 = vld [vmem:[#allocation10 + $0x140] sm:$0xff] }
 0x2ce   :  { %1328 = vmatmul.f32.vlgmr.msra.gmra.mxu0 %v1178_v35  ;;  %1380 = vmatmul.f32.vlgmr.msrb.gmra.mxu2 %v1178_v35  ;;  %v1132_v0 = vadd.f32 %v3474_v28, %v1043_v34  ;;  %v1299_v34 = vld [vmem:[#allocation12 + $0x198] sm:$0xff]  ;;  %v1298_v35 = vld [vmem:[#allocation12 + $0x190] sm:$0xff] }
 0x2cf   :  { %v870_v57 = vpop.f32.mrf.mxu2  ;;  %v905_v58 = vpop.f32.mrf.mxu3  ;;  %1343 = vmatpush.msra.mxu1 %v1300_v56  ;;  %1396 = vmatpush.msrb.mxu3 %v1299_v34  ;;  %v1225_v56 = vld [vmem:[#allocation10 + $0x148] sm:$0xff]  ;;  %v1223_v34 = vld [vmem:[#allocation10 + $0x138] sm:$0xff] }
 0x2d0   :  { %v906_v62 = vadd.f32 %v905_v58, %v870_v57  ;;  %v1144_v10 = vmax.f32 %v1132_v0, 0.0  ;;  %v1297_v0 = vld [vmem:[#allocation12 + $0x188] sm:$0xff]  ;;  %v1296_v57 = vld [vmem:[#allocation12 + $0x180] sm:$0xff] }
 0x2d1   :  { %1344 = vmatpush.msra.mxu1 %v1298_v35  ;;  %1397 = vmatpush.msrb.mxu3 %v1297_v0  ;;  %v1220_v35 = vld [vmem:[#allocation10 + $0x120] sm:$0xff]  ;;  %v1221_v0 = vld [vmem:[#allocation10 + $0x128] sm:$0xff] }
 0x2d2   :  { %v1011_v51 = vadd.f32 %v1010_v15, %v906_v62  ;;  %v1162_v52 = vmul.f32 %v3483_v18, %v1144_v10  ;;  %v1294_v62 = vld [vmem:[#allocation12 + $0x170] sm:$0xff] }
 0x2d3   :  { %1345 = vmatpush.msra.mxu1 %v1296_v57  ;;  %1398 = vmatpush.msrb.mxu3 %v1295_v61 }
 0x2d4   :  { %v1046_v4 = vadd.f32 %v1045_v3, %v1011_v51  ;;  %v1180_v5 = vadd.f32 %v3487_v48, %v1162_v52  ;;  %v1292_v51 = vld [vmem:[#allocation12 + $0x160] sm:$0xff]  ;;  %v1290_v52 = vld [vmem:[#allocation12 + $0x150] sm:$0xff]  ;;  %v1291_v3 = vld [vmem:[#allocation12 + $0x158] sm:$0xff] }
 0x2d5   :  { %1346 = vmatpush.msra.mxu1 %v1294_v62  ;;  %v1218_v62 = vld [vmem:[#allocation10 + $0x110] sm:$0xff] }
 0x2d6   :  { %1331 = vmatmul.f32.gmra.mxu0 %v1180_v5  ;;  %1383 = vmatmul.f32.gmra.mxu2 %v1180_v5  ;;  %v1134_v6 = vadd.f32 %v3474_v28, %v1046_v4  ;;  %v1158_v28 = vmul.f32 %v3483_v18, %v1140_v2  ;;  %v1287_v4 = vld [vmem:[#allocation12 + $0x138] sm:$0xff] }
 0x2d7   :  { %v925_v37 = vpop.f32.mrf.mxu2  ;;  %v960_v11 = vpop.f32.mrf.mxu3  ;;  %1347 = vmatpush.msra.mxu1 %v1292_v51 }
 0x2d8   :  { %v3502_v31 = vadd.f32 %v960_v11, %v925_v37  ;;  %v1146_v53 = vmax.f32 %v1134_v6, 0.0  ;;  %v1176_v58 = vadd.f32 %v3487_v48, %v1158_v28  ;;  %v1284_v37 = vld [vmem:[#allocation12 + $0x120] sm:$0xff]  ;;  %v1285_v11 = vld [vmem:[#allocation12 + $0x128] sm:$0xff]  ;;  %v1222_v28 = vld [vmem:[#allocation10 + $0x130] sm:$0xff] }
 0x2d9   :  { %1348 = vmatpush.msra.mxu1 %v1290_v52  ;;  %v1216_v52 = vld [vmem:[#allocation10 + $0x100] sm:$0xff] }
 0x2da   :  { %v1164_v1 = vmul.f32 %v3483_v18, %v1146_v53  ;;  %v1293_v18 = vld [vmem:[#allocation12 + $0x168] sm:$0xff]  ;;  %v1280_v53 = vld [vmem:[#allocation12 + $0x100] sm:$0xff] }
 0x2db   :  { %1399 = vmatpush.msrb.mxu3 %v1293_v18  ;;  %v1219_v18 = vld [vmem:[#allocation10 + $0x118] sm:$0xff] }
 0x2dc   :  { %v1182_v13 = vadd.f32 %v3487_v48, %v1164_v1  ;;  %v1288_v48 = vld [vmem:[#allocation12 + $0x140] sm:$0xff]  ;;  %v1246_v1 = vld [vmem:[#allocation10 + $0x1f0] sm:$0xff] }
 0x2dd   :  { %1400 = vmatpush.msrb.mxu3 %v1291_v3  ;;  %1349 = vmatpush.msra.mxu1 %v1288_v48  ;;  %v1217_v3 = vld [vmem:[#allocation10 + $0x108] sm:$0xff]  ;;  %v1121_v48 = vperm.slane %v3471_v26, 1 }
 0x2de   :  { %1334 = vmatmul.f32.gmra.mxu0 %v1182_v13  ;;  %1386 = vmatmul.f32.gmra.mxu2 %v1182_v13 }
 0x2df   :  { %v928_v19 = vpop.f32.mrf.mxu2  ;;  %v963_v23 = vpop.f32.mrf.mxu3  ;;  %1401 = vmatpush.msrb.mxu3 %v1289_v49  ;;  %1350 = vmatpush.msra.mxu1 %v1286_v50 }
 0x2e0   :  { %v3510_v24 = vadd.f32 %v963_v23, %v928_v19  ;;  %v1242_v23 = vld [vmem:[#allocation10 + $0x1d0] sm:$0xff] }
 0x2e1   :  { %1402 = vmatpush.msrb.mxu3 %v1287_v4  ;;  %1351 = vmatpush.msra.mxu1 %v1284_v37 }
 0x2e3   :  { %1403 = vmatpush.msrb.mxu3 %v1285_v11  ;;  %1352 = vmatpush.msra.mxu1 %v1282_v14  ;;  %v1169_v14 = vperm.slane %v3480_v43, 1 }
 0x2e5   :  { %1404 = vmatpush.msrb.mxu3 %v1283_v30  ;;  %1353 = vmatpush.msra.mxu1 %v1280_v53 }
 0x2e6   :  { %1432 = vmatmul.f32.vlgmr.msrb.gmra.mxu0 %v1172_v42  ;;  %1484 = vmatmul.f32.vlgmr.msra.gmra.mxu2 %v1172_v42  ;;  %v1234_v42 = vld [vmem:[#allocation10 + $0x190] sm:$0xff] }
 0x2e7   :  { %v931_v27 = vpop.f32.mrf.mxu2  ;;  %v966_v29 = vpop.f32.mrf.mxu3  ;;  %1405 = vmatpush.msrb.mxu3 %v1281_v40  ;;  %1442 = vmatpush.msrb.mxu1 %v1246_v1 }
 0x2e8   :  { %v3516_v32 = vadd.f32 %v966_v29, %v931_v27  ;;  %v1232_v27 = vld [vmem:[#allocation10 + $0x180] sm:$0xff]  ;;  %v1233_v29 = vld [vmem:[#allocation10 + $0x188] sm:$0xff] }
 0x2e9   :  { %1494 = vmatpush.msra.mxu3 %v1247_v8  ;;  %1443 = vmatpush.msrb.mxu1 %v1244_v54 }
 0x2eb   :  { %1495 = vmatpush.msra.mxu3 %v1245_v12  ;;  %1444 = vmatpush.msrb.mxu1 %v1242_v23 }
 0x2ed   :  { %1496 = vmatpush.msra.mxu3 %v1243_v55  ;;  %1445 = vmatpush.msrb.mxu1 %v1240_v20 }
 0x2ee   :  { %1435 = vmatmul.f32.gmra.mxu0 %v1174_v39  ;;  %1487 = vmatmul.f32.gmra.mxu2 %v1174_v39 }
 0x2ef   :  { %v3521_v45 = vpop.f32.mrf.mxu2  ;;  %v3523_v46 = vpop.f32.mrf.mxu3  ;;  %1497 = vmatpush.msra.mxu3 %v1241_v21  ;;  %1446 = vmatpush.msrb.mxu1 %v1238_v22 }
 0x2f0   :  { %v970_v57 = vadd.f32 %v3523_v46, %v3521_v45  ;;  %v1151_v46 = vperm.slane %v3476_v36, 1 }
 0x2f1   :  { %1498 = vmatpush.msra.mxu3 %v1239_v25  ;;  %1447 = vmatpush.msrb.mxu1 %v1236_v63 }
 0x2f3   :  { %1499 = vmatpush.msra.mxu3 %v1237_v7  ;;  %1448 = vmatpush.msrb.mxu1 %v1234_v42 }
 0x2f5   :  { %1500 = vmatpush.msra.mxu3 %v1235_v16  ;;  %1449 = vmatpush.msrb.mxu1 %v1232_v27 }
 0x2f6   :  { %1438 = vmatmul.f32.gmra.mxu0 %v1176_v58  ;;  %1490 = vmatmul.f32.gmra.mxu2 %v1176_v58 }
 0x2f7   :  { %v3527_v10 = vpop.f32.mrf.mxu2  ;;  %v3529_v15 = vpop.f32.mrf.mxu3  ;;  %1501 = vmatpush.msra.mxu3 %v1233_v29  ;;  %1450 = vmatpush.msrb.mxu1 %v1230_v33 }
 0x2f8   :  { %v973_v45 = vadd.f32 %v3529_v15, %v3527_v10 }
 0x2f9   :  { %1502 = vmatpush.msra.mxu3 %v1231_v59  ;;  %1451 = vmatpush.msrb.mxu1 %v1228_v60 }
 0x2fb   :  { %1503 = vmatpush.msra.mxu3 %v1229_v38  ;;  %1452 = vmatpush.msrb.mxu1 %v1226_v44  ;;  %v1577_v38 = vld [vmem:[#allocation16 + $0x78] sm:$0xff]  ;;  %v1576_v44 = vld [vmem:[#allocation16 + $0x70] sm:$0xff] }
 0x2fc   :  { %1672 = vmatpush.msrb.mxu2 %v1577_v38  ;;  %v1578_v38 = vld [vmem:[#allocation16 + $0x80] sm:$0xff] }
 0x2fd   :  { %1504 = vmatpush.msra.mxu3 %v1227_v17  ;;  %1453 = vmatpush.msrb.mxu1 %v1224_v47  ;;  %v1609_v17 = vld [vmem:[#allocation18 + $0x78] sm:$0xff] }
 0x2fe   :  { %1673 = vmatpush.msrb.mxu2 %v1576_v44  ;;  %v1573_v47 = vld [vmem:[#allocation16 + $0x58] sm:$0xff]  ;;  %1626 = vmatpush.msra.mxu0 %v1609_v17  ;;  %v1612_v17 = vld [vmem:[#allocation18 + $0x90] sm:$0xff] }
 0x2ff   :  { %v3531_v5 = vpop.f32.mrf.mxu2  ;;  %v3533_v6 = vpop.f32.mrf.mxu3  ;;  %1505 = vmatpush.msra.mxu3 %v1225_v56  ;;  %1454 = vmatpush.msrb.mxu1 %v1222_v28  ;;  %v1592_v56 = vld [vmem:[#allocation16 + $0xf0] sm:$0xff] }
 0x300   :  { %v976_v8 = vadd.f32 %v3533_v6, %v3531_v5  ;;  %v1608_v28 = vld [vmem:[#allocation18 + $0x70] sm:$0xff] }
 0x301   :  { %1506 = vmatpush.msra.mxu3 %v1223_v34  ;;  %1455 = vmatpush.msrb.mxu1 %v1220_v35  ;;  %v1572_v34 = vld [vmem:[#allocation16 + $0x50] sm:$0xff]  ;;  %v1591_v35 = vld [vmem:[#allocation16 + $0xe8] sm:$0xff] }
 0x302   :  { %1627 = vmatpush.msra.mxu0 %v1608_v28 }
 0x303   :  { %1507 = vmatpush.msra.mxu3 %v1221_v0  ;;  %1456 = vmatpush.msrb.mxu1 %v1218_v62  ;;  %v1607_v0 = vld [vmem:[#allocation18 + $0x68] sm:$0xff]  ;;  %v1625_v62 = vld [vmem:[#allocation18 + $0xf8] sm:$0xff] }
 0x304   :  { %1628 = vmatpush.msra.mxu0 %v1607_v0 }
 0x305   :  { %1508 = vmatpush.msra.mxu3 %v1219_v18  ;;  %1457 = vmatpush.msrb.mxu1 %v1216_v52  ;;  %v1570_v18 = vld [vmem:[#allocation16 + $0x40] sm:$0xff]  ;;  %v1605_v52 = vld [vmem:[#allocation18 + $0x58] sm:$0xff] }
 0x307   :  { %v3535_v13 = vpop.f32.mrf.mxu2  ;;  %v3537_v19 = vpop.f32.mrf.mxu3  ;;  %1509 = vmatpush.msra.mxu3 %v1217_v3  ;;  %v1624_v3 = vld [vmem:[#allocation18 + $0xf0] sm:$0xff] }
 0x308   :  { %v1066_v10 = vadd.f32 %v3535_v13, %v3502_v31 }
 0x30a   :  { %v1101_v43 = vadd.f32 %v3537_v19, %v1066_v10  ;;  %v1585_v10 = vld [vmem:[#allocation16 + $0xb8] sm:$0xff] }
 0x30c   :  { %v1125_v22 = vadd.f32 %v1121_v48, %v1101_v43  ;;  %v1619_v43 = vld [vmem:[#allocation18 + $0xc8] sm:$0xff] }
 0x30e   :  { %v1137_v63 = vmax.f32 %v1125_v22, 0.0  ;;  %v1599_v22 = vld [vmem:[#allocation18 + $0x28] sm:$0xff] }
 0x30f   :  { %v3539_v9 = vpop.f32.mrf.mxu2  ;;  %v3541_v41 = vpop.f32.mrf.mxu3 }
 0x310   :  { %v1069_v25 = vadd.f32 %v3539_v9, %v3510_v24  ;;  %v1155_v7 = vmul.f32 %v1151_v46, %v1137_v63  ;;  %v1582_v63 = vld [vmem:[#allocation16 + $0xa0] sm:$0xff] }
 0x312   :  { %v1104_v31 = vadd.f32 %v3541_v41, %v1069_v25  ;;  %v1173_v16 = vadd.f32 %v1169_v14, %v1155_v7  ;;  %v1618_v25 = vld [vmem:[#allocation18 + $0xc0] sm:$0xff] }
 0x313   :  { %v1562_v7 = vld [vmem:[#allocation16] sm:$0xff] }
 0x314   :  { %v1127_v42 = vadd.f32 %v1121_v48, %v1104_v31  ;;  %v1598_v31 = vld [vmem:[#allocation18 + $0x20] sm:$0xff] }
 0x316   :  { %v1139_v27 = vmax.f32 %v1127_v42, 0.0  ;;  %v1581_v42 = vld [vmem:[#allocation16 + $0x98] sm:$0xff] }
 0x317   :  { %v3543_v39 = vpop.f32.mrf.mxu2  ;;  %v3545_v2 = vpop.f32.mrf.mxu3 }
 0x318   :  { %v1072_v19 = vadd.f32 %v3543_v39, %v3516_v32  ;;  %v1157_v9 = vmul.f32 %v1151_v46, %v1139_v27  ;;  %v1575_v32 = vld [vmem:[#allocation16 + $0x68] sm:$0xff]  ;;  %v1574_v39 = vld [vmem:[#allocation16 + $0x60] sm:$0xff]  ;;  %v1580_v27 = vld [vmem:[#allocation16 + $0x90] sm:$0xff] }
 0x319   :  { %1674 = vmatpush.msrb.mxu2 %v1575_v32 }
 0x31a   :  { %v1107_v29 = vadd.f32 %v3545_v2, %v1072_v19  ;;  %v1175_v59 = vadd.f32 %v1169_v14, %v1157_v9  ;;  %v1593_v2 = vld [vmem:[#allocation16 + $0xf8] sm:$0xff]  ;;  %v1615_v9 = vld [vmem:[#allocation18 + $0xa8] sm:$0xff] }
 0x31b   :  { %1675 = vmatpush.msrb.mxu2 %v1574_v39  ;;  %v1597_v19 = vld [vmem:[#allocation18 + $0x18] sm:$0xff]  ;;  %v1594_v39 = vld [vmem:[#allocation18] sm:$0xff] }
 0x31c   :  { %v1129_v24 = vadd.f32 %v1121_v48, %v1107_v29 }
 0x31d   :  { %1676 = vmatpush.msrb.mxu2 %v1573_v47  ;;  %v1611_v47 = vld [vmem:[#allocation18 + $0x88] sm:$0xff] }
 0x31e   :  { %v1141_v33 = vmax.f32 %v1129_v24, 0.0  ;;  %v1596_v24 = vld [vmem:[#allocation18 + $0x10] sm:$0xff] }
 0x31f   :  { %v1074_v58 = vpop.f32.mrf.mxu2  ;;  %v1109_v61 = vpop.f32.mrf.mxu3  ;;  %1677 = vmatpush.msrb.mxu2 %v1572_v34  ;;  %v1610_v34 = vld [vmem:[#allocation18 + $0x80] sm:$0xff] }
 0x320   :  { %v1075_v51 = vadd.f32 %v1074_v58, %v970_v57  ;;  %v1159_v41 = vmul.f32 %v1151_v46, %v1141_v33  ;;  %v1571_v57 = vld [vmem:[#allocation16 + $0x48] sm:$0xff]  ;;  %v1590_v58 = vld [vmem:[#allocation16 + $0xe0] sm:$0xff] }
 0x321   :  { %1678 = vmatpush.msrb.mxu2 %v1571_v57  ;;  %v1579_v33 = vld [vmem:[#allocation16 + $0x88] sm:$0xff] }
 0x322   :  { %v1110_v49 = vadd.f32 %v1109_v61, %v1075_v51  ;;  %v1177_v60 = vadd.f32 %v1169_v14, %v1159_v41  ;;  %v1606_v61 = vld [vmem:[#allocation18 + $0x60] sm:$0xff]  ;;  %v1589_v51 = vld [vmem:[#allocation16 + $0xd8] sm:$0xff]  ;;  %v1595_v41 = vld [vmem:[#allocation18 + $0x8] sm:$0xff] }
 0x323   :  { %1629 = vmatpush.msra.mxu0 %v1606_v61  ;;  %1679 = vmatpush.msrb.mxu2 %v1570_v18 }
 0x324   :  { %v1131_v50 = vadd.f32 %v1121_v48, %v1110_v49  ;;  %v1588_v49 = vld [vmem:[#allocation16 + $0xd0] sm:$0xff] }
 0x325   :  { %1630 = vmatpush.msra.mxu0 %v1605_v52 }
 0x326   :  { %v1143_v4 = vmax.f32 %v1131_v50, 0.0 }
 0x327   :  { %v1077_v37 = vpop.f32.mrf.mxu2  ;;  %v1112_v11 = vpop.f32.mrf.mxu3 }
 0x328   :  { %v1161_v30 = vmul.f32 %v1151_v46, %v1143_v4  ;;  %v1078_v53 = vadd.f32 %v1077_v37, %v973_v45  ;;  %v1604_v45 = vld [vmem:[#allocation18 + $0x50] sm:$0xff]  ;;  %v1587_v37 = vld [vmem:[#allocation16 + $0xc8] sm:$0xff] }
 0x329   :  { %v1568_v4 = vld [vmem:[#allocation16 + $0x30] sm:$0xff]  ;;  %1631 = vmatpush.msra.mxu0 %v1604_v45 }
 0x32a   :  { %v1179_v40 = vadd.f32 %v1169_v14, %v1161_v30  ;;  %v1113_v26 = vadd.f32 %v1112_v11, %v1078_v53  ;;  %v1603_v11 = vld [vmem:[#allocation18 + $0x48] sm:$0xff]  ;;  %v1586_v53 = vld [vmem:[#allocation16 + $0xc0] sm:$0xff]  ;;  %v1756_v45 = vld [vmem:[#allocation21 + $0xf0] sm:$0xff] }
 0x32b   :  { %v1567_v30 = vld [vmem:[#allocation16 + $0x28] sm:$0xff]  ;;  %1632 = vmatpush.msra.mxu0 %v1603_v11 }
 0x32c   :  { %v1133_v1 = vadd.f32 %v1121_v48, %v1113_v26  ;;  %1354 = vmatmul.f32.vlgmr.msra.gmra.mxu1 %v1179_v40  ;;  %1406 = vmatmul.f32.vlgmr.msrb.gmra.mxu3 %v1179_v40  ;;  %v1602_v40 = vld [vmem:[#allocation18 + $0x40] sm:$0xff]  ;;  %v1621_v26 = vld [vmem:[#allocation18 + $0xd8] sm:$0xff]  ;;  %v1755_v11 = vld [vmem:[#allocation21 + $0xe8] sm:$0xff] }
 0x32d   :  { %1695 = vmatpush.msrb.mxu3 %v1593_v2  ;;  %1649 = vmatpush.msra.mxu1 %v1625_v62  ;;  %v1613_v2 = vld [vmem:[#allocation18 + $0x98] sm:$0xff] }
 0x32e   :  { %v1145_v15 = vmax.f32 %v1133_v1, 0.0  ;;  %v1566_v1 = vld [vmem:[#allocation16 + $0x20] sm:$0xff]  ;;  %1633 = vmatpush.msra.mxu0 %v1602_v40 }
 0x32f   :  { %v1080_v36 = vpop.f32.mrf.mxu2  ;;  %v1115_v23 = vpop.f32.mrf.mxu3  ;;  %1696 = vmatpush.msrb.mxu3 %v1592_v56  ;;  %1650 = vmatpush.msra.mxu1 %v1624_v3  ;;  %v1538_v3 = vld [vmem:[#allocation15] sm:$0x3] }
 0x330   :  { %v1081_v54 = vadd.f32 %v1080_v36, %v976_v8  ;;  %v1163_v12 = vmul.f32 %v1151_v46, %v1145_v15  ;;  %v1601_v15 = vld [vmem:[#allocation18 + $0x38] sm:$0xff]  ;;  %v1620_v36 = vld [vmem:[#allocation18 + $0xd0] sm:$0xff] }
 0x331   :  { %1697 = vmatpush.msrb.mxu3 %v1591_v35  ;;  %1634 = vmatpush.msra.mxu0 %v1601_v15  ;;  %v1753_v40 = vld [vmem:[#allocation21 + $0xd8] sm:$0xff] }
 0x332   :  { %v1116_v55 = vadd.f32 %v1115_v23, %v1081_v54  ;;  %v1181_v20 = vadd.f32 %v1169_v14, %v1163_v12  ;;  %v1565_v54 = vld [vmem:[#allocation16 + $0x18] sm:$0xff]  ;;  %v1584_v12 = vld [vmem:[#allocation16 + $0xb0] sm:$0xff] }
 0x333   :  { %1698 = vmatpush.msrb.mxu3 %v1590_v58  ;;  %v1600_v23 = vld [vmem:[#allocation18 + $0x30] sm:$0xff]  ;;  %v1520_v58 = vld [vmem:[#allocation13] sm:$0x3] }
 0x334   :  { %v1135_v21 = vadd.f32 %v1121_v48, %v1116_v55  ;;  %1357 = vmatmul.f32.gmra.mxu1 %v1181_v20  ;;  %1409 = vmatmul.f32.gmra.mxu3 %v1181_v20  ;;  %v1569_v48 = vld [vmem:[#allocation16 + $0x38] sm:$0xff]  ;;  %v1564_v55 = vld [vmem:[#allocation16 + $0x10] sm:$0xff]  ;;  %v3582_v18 = vperm.slane %v1520_v58, 0 }
 0x335   :  { %1699 = vmatpush.msrb.mxu3 %v1589_v51  ;;  %1680 = vmatpush.msrb.mxu2 %v1569_v48 }
 0x336   :  { %v1147_v5 = vmax.f32 %v1135_v21, 0.0  ;;  %1635 = vmatpush.msra.mxu0 %v1600_v23  ;;  %v1583_v21 = vld [vmem:[#allocation16 + $0xa8] sm:$0xff] }
 0x337   :  { %1700 = vmatpush.msrb.mxu3 %v1588_v49  ;;  %1681 = vmatpush.msrb.mxu2 %v1568_v4  ;;  %v1754_v4 = vld [vmem:[#allocation21 + $0xe0] sm:$0xff]  ;;  %v1751_v23 = vld [vmem:[#allocation21 + $0xc8] sm:$0xff] }
 0x338   :  { %v1165_v6 = vmul.f32 %v1151_v46, %v1147_v5  ;;  %v1623_v46 = vld [vmem:[#allocation18 + $0xe8] sm:$0xff]  ;;  %1636 = vmatpush.msra.mxu0 %v1599_v22 }
 0x339   :  { %1651 = vmatpush.msra.mxu1 %v1623_v46  ;;  %1701 = vmatpush.msrb.mxu3 %v1587_v37  ;;  %v1563_v5 = vld [vmem:[#allocation16 + $0x8] sm:$0xff]  ;;  %v1757_v46 = vld [vmem:[#allocation21 + $0xf8] sm:$0xff]  ;;  %v1550_v37 = vld [vmem:[%s3644_s19] sm:$0x3] }
 0x33a   :  { %v1183_v13 = vadd.f32 %v1169_v14, %v1165_v6  ;;  %v1622_v14 = vld [vmem:[#allocation18 + $0xe0] sm:$0xff]  ;;  %1682 = vmatpush.msrb.mxu2 %v1567_v30  ;;  %1637 = vmatpush.msra.mxu0 %v1598_v31  ;;  %v3588_v30 = vperm.slane %v1538_v3, 0 }
 0x33b   :  { %1652 = vmatpush.msra.mxu1 %v1622_v14  ;;  %1702 = vmatpush.msrb.mxu3 %v1586_v53  ;;  %v1752_v53 = vld [vmem:[#allocation21 + $0xd0] sm:$0xff] }
 0x33c   :  { %1360 = vmatmul.f32.gmra.mxu1 %v1183_v13  ;;  %1412 = vmatmul.f32.gmra.mxu3 %v1183_v13  ;;  %v1617_v13 = vld [vmem:[#allocation18 + $0xb8] sm:$0xff] }
 0x33d   :  { %1653 = vmatpush.msra.mxu1 %v1621_v26  ;;  %1683 = vmatpush.msrb.mxu2 %v1566_v1  ;;  %v1788_v26 = vld [vmem:[#allocation22 + $0xf0] sm:$0xff] }
 0x33e   :  { %1703 = vmatpush.msrb.mxu3 %v1585_v10  ;;  %1638 = vmatpush.msra.mxu0 %v1597_v19  ;;  %v1789_v10 = vld [vmem:[#allocation22 + $0xf8] sm:$0xff] }
 0x33f   :  { %1654 = vmatpush.msra.mxu1 %v1620_v36  ;;  %1684 = vmatpush.msrb.mxu2 %v1565_v54  ;;  %v3590_v36 = vperm.slane %v1550_v37, 0 }
 0x340   :  { %1704 = vmatpush.msrb.mxu3 %v1584_v12  ;;  %1639 = vmatpush.msra.mxu0 %v1596_v24  ;;  %v3592_v12 = vperm.slane %v1520_v58, 1 }
 0x341   :  { %1655 = vmatpush.msra.mxu1 %v1619_v43  ;;  %1685 = vmatpush.msrb.mxu2 %v1564_v55  ;;  %v1786_v43 = vld [vmem:[#allocation22 + $0xe0] sm:$0xff]  ;;  %v1787_v55 = vld [vmem:[#allocation22 + $0xe8] sm:$0xff] }
 0x342   :  { %1705 = vmatpush.msrb.mxu3 %v1583_v21  ;;  %1640 = vmatpush.msra.mxu0 %v1595_v41 }
 0x343   :  { %1656 = vmatpush.msra.mxu1 %v1618_v25  ;;  %1686 = vmatpush.msrb.mxu2 %v1563_v5  ;;  %v1748_v5 = vld [vmem:[#allocation21 + $0xb0] sm:$0xff] }
 0x344   :  { %1458 = vmatmul.f32.vlgmr.msrb.gmra.mxu1 %v1173_v16  ;;  %1510 = vmatmul.f32.vlgmr.msra.gmra.mxu3 %v1173_v16  ;;  %v1616_v16 = vld [vmem:[#allocation18 + $0xb0] sm:$0xff] }
 0x345   :  { %1706 = vmatpush.msrb.mxu3 %v1582_v63  ;;  %1657 = vmatpush.msra.mxu1 %v1617_v13  ;;  %v1541_v63 = vperm.slane %v1538_v3, 1 }
 0x346   :  { %1687 = vmatpush.msrb.mxu2 %v1562_v7  ;;  %1641 = vmatpush.msra.mxu0 %v1594_v39 }
 0x347   :  { %1707 = vmatpush.msrb.mxu3 %v1581_v42  ;;  %1658 = vmatpush.msra.mxu1 %v1616_v16  ;;  %v1746_v16 = vld [vmem:[#allocation21 + $0xa0] sm:$0xff] }
 0x348   :  { %1830 = vmatpush.msra.mxu2 %v1756_v45  ;;  %1790 = vmatpush.msrb.mxu0 %v1788_v26  ;;  %v1783_v26 = vld [vmem:[#allocation22 + $0xc8] sm:$0xff] }
 0x349   :  { %1708 = vmatpush.msrb.mxu3 %v1580_v27  ;;  %1659 = vmatpush.msra.mxu1 %v1615_v9  ;;  %v1747_v27 = vld [vmem:[#allocation21 + $0xa8] sm:$0xff] }
 0x34a   :  { %1831 = vmatpush.msra.mxu2 %v1754_v4  ;;  %1791 = vmatpush.msrb.mxu0 %v1786_v43  ;;  %v1738_v43 = vld [vmem:[#allocation21 + $0x60] sm:$0xff] }
 0x34b   :  { %v3565_v50 = vpop.f32.mrf.mxu0  ;;  %1709 = vmatpush.msrb.mxu3 %v1579_v33 }
 0x34c   :  { %1461 = vmatmul.f32.gmra.mxu1 %v1175_v59  ;;  %1513 = vmatmul.f32.gmra.mxu3 %v1175_v59 }
 0x34d   :  { %1710 = vmatpush.msrb.mxu3 %v1578_v38  ;;  %1832 = vmatpush.msra.mxu2 %v1752_v53  ;;  %v1744_v53 = vld [vmem:[#allocation21 + $0x90] sm:$0xff] }
 0x34f   :  { %1850 = vmatpush.msra.mxu3 %v1757_v46 }
 0x351   :  { %v3567_v8 = vpop.f32.mrf.mxu2  ;;  %1851 = vmatpush.msra.mxu3 %v1755_v11 }
 0x353   :  { %v3569_v20 = vpop.f32.mrf.mxu0  ;;  %1852 = vmatpush.msra.mxu3 %v1753_v40  ;;  %v1745_v40 = vld [vmem:[#allocation21 + $0x98] sm:$0xff] }
 0x354   :  { %1464 = vmatmul.f32.gmra.mxu1 %v1177_v60  ;;  %1516 = vmatmul.f32.gmra.mxu3 %v1177_v60  ;;  %v1614_v60 = vld [vmem:[#allocation18 + $0xa0] sm:$0xff] }
 0x355   :  { %1660 = vmatpush.msra.mxu1 %v1614_v60  ;;  %1853 = vmatpush.msra.mxu3 %v1751_v23  ;;  %v1779_v23 = vld [vmem:[#allocation22 + $0xa8] sm:$0xff] }
 0x357   :  { %1661 = vmatpush.msra.mxu1 %v1613_v2 }
 0x359   :  { %v3571_v29 = vpop.f32.mrf.mxu2  ;;  %1662 = vmatpush.msra.mxu1 %v1612_v17 }
 0x35b   :  { %v3573_v44 = vpop.f32.mrf.mxu0  ;;  %1663 = vmatpush.msra.mxu1 %v1611_v47 }
 0x35d   :  { %1664 = vmatpush.msra.mxu1 %v1610_v34 }
 0x35f   :  { %1810 = vmatpush.msrb.mxu1 %v1789_v10  ;;  %v1780_v10 = vld [vmem:[#allocation22 + $0xb0] sm:$0xff] }
 0x361   :  { %v3575_v56 = vpop.f32.mrf.mxu2  ;;  %1811 = vmatpush.msrb.mxu1 %v1787_v55  ;;  %v1739_v55 = vld [vmem:[#allocation21 + $0x68] sm:$0xff] }
 0x363   :  { %v1433_v0 = vpop.f32.mrf.mxu0 }
 0x369   :  { %v1485_v51 = vpop.f32.mrf.mxu2 }
 0x36b   :  { %v1436_v1 = vpop.f32.mrf.mxu0 }
 0x371   :  { %v1488_v24 = vpop.f32.mrf.mxu2 }
 0x3a9   :  { %v1355_v6 = vpop.f32.mrf.mxu1 }
 0x3aa   :  { %v1356_v57 = vadd.f32 %v1355_v6, %v3565_v50  ;;  %v1749_v6 = vld [vmem:[#allocation21 + $0xb8] sm:$0xff] }
 0x3ab   :  { %1854 = vmatpush.msra.mxu3 %v1749_v6  ;;  %v1775_v6 = vld [vmem:[#allocation22 + $0x88] sm:$0xff] }
 0x3ac   :  { %v1434_v62 = vadd.f32 %v1433_v0, %v1356_v57 }
 0x3ad   :  { %1855 = vmatpush.msra.mxu3 %v1747_v27  ;;  %v1771_v27 = vld [vmem:[#allocation22 + $0x68] sm:$0xff] }
 0x3af   :  { %v1407_v59 = vpop.f32.mrf.mxu3  ;;  %1856 = vmatpush.msra.mxu3 %v1745_v40 }
 0x3b0   :  { %v1408_v48 = vadd.f32 %v1407_v59, %v3567_v8  ;;  %v1750_v8 = vld [vmem:[#allocation21 + $0xc0] sm:$0xff]  ;;  %v1553_v59 = vperm.slane %v1550_v37, 1 }
 0x3b1   :  { %v1358_v32 = vpop.f32.mrf.mxu1  ;;  %1833 = vmatpush.msra.mxu2 %v1750_v8  ;;  %v1743_v8 = vld [vmem:[#allocation21 + $0x88] sm:$0xff] }
 0x3b2   :  { %v1359_v50 = vadd.f32 %v1358_v32, %v3569_v20  ;;  %v1486_v54 = vadd.f32 %v1485_v51, %v1408_v48  ;;  %v1439_v32 = vpop.f32.mrf.mxu0  ;;  %v1491_v51 = vpop.f32.mrf.mxu2  ;;  %1857 = vmatpush.msra.mxu3 %v1743_v8 }
 0x3b3   :  { %1834 = vmatpush.msra.mxu2 %v1748_v5  ;;  %v1774_v5 = vld [vmem:[#allocation22 + $0x80] sm:$0xff] }
 0x3b4   :  { %v1437_v25 = vadd.f32 %v1436_v1, %v1359_v50  ;;  %v1784_v50 = vld [vmem:[#allocation22 + $0xd0] sm:$0xff]  ;;  %v1742_v1 = vld [vmem:[#allocation21 + $0x80] sm:$0xff] }
 0x3b5   :  { %1835 = vmatpush.msra.mxu2 %v1746_v16  ;;  %1792 = vmatpush.msrb.mxu0 %v1784_v50  ;;  %v1770_v16 = vld [vmem:[#allocation22 + $0x60] sm:$0xff] }
 0x3b6   :  { %v1920_v50 = vld [vmem:[#allocation28 + $0xc0] sm:$0xff] }
 0x3b7   :  { %v1410_v28 = vpop.f32.mrf.mxu3  ;;  %1836 = vmatpush.msra.mxu2 %v1744_v53 }
 0x3b8   :  { %v1411_v13 = vadd.f32 %v1410_v28, %v3571_v29 }
 0x3b9   :  { %v3577_v35 = vpop.f32.mrf.mxu1  ;;  %1837 = vmatpush.msra.mxu2 %v1742_v1 }
 0x3ba   :  { %v1362_v9 = vadd.f32 %v3577_v35, %v3573_v44  ;;  %v1489_v38 = vadd.f32 %v1488_v24, %v1411_v13  ;;  %v1772_v13 = vld [vmem:[#allocation22 + $0x70] sm:$0xff]  ;;  %v1730_v24 = vld [vmem:[#allocation21 + $0x20] sm:$0xff] }
 0x3bc   :  { %v1440_v28 = vadd.f32 %v1439_v32, %v1362_v9  ;;  %v1731_v9 = vld [vmem:[#allocation21 + $0x28] sm:$0xff]  ;;  %v1726_v32 = vld [vmem:[#allocation21] sm:$0xff] }
 0x3bf   :  { %v3580_v61 = vpop.f32.mrf.mxu3 }
 0x3c0   :  { %v1414_v44 = vadd.f32 %v3580_v61, %v3575_v56 }
 0x3c1   :  { %v1459_v52 = vpop.f32.mrf.mxu1 }
 0x3c2   :  { %v1460_v49 = vadd.f32 %v1459_v52, %v1434_v62  ;;  %v1492_v48 = vadd.f32 %v1491_v51, %v1414_v44  ;;  %v1761_v44 = vld [vmem:[#allocation22 + $0x18] sm:$0xff] }
 0x3c3   :  { %v1926_v51 = vld [vmem:[#allocation28 + $0xf0] sm:$0xff] }
 0x3c4   :  { %v1526_v14 = vadd.f32 %v3582_v18, %v1460_v49 }
 0x3c6   :  { %v1532_v15 = vmax.f32 %v1526_v14, 0.0  ;;  %v1785_v14 = vld [vmem:[#allocation22 + $0xd8] sm:$0xff] }
 0x3c7   :  { %v1511_v20 = vpop.f32.mrf.mxu3  ;;  %1812 = vmatpush.msrb.mxu1 %v1785_v14 }
 0x3c8   :  { %v1544_v21 = vmul.f32 %v3588_v30, %v1532_v15  ;;  %v1512_v22 = vadd.f32 %v1511_v20, %v1486_v54  ;;  %v1781_v15 = vld [vmem:[#allocation22 + $0xb8] sm:$0xff]  ;;  %v1776_v20 = vld [vmem:[#allocation22 + $0x90] sm:$0xff] }
 0x3c9   :  { %v1462_v31 = vpop.f32.mrf.mxu1  ;;  %1813 = vmatpush.msrb.mxu1 %v1783_v26  ;;  %v1741_v54 = vld [vmem:[#allocation21 + $0x78] sm:$0xff] }
 0x3ca   :  { %v1556_v7 = vadd.f32 %v3590_v36, %v1544_v21  ;;  %v1527_v42 = vadd.f32 %v3592_v12, %v1512_v22  ;;  %v1463_v19 = vadd.f32 %v1462_v31, %v1437_v25  ;;  %1858 = vmatpush.msra.mxu3 %v1741_v54  ;;  %v1777_v21 = vld [vmem:[#allocation22 + $0x98] sm:$0xff]  ;;  %v1736_v22 = vld [vmem:[#allocation21 + $0x50] sm:$0xff]  ;;  %v1735_v31 = vld [vmem:[#allocation21 + $0x48] sm:$0xff] }
 0x3cb   :  { %1814 = vmatpush.msrb.mxu1 %v1781_v15  ;;  %v1737_v25 = vld [vmem:[#allocation21 + $0x58] sm:$0xff] }
 0x3cc   :  { %v1533_v33 = vmax.f32 %v1527_v42, 0.0  ;;  %v1528_v41 = vadd.f32 %v3582_v18, %v1463_v19  ;;  %1688 = vmatmul.f32.vlgmr.msrb.gmra.mxu2 %v1556_v7  ;;  %1859 = vmatpush.msra.mxu3 %v1739_v55  ;;  %v1773_v7 = vld [vmem:[#allocation22 + $0x78] sm:$0xff]  ;;  %v1732_v42 = vld [vmem:[#allocation21 + $0x30] sm:$0xff] }
 0x3cd   :  { %1815 = vmatpush.msrb.mxu1 %v1779_v23  ;;  %v1733_v19 = vld [vmem:[#allocation21 + $0x38] sm:$0xff] }
 0x3ce   :  { %v1545_v29 = vmul.f32 %v1541_v63, %v1533_v33  ;;  %v1534_v60 = vmax.f32 %v1528_v41, 0.0  ;;  %1860 = vmatpush.msra.mxu3 %v1737_v25  ;;  %v1768_v33 = vld [vmem:[#allocation22 + $0x50] sm:$0xff]  ;;  %v1919_v26 = vld [vmem:[#allocation28 + $0xb8] sm:$0xff] }
 0x3cf   :  { %v1514_v39 = vpop.f32.mrf.mxu3  ;;  %1816 = vmatpush.msrb.mxu1 %v1777_v21  ;;  %v1728_v41 = vld [vmem:[#allocation21 + $0x10] sm:$0xff] }
 0x3d0   :  { %v1557_v2 = vadd.f32 %v1553_v59, %v1545_v29  ;;  %v1546_v17 = vmul.f32 %v3588_v30, %v1534_v60  ;;  %v1515_v47 = vadd.f32 %v1514_v39, %v1489_v38  ;;  %1861 = vmatpush.msra.mxu3 %v1735_v31  ;;  %v1729_v29 = vld [vmem:[#allocation21 + $0x18] sm:$0xff]  ;;  %v1766_v60 = vld [vmem:[#allocation22 + $0x40] sm:$0xff]  ;;  %v1767_v38 = vld [vmem:[#allocation22 + $0x48] sm:$0xff] }
 0x3d1   :  { %v1465_v34 = vpop.f32.mrf.mxu1  ;;  %1817 = vmatpush.msrb.mxu1 %v1775_v6  ;;  %v1727_v39 = vld [vmem:[#allocation21 + $0x8] sm:$0xff]  ;;  %v1902_v6 = vld [vmem:[#allocation28 + $0x30] sm:$0xff] }
 0x3d2   :  { %v1558_v35 = vadd.f32 %v3590_v36, %v1546_v17  ;;  %v1529_v0 = vadd.f32 %v3592_v12, %v1515_v47  ;;  %v1466_v57 = vadd.f32 %v1465_v34, %v1440_v28  ;;  %1711 = vmatmul.f32.vlgmr.msrb.gmra.mxu3 %v1557_v2  ;;  %v1764_v2 = vld [vmem:[#allocation22 + $0x30] sm:$0xff]  ;;  %v1765_v17 = vld [vmem:[#allocation22 + $0x38] sm:$0xff]  ;;  %v1762_v47 = vld [vmem:[#allocation22 + $0x20] sm:$0xff] }
 0x3d3   :  { %1818 = vmatpush.msrb.mxu1 %v1773_v7  ;;  %1862 = vmatpush.msra.mxu3 %v1733_v19  ;;  %v1763_v28 = vld [vmem:[#allocation22 + $0x28] sm:$0xff]  ;;  %v1760_v34 = vld [vmem:[#allocation22 + $0x10] sm:$0xff]  ;;  %v1899_v19 = vld [vmem:[#allocation28 + $0x18] sm:$0xff] }
 0x3d4   :  { %v1535_v58 = vmax.f32 %v1529_v0, 0.0  ;;  %v1530_v62 = vadd.f32 %v3582_v18, %v1466_v57  ;;  %1642 = vmatmul.f32.vlgmr.msra.gmra.mxu0 %v1558_v35  ;;  %1691 = vmatmul.f32.gmra.mxu2 %v1558_v35  ;;  %v1758_v35 = vld [vmem:[#allocation22] sm:$0xff]  ;;  %v1759_v0 = vld [vmem:[#allocation22 + $0x8] sm:$0xff] }
 0x3d5   :  { %1819 = vmatpush.msrb.mxu1 %v1771_v27  ;;  %1863 = vmatpush.msra.mxu3 %v1731_v9  ;;  %v1911_v57 = vld [vmem:[#allocation28 + $0x78] sm:$0xff]  ;;  %v1901_v31 = vld [vmem:[#allocation28 + $0x28] sm:$0xff]  ;;  %v1900_v7 = vld [vmem:[#allocation28 + $0x20] sm:$0xff] }
 0x3d6   :  { %v1547_v52 = vmul.f32 %v1541_v63, %v1535_v58  ;;  %v1536_v3 = vmax.f32 %v1530_v62, 0.0  ;;  %v1927_v58 = vld [vmem:[#allocation28 + $0xf8] sm:$0xff]  ;;  %v1910_v62 = vld [vmem:[#allocation28 + $0x70] sm:$0xff]  ;;  %v1897_v9 = vld [vmem:[#allocation28 + $0x8] sm:$0xff] }
 0x3d7   :  { %v1517_v49 = vpop.f32.mrf.mxu3  ;;  %1864 = vmatpush.msra.mxu3 %v1729_v29  ;;  %v1898_v27 = vld [vmem:[#allocation28 + $0x10] sm:$0xff]  ;;  %v1990_v29 = vld [vmem:[#allocation31 + $0x78] sm:$0xff] }
 0x3d8   :  { %v1559_v45 = vadd.f32 %v1553_v59, %v1547_v52  ;;  %v1548_v46 = vmul.f32 %v3588_v30, %v1536_v3  ;;  %v1518_v56 = vadd.f32 %v1517_v49, %v1492_v48  ;;  %v1782_v30 = vld [vmem:[#allocation22 + $0xc0] sm:$0xff]  ;;  %v1909_v52 = vld [vmem:[#allocation28 + $0x68] sm:$0xff] }
 0x3d9   :  { %1793 = vmatpush.msrb.mxu0 %v1782_v30  ;;  %1865 = vmatpush.msra.mxu3 %v1727_v39  ;;  %v1925_v3 = vld [vmem:[#allocation28 + $0xe8] sm:$0xff]  ;;  %v1908_v48 = vld [vmem:[#allocation28 + $0x60] sm:$0xff]  ;;  %v1903_v30 = vld [vmem:[#allocation28 + $0x38] sm:$0xff] }
 0x3da   :  { %v1531_v61 = vadd.f32 %v3592_v12, %v1518_v56  ;;  %1665 = vmatmul.f32.vlgmr.msra.gmra.mxu1 %v1559_v45  ;;  %1714 = vmatmul.f32.gmra.mxu3 %v1559_v45  ;;  %v1560_v4 = vadd.f32 %v3590_v36, %v1548_v46  ;;  %v1740_v36 = vld [vmem:[#allocation21 + $0x70] sm:$0xff]  ;;  %v1778_v12 = vld [vmem:[#allocation22 + $0xa0] sm:$0xff] }
 0x3db   :  { %1794 = vmatpush.msrb.mxu0 %v1780_v10  ;;  %1838 = vmatpush.msra.mxu2 %v1740_v36  ;;  %v1924_v49 = vld [vmem:[#allocation28 + $0xe0] sm:$0xff]  ;;  %v1907_v45 = vld [vmem:[#allocation28 + $0x58] sm:$0xff]  ;;  %v1906_v56 = vld [vmem:[#allocation28 + $0x50] sm:$0xff] }
 0x3dc   :  { %v1537_v37 = vmax.f32 %v1531_v61, 0.0  ;;  %1645 = vmatmul.f32.gmra.mxu0 %v1560_v4  ;;  %v1923_v46 = vld [vmem:[#allocation28 + $0xd8] sm:$0xff]  ;;  %v1922_v61 = vld [vmem:[#allocation28 + $0xd0] sm:$0xff]  ;;  %v1905_v4 = vld [vmem:[#allocation28 + $0x48] sm:$0xff] }
 0x3dd   :  { %1795 = vmatpush.msrb.mxu0 %v1778_v12  ;;  %1839 = vmatpush.msra.mxu2 %v1738_v43  ;;  %v2182_v10 = vld [vmem:[#allocation19] ss:$0 sm:$0xff]  ;;  %v1986_v39 = vld [vmem:[#allocation31 + $0x58] sm:$0xff] }
 0x3de   :  { %v1549_v18 = vmul.f32 %v1541_v63, %v1537_v37  ;;  %v1734_v63 = vld [vmem:[#allocation21 + $0x40] sm:$0xff]  ;;  %v1921_v37 = vld [vmem:[#allocation28 + $0xc8] sm:$0xff] }
 0x3df   :  { %1796 = vmatpush.msrb.mxu0 %v1776_v20  ;;  %1840 = vmatpush.msra.mxu2 %v1736_v22 }
 0x3e0   :  { %v1561_v11 = vadd.f32 %v1553_v59, %v1549_v18  ;;  %v1769_v59 = vld [vmem:[#allocation22 + $0x58] sm:$0xff] }
 0x3e1   :  { %1797 = vmatpush.msrb.mxu0 %v1774_v5  ;;  %1841 = vmatpush.msra.mxu2 %v1734_v63  ;;  %v1918_v63 = vld [vmem:[#allocation28 + $0xb0] sm:$0xff] }
 0x3e2   :  { %1668 = vmatmul.f32.gmra.mxu1 %v1561_v11  ;;  %v1904_v11 = vld [vmem:[#allocation28 + $0x40] sm:$0xff] }
 0x3e3   :  { %1798 = vmatpush.msrb.mxu0 %v1772_v13  ;;  %1842 = vmatpush.msra.mxu2 %v1732_v42  ;;  %v1917_v13 = vld [vmem:[#allocation28 + $0xa8] sm:$0xff]  ;;  %v1916_v42 = vld [vmem:[#allocation28 + $0xa0] sm:$0xff] }
 0x3e4   :  { %1820 = vmatpush.msrb.mxu1 %v1769_v59  ;;  %v1896_v59 = vld [vmem:[#allocation28] sm:$0xff] }
 0x3e5   :  { %1799 = vmatpush.msrb.mxu0 %v1770_v16  ;;  %1843 = vmatpush.msra.mxu2 %v1730_v24  ;;  %v1915_v16 = vld [vmem:[#allocation28 + $0x98] sm:$0xff]  ;;  %v1914_v24 = vld [vmem:[#allocation28 + $0x90] sm:$0xff] }
 0x3e6   :  { %1821 = vmatpush.msrb.mxu1 %v1767_v38  ;;  %v1988_v38 = vld [vmem:[#allocation31 + $0x68] sm:$0xff] }
 0x3e7   :  { %1800 = vmatpush.msrb.mxu0 %v1768_v33  ;;  %1844 = vmatpush.msra.mxu2 %v1728_v41  ;;  %v1913_v33 = vld [vmem:[#allocation28 + $0x88] sm:$0xff]  ;;  %v1912_v41 = vld [vmem:[#allocation28 + $0x80] sm:$0xff] }
 0x3e8   :  { %1822 = vmatpush.msrb.mxu1 %v1765_v17  ;;  %v1984_v17 = vld [vmem:[#allocation31 + $0x48] sm:$0xff] }
 0x3e9   :  { %1801 = vmatpush.msrb.mxu0 %v1766_v60  ;;  %1845 = vmatpush.msra.mxu2 %v1726_v32  ;;  %v1989_v60 = vld [vmem:[#allocation31 + $0x70] sm:$0xff]  ;;  %v1987_v32 = vld [vmem:[#allocation31 + $0x60] sm:$0xff] }
 0x3ea   :  { %1823 = vmatpush.msrb.mxu1 %v1763_v28  ;;  %v1982_v28 = vld [vmem:[#allocation31 + $0x38] sm:$0xff] }
 0x3eb   :  { %1802 = vmatpush.msrb.mxu0 %v1764_v2  ;;  %1995 = vmatpush.msrb.mxu2 %v1990_v29  ;;  %v1985_v2 = vld [vmem:[#allocation31 + $0x50] sm:$0xff] }
 0x3ec   :  { %1824 = vmatpush.msrb.mxu1 %v1761_v44  ;;  %v1870_v44 = vld [vmem:[#allocation24] sm:$0x3] }
 0x3ed   :  { %1803 = vmatpush.msrb.mxu0 %v1762_v47  ;;  %1996 = vmatpush.msrb.mxu2 %v1989_v60  ;;  %v1983_v47 = vld [vmem:[#allocation31 + $0x40] sm:$0xff] }
 0x3ee   :  { %1825 = vmatpush.msrb.mxu1 %v1759_v0 }
 0x3ef   :  { %1804 = vmatpush.msrb.mxu0 %v1760_v34  ;;  %1997 = vmatpush.msrb.mxu2 %v1988_v38  ;;  %v1981_v34 = vld [vmem:[#allocation31 + $0x30] sm:$0xff]  ;;  %v2185_v38 = vld [vmem:[#allocation36] ss:$0 sm:$0xff] }
 0x3f0   :  { %1952 = vmatpush.msra.mxu1 %v1927_v58  ;;  %v1872_v58 = vperm.slane %v1870_v44, 0 }
 0x3f1   :  { %1805 = vmatpush.msrb.mxu0 %v1758_v35  ;;  %1998 = vmatpush.msrb.mxu2 %v1987_v32  ;;  %v1980_v35 = vld [vmem:[#allocation31 + $0x28] sm:$0xff] }
 0x3f2   :  { %1953 = vmatpush.msra.mxu1 %v1926_v51  ;;  %v1979_v51 = vld [vmem:[#allocation31 + $0x20] sm:$0xff] }
 0x3f3   :  { %1932 = vmatpush.msra.mxu0 %v1911_v57  ;;  %1999 = vmatpush.msrb.mxu2 %v1986_v39 }
 0x3f4   :  { %1954 = vmatpush.msra.mxu1 %v1925_v3  ;;  %v1880_v3 = vld [vmem:[#allocation25] sm:$0x3] }
 0x3f5   :  { %1933 = vmatpush.msra.mxu0 %v1910_v62  ;;  %2000 = vmatpush.msrb.mxu2 %v1985_v2  ;;  %v1873_v62 = vperm.slane %v1870_v44, 1 }
 0x3f6   :  { %1955 = vmatpush.msra.mxu1 %v1924_v49 }
 0x3f7   :  { %1934 = vmatpush.msra.mxu0 %v1909_v52  ;;  %2001 = vmatpush.msrb.mxu2 %v1984_v17 }
 0x3f8   :  { %1956 = vmatpush.msra.mxu1 %v1923_v46  ;;  %v1888_v46 = vld [vmem:[#allocation27] sm:$0x3] }
 0x3f9   :  { %1935 = vmatpush.msra.mxu0 %v1908_v48  ;;  %2002 = vmatpush.msrb.mxu2 %v1983_v47 }
 0x3fa   :  { %1957 = vmatpush.msra.mxu1 %v1922_v61  ;;  %v1882_v61 = vperm.slane %v1880_v3, 0 }
 0x3fb   :  { %1936 = vmatpush.msra.mxu0 %v1907_v45  ;;  %2003 = vmatpush.msrb.mxu2 %v1982_v28 }
 0x3fc   :  { %1958 = vmatpush.msra.mxu1 %v1921_v37  ;;  %v1883_v37 = vperm.slane %v1880_v3, 1 }
 0x3fd   :  { %1937 = vmatpush.msra.mxu0 %v1906_v56  ;;  %2004 = vmatpush.msrb.mxu2 %v1981_v34 }
 0x3fe   :  { %1959 = vmatpush.msra.mxu1 %v1920_v50 }
 0x3ff   :  { %1938 = vmatpush.msra.mxu0 %v1905_v4  ;;  %2005 = vmatpush.msrb.mxu2 %v1980_v35 }
 0x400   :  { %1960 = vmatpush.msra.mxu1 %v1919_v26 }
 0x401   :  { %1939 = vmatpush.msra.mxu0 %v1904_v11  ;;  %2006 = vmatpush.msrb.mxu2 %v1979_v51  ;;  %v1890_v11 = vperm.slane %v1888_v46, 0 }
 0x402   :  { %1961 = vmatpush.msra.mxu1 %v1918_v63 }
 0x403   :  { %1940 = vmatpush.msra.mxu0 %v1903_v30 }
 0x404   :  { %1962 = vmatpush.msra.mxu1 %v1917_v13 }
 0x405   :  { %1941 = vmatpush.msra.mxu0 %v1902_v6  ;;  %v2183_v6 = vld [vmem:[#allocation30] ss:$0 sm:$0xff] }
 0x406   :  { %1963 = vmatpush.msra.mxu1 %v1916_v42 }
 0x407   :  { %1942 = vmatpush.msra.mxu0 %v1901_v31 }
 0x408   :  { %1964 = vmatpush.msra.mxu1 %v1915_v16  ;;  %v2020_v16 = vld [vmem:[#allocation34 + $0x20] sm:$0xff] }
 0x409   :  { %1943 = vmatpush.msra.mxu0 %v1900_v7 }
 0x40a   :  { %1965 = vmatpush.msra.mxu1 %v1914_v24  ;;  %v2018_v24 = vld [vmem:[#allocation34 + $0x10] sm:$0xff] }
 0x40b   :  { %1944 = vmatpush.msra.mxu0 %v1899_v19 }
 0x40c   :  { %1966 = vmatpush.msra.mxu1 %v1913_v33  ;;  %v2016_v33 = vld [vmem:[#allocation34] sm:$0xff] }
 0x40d   :  { %1945 = vmatpush.msra.mxu0 %v1898_v27  ;;  %v2019_v27 = vld [vmem:[#allocation34 + $0x18] sm:$0xff] }
 0x40e   :  { %1967 = vmatpush.msra.mxu1 %v1912_v41 }
 0x40f   :  { %1946 = vmatpush.msra.mxu0 %v1897_v9  ;;  %v2017_v9 = vld [vmem:[#allocation34 + $0x8] sm:$0xff] }
 0x411   :  { %1947 = vmatpush.msra.mxu0 %v1896_v59  ;;  %v2184_v59 = vld [vmem:[#allocation33] ss:$0 sm:$0xff] }
 0x44f   :  { %v1689_v14 = vpop.f32.mrf.mxu2 }
 0x451   :  { %v1643_v18 = vpop.f32.mrf.mxu0 }
 0x455   :  { %v1712_v1 = vpop.f32.mrf.mxu3 }
 0x457   :  { %v1666_v53 = vpop.f32.mrf.mxu1  ;;  %v1692_v55 = vpop.f32.mrf.mxu2 }
 0x458   :  { %v1667_v40 = vadd.f32 %v1666_v53, %v1643_v18 }
 0x459   :  { %v1646_v54 = vpop.f32.mrf.mxu0 }
 0x45a   :  { %v1690_v8 = vadd.f32 %v1689_v14, %v1667_v40  ;;  %v1891_v14 = vperm.slane %v1888_v46, 1 }
 0x45c   :  { %v1713_v15 = vadd.f32 %v1712_v1, %v1690_v8  ;;  %v1978_v1 = vld [vmem:[#allocation31 + $0x18] sm:$0xff]  ;;  %v1977_v8 = vld [vmem:[#allocation31 + $0x10] sm:$0xff] }
 0x45d   :  { %v1715_v21 = vpop.f32.mrf.mxu3  ;;  %2007 = vmatpush.msrb.mxu2 %v1978_v1 }
 0x45e   :  { %v1722_v36 = vadd.f32 %v2182_v10, %v1713_v15  ;;  %v1975_v15 = vld [vmem:[#allocation31] sm:$0xff] }
 0x45f   :  { %v1669_v12 = vpop.f32.mrf.mxu1  ;;  %2008 = vmatpush.msrb.mxu2 %v1977_v8 }
 0x460   :  { %v1724_v23 = vmax.f32 %v1722_v36, 0.0  ;;  %v1670_v43 = vadd.f32 %v1669_v12, %v1646_v54  ;;  %v2031_v36 = vld [vmem:[#allocation34 + $0x78] sm:$0xff]  ;;  %v2030_v54 = vld [vmem:[#allocation34 + $0x70] sm:$0xff]  ;;  %v2029_v12 = vld [vmem:[#allocation34 + $0x68] sm:$0xff] }
 0x461   :  { %2036 = vmatpush.msrb.mxu3 %v2031_v36 }
 0x462   :  { %v1693_v20 = vadd.f32 %v1692_v55, %v1670_v43  ;;  %1846 = vmatmul.f32.vlgmr.msra.gmra.mxu2 %v1724_v23  ;;  %1866 = vmatmul.f32.vlgmr.msra.gmra.mxu3 %v1724_v23  ;;  %v2028_v23 = vld [vmem:[#allocation34 + $0x60] sm:$0xff]  ;;  %v2027_v43 = vld [vmem:[#allocation34 + $0x58] sm:$0xff]  ;;  %v2026_v55 = vld [vmem:[#allocation34 + $0x50] sm:$0xff] }
 0x463   :  { %2037 = vmatpush.msrb.mxu3 %v2030_v54 }
 0x464   :  { %v1716_v22 = vadd.f32 %v1715_v21, %v1693_v20  ;;  %v2025_v20 = vld [vmem:[#allocation34 + $0x48] sm:$0xff]  ;;  %v2024_v21 = vld [vmem:[#allocation34 + $0x40] sm:$0xff] }
 0x465   :  { %2038 = vmatpush.msrb.mxu3 %v2029_v12 }
 0x466   :  { %v1723_v25 = vadd.f32 %v2182_v10, %v1716_v22  ;;  %v1976_v10 = vld [vmem:[#allocation31 + $0x8] sm:$0xff]  ;;  %v2023_v22 = vld [vmem:[#allocation34 + $0x38] sm:$0xff] }
 0x467   :  { %2009 = vmatpush.msrb.mxu2 %v1976_v10  ;;  %2039 = vmatpush.msrb.mxu3 %v2028_v23 }
 0x468   :  { %v1725_v5 = vmax.f32 %v1723_v25, 0.0  ;;  %v2022_v25 = vld [vmem:[#allocation34 + $0x30] sm:$0xff] }
 0x469   :  { %2010 = vmatpush.msrb.mxu2 %v1975_v15  ;;  %2040 = vmatpush.msrb.mxu3 %v2027_v43 }
 0x46a   :  { %1806 = vmatmul.f32.vlgmr.msrb.gmra.mxu0 %v1725_v5  ;;  %1826 = vmatmul.f32.vlgmr.msrb.gmra.mxu1 %v1725_v5  ;;  %v2021_v5 = vld [vmem:[#allocation34 + $0x28] sm:$0xff] }
 0x46b   :  { %2041 = vmatpush.msrb.mxu3 %v2026_v55 }
 0x46d   :  { %2042 = vmatpush.msrb.mxu3 %v2025_v20 }
 0x46f   :  { %2043 = vmatpush.msrb.mxu3 %v2024_v21 }
 0x471   :  { %2044 = vmatpush.msrb.mxu3 %v2023_v22 }
 0x473   :  { %2045 = vmatpush.msrb.mxu3 %v2022_v25 }
 0x475   :  { %2046 = vmatpush.msrb.mxu3 %v2021_v5 }
 0x477   :  { %2047 = vmatpush.msrb.mxu3 %v2020_v16 }
 0x479   :  { %2048 = vmatpush.msrb.mxu3 %v2019_v27 }
 0x47b   :  { %2049 = vmatpush.msrb.mxu3 %v2018_v24 }
 0x47d   :  { %2050 = vmatpush.msrb.mxu3 %v2017_v9 }
 0x47f   :  { %2051 = vmatpush.msrb.mxu3 %v2016_v33 }
 0x4e5   :  { %v1847_v0 = vpop.f32.mrf.mxu2  ;;  %v1867_v57 = vpop.f32.mrf.mxu3 }
 0x4e7   :  { %v1807_v52 = vpop.f32.mrf.mxu0  ;;  %v1827_v48 = vpop.f32.mrf.mxu1 }
 0x4e8   :  { %v1848_v49 = vadd.f32 %v1847_v0, %v1807_v52  ;;  %v1868_v45 = vadd.f32 %v1867_v57, %v1827_v48 }
 0x4ea   :  { %v1876_v56 = vadd.f32 %v1872_v58, %v1848_v49  ;;  %v1877_v4 = vadd.f32 %v1873_v62, %v1868_v45 }
 0x4ec   :  { %v1878_v18 = vmax.f32 %v1876_v56, 0.0  ;;  %v1879_v50 = vmax.f32 %v1877_v4, 0.0 }
 0x4ee   :  { %v1886_v53 = vmul.f32 %v1882_v61, %v1878_v18  ;;  %v1887_v40 = vmul.f32 %v1883_v37, %v1879_v50 }
 0x4f0   :  { %v1894_v30 = vadd.f32 %v1890_v11, %v1886_v53  ;;  %v1895_v26 = vadd.f32 %v1891_v14, %v1887_v40 }
 0x4f2   :  { %1948 = vmatmul.f32.vlgmr.msra.gmra.mxu0 %v1894_v30  ;;  %1968 = vmatmul.f32.vlgmr.msra.gmra.mxu1 %v1895_v26 }
 0x56f   :  { %v1949_v63 = vpop.f32.mrf.mxu0  ;;  %v1969_v13 = vpop.f32.mrf.mxu1 }
 0x570   :  { %v1950_v31 = vadd.f32 %v2183_v6, %v1949_v63 }
 0x572   :  { %v1970_v7 = vadd.f32 %v1969_v13, %v1950_v31 }
 0x574   :  { %vm1972_vm1 = vcmp.ge.f32.partialorder %v1970_v7, 0.0  ;;  %v1973_v42 = vmul.f32 0.01, %v1970_v7 }
 0x576   :  { %v1974_v19 = vsel %vm1972_vm1, %v1970_v7, %v1973_v42 }
 0x577   :  { %2011 = vmatmul.f32.vlgmr.msrb.gmra.mxu2 %v1974_v19 }
 0x5fa   :  { %v2012_v41 = vpop.f32.mrf.mxu2 }
 0x5fb   :  { %v2013_v29 = vadd.f32 %v2184_v59, %v2012_v41 }
 0x5fd   :  { %2186 = vtanh.f32 %v2013_v29 }
 0x603   :  { %v2187_v60 = vpop.eup %2186 }
 0x604   :  { %2052 = vmatmul.f32.vlgmr.msrb.gmra.mxu3 %v2187_v60 }
 0x687   :  { %v2053_v32 = vpop.f32.mrf.mxu3 }
 0x688   :  { %v2054_v39 = vadd.f32 %v2185_v38, %v2053_v32 }
 0x68a   :  { %2056 = vst [vmem:[%s2973_s6] sm:$0xff] %v2054_v39 }
 0x68b   :  { %2061 = vsyncpa [#allocation3], 1 }
 0x68c   :  { %2062 = vsyncpa [#allocation5], 1 }
 0x68d   :  { %2063 = vsyncpa [#allocation8], 1 }
 0x68e   :  { %2064 = vsyncpa [#allocation11], 1 }
 0x68f   :  { %2065 = vsyncpa [#allocation14], 1 }
 0x690   :  { %2066 = vsyncpa [#allocation17], 1 }
 0x691   :  { %2067 = vsyncpa [#allocation20], 1 }
 0x692   :  { %2068 = vsyncpa [#allocation23], 1 }
 0x693   :  { %2069 = vsyncpa [#allocation26], 1 }
 0x694   :  { %2070 = vsyncpa [#allocation29], 1 }
 0x695   :  { %2071 = vsyncpa [#allocation32], 1 }
 0x696   :  { %2072 = vsyncpa [#allocation35], 1 }

</bundles_post_ra>
